<compile_context>
chip_gen: v7x
topology: tpu7x:2x2x1
jax: 0.10.0
libtpu: 0.0.40
codegen_flags: <defaults>
</compile_context>

<pallas_src>
import functools
import math

import jax
import jax.numpy as jnp
from jax.experimental import pallas as pl
from jax.experimental.pallas import tpu as pltpu


# ----------------------------- Pallas kernel -------------------------------

def _siren_fused_kernel(*refs, num_layers, final_sine):
    """refs = (x_ref, w0, b0, w1, b1, ..., wL, bL, o_ref).

    x_ref : (Din, TN)      feature-major activation tile (batch on lanes)
    wl    : (Doutl, Dinl)  resident in VMEM (omega already folded in)
    bl    : (Doutl, 1)     broadcast along lanes
    o_ref : (Dout_last, TN)
    """
    x_ref = refs[0]
    o_ref = refs[-1]
    wb = refs[1:-1]

    h = x_ref[...].astype(jnp.float32)
    for l in range(num_layers):
        w = wb[2 * l][...]
        b = wb[2 * l + 1][...]
        # (Dout, Din) @ (Din, TN) on the MXU, f32 accumulation; bias add and
        # sine are lane-dense VPU/EUP work.
        z = jnp.dot(w, h, preferred_element_type=jnp.float32) + b
        if l < num_layers - 1 or final_sine:
            h = jnp.sin(z)
        else:
            h = z
    o_ref[...] = h.astype(o_ref.dtype)


def _round_up(x, m):
    return ((x + m - 1) // m) * m


# ------------------------------ Siren forward -------------------------------

@functools.partial(jax.jit, static_argnames=("final_sine",))
def siren_forward(params, coords, final_sine=True):
    """Equivalent of Siren.forward: returns (output, coords).

    params: list of (w, b) with w: (Dout, Din), b: (Dout, 1); omega pre-folded.
    coords: (N, in_features) float32.
    """
    # TODO(synk): the torch module marks coords as requires_grad for later
    # autograd wrt inputs; in JAX gradients are taken functionally, so coords
    # is simply returned unchanged.
    n, din = coords.shape
    num_layers = len(params)
    dout_last = params[-1][0].shape[0]

    # Feature-major layout: batch on the lane axis.
    x_t = coords.T  # (din, n)

    # Lane tile: multiple of 128, up to 4096 columns per grid step (activation
    # tile for hidden width 32 is 32*4096*4 B = 512 KiB -> far below VMEM).
    n128 = _round_up(n, 128)
    tn = min(n128, 4096)
    npad = _round_up(n, tn)
    if npad != n:
        x_t = jnp.pad(x_t, ((0, 0), (0, npad - n)))

    grid = (npad // tn,)

    in_specs = [pl.BlockSpec((din, tn), lambda i: (0, i))]
    flat_args = []
    for (w, b) in params:
        flat_args.append(w)
        flat_args.append(b)
        # Small, grid-invariant operands: keep fully resident in VMEM
        # (no blocking, no double-buffered DMA).
        in_specs.append(pl.BlockSpec(memory_space=pltpu.MemorySpace.VMEM))
        in_specs.append(pl.BlockSpec(memory_space=pltpu.MemorySpace.VMEM))

    kernel = functools.partial(_siren_fused_kernel,
                               num_layers=num_layers,
                               final_sine=final_sine)

    out_t = pl.pallas_call(
        kernel,
        out_shape=jax.ShapeDtypeStruct((dout_last, npad), jnp.float32),
        grid=grid,
        in_specs=in_specs,
        out_specs=pl.BlockSpec((dout_last, tn), lambda i: (0, i)),
        compiler_params=pltpu.CompilerParams(
            dimension_semantics=("parallel",)),
    )(x_t, *flat_args)

    out = out_t[:, :n].T  # back to (N, Dout_last)
    return out, coords


# --------------------------- Parameter creation -----------------------------

def init_siren_params(key, in_features, hidden_features, hidden_layers,
                      out_features, outermost_linear=False,
                      first_omega_0=30.0, hidden_omega_0=30.0):
    """SIREN init (same distributions as the PyTorch reference).

    Returns (params, final_sine) where params is a list of (w, b) with
    w: (Dout, Din), b: (Dout, 1). For sine layers omega_0 is folded into both
    w and b so the kernel computes sin(W @ x + b) directly.
    """
    def linear_params(k, din, dout, w_bound):
        kw, kb = jax.random.split(k)
        # PyTorch nn.Linear weight layout is (out, in); same here.
        w = jax.random.uniform(kw, (dout, din), jnp.float32,
                               minval=-w_bound, maxval=w_bound)
        # PyTorch nn.Linear default bias init: U(-1/sqrt(fan_in), 1/sqrt(fan_in)).
        bb = 1.0 / math.sqrt(din)
        b = jax.random.uniform(kb, (dout, 1), jnp.float32,
                               minval=-bb, maxval=bb)
        return w, b

    keys = jax.random.split(key, hidden_layers + 2)
    params = []

    # first sine layer
    w, b = linear_params(keys[0], in_features, hidden_features,
                         1.0 / in_features)
    params.append((first_omega_0 * w, first_omega_0 * b))

    # hidden sine layers
    for i in range(hidden_layers):
        bound = math.sqrt(6.0 / hidden_features) / hidden_omega_0
        w, b = linear_params(keys[1 + i], hidden_features, hidden_features,
                             bound)
        params.append((hidden_omega_0 * w, hidden_omega_0 * b))

    # last layer
    bound = math.sqrt(6.0 / hidden_features) / hidden_omega_0
    w, b = linear_params(keys[-1], hidden_features, out_features, bound)
    if outermost_linear:
        params.append((w, b))          # plain linear, no omega, no sine
        final_sine = False
    else:
        params.append((hidden_omega_0 * w, hidden_omega_0 * b))
        final_sine = True

    return params, final_sine


# ----------------------------- pure-JAX reference ----------------------------

def _reference_forward(params, coords, final_sine):
    x = coords.T
    for l, (w, b) in enumerate(params):
        z = w @ x + b
        x = jnp.sin(z) if (l < len(params) - 1 or final_sine) else z
    return x.T


# ------------------------------------ main -----------------------------------

if __name__ == "__main__":
    key = jax.random.PRNGKey(0)
    kp, kx = jax.random.split(key)

    in_features = 2
    hidden_features = 32
    hidden_layers = 2
    out_features = 3
    N = 256  # number of coordinate samples

    params, final_sine = init_siren_params(
        kp, in_features, hidden_features, hidden_layers, out_features,
        outermost_linear=False, first_omega_0=30.0, hidden_omega_0=30.0)

    coords = jax.random.uniform(kx, (N, in_features), jnp.float32,
                                minval=-1.0, maxval=1.0)

    out, coords_out = siren_forward(params, coords, final_sine=final_sine)
    jax.block_until_ready(out)
    jax.block_until_ready(coords_out)

    assert out.shape == (N, out_features)
    assert coords_out.shape == coords.shape

    ref = _reference_forward(params, coords, final_sine)
    err = float(jnp.max(jnp.abs(out - ref)))
    assert err < 1e-3, f"mismatch vs reference: {err}"

    print("KERNEL_OK")
</pallas_src>

<mosaic_0001>
module attributes {stable_mosaic.version = 11 : i64} {
  func.func @_siren_fused_kernel(%arg0: i32, %arg1: memref<2x256xf32, #tpu.memory_space<vmem>>, %arg2: memref<32x2xf32, #tpu.memory_space<vmem>>, %arg3: memref<32x1xf32, #tpu.memory_space<vmem>>, %arg4: memref<32x32xf32, #tpu.memory_space<vmem>>, %arg5: memref<32x1xf32, #tpu.memory_space<vmem>>, %arg6: memref<32x32xf32, #tpu.memory_space<vmem>>, %arg7: memref<32x1xf32, #tpu.memory_space<vmem>>, %arg8: memref<3x32xf32, #tpu.memory_space<vmem>>, %arg9: memref<3x1xf32, #tpu.memory_space<vmem>>, %arg10: memref<3x256xf32, #tpu.memory_space<vmem>>) attributes {dimension_semantics = [#tpu.dimension_semantics<parallel>], iteration_bounds = array<i64: 1>, scalar_prefetch = 0 : i64, scratch_operands = 0 : i64, tpu.core_type = #tpu.core_type<tc>, window_params = [{transform_indices = @transform_0, window_bounds = array<i64: 2, 256>}, {pipeline_mode = #tpu.pipeline_mode<synchronous>, transform_indices = @transform_1, window_bounds = array<i64: 32, 2>}, {pipeline_mode = #tpu.pipeline_mode<synchronous>, transform_indices = @transform_2, window_bounds = array<i64: 32, 1>}, {pipeline_mode = #tpu.pipeline_mode<synchronous>, transform_indices = @transform_3, window_bounds = array<i64: 32, 32>}, {pipeline_mode = #tpu.pipeline_mode<synchronous>, transform_indices = @transform_4, window_bounds = array<i64: 32, 1>}, {pipeline_mode = #tpu.pipeline_mode<synchronous>, transform_indices = @transform_5, window_bounds = array<i64: 32, 32>}, {pipeline_mode = #tpu.pipeline_mode<synchronous>, transform_indices = @transform_6, window_bounds = array<i64: 32, 1>}, {pipeline_mode = #tpu.pipeline_mode<synchronous>, transform_indices = @transform_7, window_bounds = array<i64: 3, 32>}, {pipeline_mode = #tpu.pipeline_mode<synchronous>, transform_indices = @transform_8, window_bounds = array<i64: 3, 1>}, {transform_indices = @transform_9, window_bounds = array<i64: 3, 256>}]} {
    %c0 = arith.constant 0 : index
    %c0_0 = arith.constant 0 : index
    %0 = vector.load %arg1[%c0, %c0_0] : memref<2x256xf32, #tpu.memory_space<vmem>>, vector<2x256xf32>
    %c0_1 = arith.constant 0 : index
    %c0_2 = arith.constant 0 : index
    %1 = vector.load %arg2[%c0_1, %c0_2] : memref<32x2xf32, #tpu.memory_space<vmem>>, vector<32x2xf32>
    %c0_3 = arith.constant 0 : index
    %c0_4 = arith.constant 0 : index
    %2 = vector.load %arg3[%c0_3, %c0_4] : memref<32x1xf32, #tpu.memory_space<vmem>>, vector<32x1xf32>
    %cst = arith.constant dense<0.000000e+00> : vector<32x256xf32>
    %3 = tpu.matmul %1, %0, %cst {dimension_numbers = #tpu.dot_dimension_numbers<[1], [0], [0], [1], [0, 0, 1, 1], [], []>} : vector<32x2xf32>, vector<2x256xf32>, vector<32x256xf32> -> vector<32x256xf32>
    %4 = vector.broadcast %2 : vector<32x1xf32> to vector<32x256xf32>
    %5 = arith.addf %3, %4 : vector<32x256xf32>
    %6 = math.sin %5 : vector<32x256xf32>
    %c0_5 = arith.constant 0 : index
    %c0_6 = arith.constant 0 : index
    %7 = vector.load %arg4[%c0_5, %c0_6] : memref<32x32xf32, #tpu.memory_space<vmem>>, vector<32x32xf32>
    %c0_7 = arith.constant 0 : index
    %c0_8 = arith.constant 0 : index
    %8 = vector.load %arg5[%c0_7, %c0_8] : memref<32x1xf32, #tpu.memory_space<vmem>>, vector<32x1xf32>
    %cst_9 = arith.constant dense<0.000000e+00> : vector<32x256xf32>
    %9 = tpu.matmul %7, %6, %cst_9 {dimension_numbers = #tpu.dot_dimension_numbers<[1], [0], [0], [1], [0, 0, 1, 1], [], []>} : vector<32x32xf32>, vector<32x256xf32>, vector<32x256xf32> -> vector<32x256xf32>
    %10 = vector.broadcast %8 : vector<32x1xf32> to vector<32x256xf32>
    %11 = arith.addf %9, %10 : vector<32x256xf32>
    %12 = math.sin %11 : vector<32x256xf32>
    %c0_10 = arith.constant 0 : index
    %c0_11 = arith.constant 0 : index
    %13 = vector.load %arg6[%c0_10, %c0_11] : memref<32x32xf32, #tpu.memory_space<vmem>>, vector<32x32xf32>
    %c0_12 = arith.constant 0 : index
    %c0_13 = arith.constant 0 : index
    %14 = vector.load %arg7[%c0_12, %c0_13] : memref<32x1xf32, #tpu.memory_space<vmem>>, vector<32x1xf32>
    %cst_14 = arith.constant dense<0.000000e+00> : vector<32x256xf32>
    %15 = tpu.matmul %13, %12, %cst_14 {dimension_numbers = #tpu.dot_dimension_numbers<[1], [0], [0], [1], [0, 0, 1, 1], [], []>} : vector<32x32xf32>, vector<32x256xf32>, vector<32x256xf32> -> vector<32x256xf32>
    %16 = vector.broadcast %14 : vector<32x1xf32> to vector<32x256xf32>
    %17 = arith.addf %15, %16 : vector<32x256xf32>
    %18 = math.sin %17 : vector<32x256xf32>
    %c0_15 = arith.constant 0 : index
    %c0_16 = arith.constant 0 : index
    %19 = vector.load %arg8[%c0_15, %c0_16] : memref<3x32xf32, #tpu.memory_space<vmem>>, vector<3x32xf32>
    %c0_17 = arith.constant 0 : index
    %c0_18 = arith.constant 0 : index
    %20 = vector.load %arg9[%c0_17, %c0_18] : memref<3x1xf32, #tpu.memory_space<vmem>>, vector<3x1xf32>
    %cst_19 = arith.constant dense<0.000000e+00> : vector<3x256xf32>
    %21 = tpu.matmul %19, %18, %cst_19 {dimension_numbers = #tpu.dot_dimension_numbers<[1], [0], [0], [1], [0, 0, 1, 1], [], []>} : vector<3x32xf32>, vector<32x256xf32>, vector<3x256xf32> -> vector<3x256xf32>
    %22 = vector.broadcast %20 : vector<3x1xf32> to vector<3x256xf32>
    %23 = arith.addf %21, %22 : vector<3x256xf32>
    %24 = math.sin %23 : vector<3x256xf32>
    %c0_20 = arith.constant 0 : index
    %c0_21 = arith.constant 0 : index
    %25 = vector.load %arg10[%c0_20, %c0_21] : memref<3x256xf32, #tpu.memory_space<vmem>>, vector<3x256xf32>
    tpu.vector_store %arg10[%c0_20, %c0_21], %24 {strides = array<i32>} : memref<3x256xf32, #tpu.memory_space<vmem>>, vector<3x256xf32>,
    return
  }
  func.func @transform_0(%arg0: i32) -> (i32, i32) {
    %c0_i32 = arith.constant 0 : i32
    %c0_i32_0 = arith.constant 0 : i32
    return %c0_i32, %arg0 : i32, i32
  }
  func.func @transform_1(%arg0: i32) -> (i32, i32) {
    %c0_i32 = arith.constant 0 : i32
    %c0_i32_0 = arith.constant 0 : i32
    %c0_i32_1 = arith.constant 0 : i32
    return %c0_i32, %c0_i32_0 : i32, i32
  }
  func.func @transform_2(%arg0: i32) -> (i32, i32) {
    %c0_i32 = arith.constant 0 : i32
    %c0_i32_0 = arith.constant 0 : i32
    %c0_i32_1 = arith.constant 0 : i32
    return %c0_i32, %c0_i32_0 : i32, i32
  }
  func.func @transform_3(%arg0: i32) -> (i32, i32) {
    %c0_i32 = arith.constant 0 : i32
    %c0_i32_0 = arith.constant 0 : i32
    %c0_i32_1 = arith.constant 0 : i32
    return %c0_i32, %c0_i32_0 : i32, i32
  }
  func.func @transform_4(%arg0: i32) -> (i32, i32) {
    %c0_i32 = arith.constant 0 : i32
    %c0_i32_0 = arith.constant 0 : i32
    %c0_i32_1 = arith.constant 0 : i32
    return %c0_i32, %c0_i32_0 : i32, i32
  }
  func.func @transform_5(%arg0: i32) -> (i32, i32) {
    %c0_i32 = arith.constant 0 : i32
    %c0_i32_0 = arith.constant 0 : i32
    %c0_i32_1 = arith.constant 0 : i32
    return %c0_i32, %c0_i32_0 : i32, i32
  }
  func.func @transform_6(%arg0: i32) -> (i32, i32) {
    %c0_i32 = arith.constant 0 : i32
    %c0_i32_0 = arith.constant 0 : i32
    %c0_i32_1 = arith.constant 0 : i32
    return %c0_i32, %c0_i32_0 : i32, i32
  }
  func.func @transform_7(%arg0: i32) -> (i32, i32) {
    %c0_i32 = arith.constant 0 : i32
    %c0_i32_0 = arith.constant 0 : i32
    %c0_i32_1 = arith.constant 0 : i32
    return %c0_i32, %c0_i32_0 : i32, i32
  }
  func.func @transform_8(%arg0: i32) -> (i32, i32) {
    %c0_i32 = arith.constant 0 : i32
    %c0_i32_0 = arith.constant 0 : i32
    %c0_i32_1 = arith.constant 0 : i32
    return %c0_i32, %c0_i32_0 : i32, i32
  }
  func.func @transform_9(%arg0: i32) -> (i32, i32) {
    %c0_i32 = arith.constant 0 : i32
    %c0_i32_0 = arith.constant 0 : i32
    return %c0_i32, %arg0 : i32, i32
  }
}

</mosaic_0001>

<bundles_post_ra>
// kernel: siren_forward.1
= control target key start
LH: loop header
LB: loop body
LE: loop exit
PB: predicated region body
PF: predicated region fallthrough
CT: control target
= control target key end

     0   :  { %vm84_vm0 = vcmask 1041408   ;;  %v5853_v2 = vmov 0.0   ;;  %vm71_vm1 = vcmask 15360   ;;  %v3631_v5 = vmov 0   ;;  %s5843_s0 = inlined_call_operand.vmem [shape: f32[2,256], index: 0, kind: input, shape index: {}]   ;;  %s5844_s1 = inlined_call_operand.vmem [shape: f32[32,2], index: 1, kind: input, shape index: {}]   ;;  %s5845_s2 = inlined_call_operand.vmem [shape: f32[32,1], index: 2, kind: input, shape index: {}]   ;;  %s5846_s3 = inlined_call_operand.vmem [shape: f32[32,32], index: 3, kind: input, shape index: {}]   ;;  %s5847_s4 = inlined_call_operand.vmem [shape: f32[32,1], index: 4, kind: input, shape index: {}]   ;;  %s5848_s5 = inlined_call_operand.vmem [shape: f32[32,32], index: 5, kind: input, shape index: {}]   ;;  %s5849_s6 = inlined_call_operand.vmem [shape: f32[32,1], index: 6, kind: input, shape index: {}]   ;;  %s5850_s7 = inlined_call_operand.vmem [shape: f32[3,32], index: 7, kind: input, shape index: {}]   ;;  %s5851_s8 = inlined_call_operand.vmem [shape: f32[3,1], index: 8, kind: input, shape index: {}]   ;;  %s5852_s9 = inlined_call_operand.hbm [shape: f32[3,256], index: 9, kind: output, shape index: {}]  }
   0x1   :  { %v3241_v0 = vld.sshfl [vmem:[%s5843_s0] sm:$0x33 pattern:$0x76325410]  ;;  %153 = vmatprep.mubr.f32.mxu0 %v5853_v2  ;;  %165 = vmatprep.mubr.f32.mxu1 %v5853_v2  ;;  %v36_v4 = vld [vmem:[%s5844_s1 + $0x10] sm:$0xff]  ;;  %v35_v8 = vld [vmem:[%s5844_s1 + $0x8] sm:$0xff] }
   0x2   :  { %v70_v1 = vcombine.high %v3241_v0, %v3241_v0  ;;  %v34_v3 = vld [vmem:[%s5844_s1] sm:$0xff]  ;;  %3500 = vset.pattern.permute.xlu0 %v3631_v5  ;;  %3501 = vset.pattern.permute.xlu1 %v3631_v5  ;;  %v40_v7 = vld [vmem:[%s5845_s2 + $0x10] sm:$0xff]  ;;  %v37_v9 = vld [vmem:[%s5844_s1 + $0x18] sm:$0xff] }
   0x3   :  { %v38_v6 = vld [vmem:[%s5845_s2] sm:$0xff] }
   0x4   :  { %3242 = vmatprep.subr.msk.mxu0 %vm84_vm0, %v70_v1  ;;  %3385 = vmatprep.subr.msk.mxu1 %vm84_vm0, %v70_v1 }
   0x5   :  { %3243 = vmatpush1.msk.msra.mxu0 %vm84_vm0, %v3241_v0  ;;  %3386 = vmatpush1.msk.msra.mxu1 %vm84_vm0, %v3241_v0 }
   0x6   :  { %3244 = vmatmul.mubr.msk.f32.vlgmr.msra.gmra.mrb[0].mxu0 %vm71_vm1, %v34_v3  ;;  %3246 = vmatmul.mubr.msk.f32.vlgmr.msra.gmra.mrb[0].mxu1 %vm71_vm1, %v36_v4 }
   0x7   :  { %159 = vmatprep.mubr.f32.mxu0 %v5853_v2  ;;  %171 = vmatprep.mubr.f32.mxu1 %v5853_v2 }
   0x8   :  { %14 = vsyncpa [#allocation3], 0  ;;  %44 = vperm.xlu0 %3500, %v38_v6   ;;  %54 = vperm.xlu1 %3501, %v40_v7   ;;  %v39_v10 = vld [vmem:[%s5845_s2 + $0x8] sm:$0xff]  ;;  %v41_v11 = vld [vmem:[%s5845_s2 + $0x18] sm:$0xff]  ;;  %v5875_v59 = vmov 683565275  }
   0x9   :  { %v1014_v12 = vld [vmem:[%s5847_s4] sm:$0xff]  ;;  %v1015_v13 = vld [vmem:[%s5847_s4 + $0x8] sm:$0xff]  ;;  %v1016_v14 = vld [vmem:[%s5847_s4 + $0x10] sm:$0xff]  ;;  %v5873_v63 = vmov 2475754826  }
   0xa   :  { %3245 = vmatmul.mubr.msk.f32.gmra.mrb[2].mxu0 %vm71_vm1, %v35_v8  ;;  %3247 = vmatmul.mubr.msk.f32.gmra.mrb[2].mxu1 %vm71_vm1, %v37_v9  ;;  %v1017_v15 = vld [vmem:[%s5847_s4 + $0x18] sm:$0xff]  ;;  %v1976_v16 = vld [vmem:[%s5849_s6] sm:$0xff]  ;;  %v1977_v17 = vld [vmem:[%s5849_s6 + $0x8] sm:$0xff]  ;;  %v5867_v1 = vmov 2131351028  }
   0xb   :  { %1115 = vmatprep.mubr.f32.mxu1 %v5853_v2  ;;  %2076 = vmatprep.mubr.f32.mxu0 %v5853_v2  ;;  %v1978_v18 = vld [vmem:[%s5849_s6 + $0x10] sm:$0xff]  ;;  %v1979_v19 = vld [vmem:[%s5849_s6 + $0x18] sm:$0xff]  ;;  %v2934_v20 = vld [vmem:[%s5851_s8] sm:$0x7]  ;;  %v5865_v4 = vmov 2102212464  }
   0xc   :  { %49 = vperm.xlu0 %3500, %v39_v10   ;;  %59 = vperm.xlu1 %3501, %v41_v11   ;;  %v5863_v6 = vmov 920167782  }
  0x10   :  { %1020 = vperm.xlu0 %3500, %v1014_v12   ;;  %1025 = vperm.xlu1 %3501, %v1015_v13   ;;  %v5860_v13 = vmov 1326507024  }
  0x14   :  { %1030 = vperm.xlu0 %3500, %v1016_v14   ;;  %1035 = vperm.xlu1 %3501, %v1017_v15  }
  0x18   :  { %1982 = vperm.xlu0 %3500, %v1976_v16   ;;  %1987 = vperm.xlu1 %3501, %v1977_v17  }
  0x1c   :  { %1992 = vperm.xlu0 %3500, %v1978_v18   ;;  %1997 = vperm.xlu1 %3501, %v1979_v19  }
  0x20   :  { %2937 = vperm.xlu0 %3500, %v2934_v20  }
  0x87   :  { %v45_v21 = vpop.permute.xlu0 %44  ;;  %v55_v22 = vpop.permute.xlu1 %54 }
  0xd9   :  { %v155_v23 = vpop.f32.mrb[0].mxu0  ;;  %v167_v24 = vpop.f32.mrb[0].mxu1 }
  0xda   :  { %v3753_v25 = vadd.f32 %v155_v23, %v45_v21  ;;  %v3755_v26 = vadd.f32 %v167_v24, %v55_v22  ;;  %v157_v27 = vpop.f32.mrb[1].mxu0  ;;  %v169_v28 = vpop.f32.mrb[1].mxu1 }
  0xdb   :  { %v3757_v29 = vadd.f32 %v157_v27, %v45_v21  ;;  %v3783_v57 = vadd.f32 %v169_v28, %v55_v22 }
  0xdc   :  { %v178_v30 = vand.u32 2147483647, %v3753_v25  ;;  %v181_v31 = vand.u32 2139095040, %v3753_v25  ;;  %v597_v32 = vand.u32 2139095040, %v3755_v26  ;;  %v5857_v37 = vand.u32 2147483647, %v3755_v26 }
  0xdd   :  { %v3762_v33 = vpop.f32.mrb[2].mxu0  ;;  %v285_v35 = vand.u32 2139095040, %v3757_v29  ;;  %v3768_v41 = vpop.f32.mrb[2].mxu1 }
  0xde   :  { %v182_v34 = vshrl.u32 %v181_v31, 23  ;;  %v185_v36 = vand.u32 8388607, %v178_v30  ;;  %v598_v38 = vshrl.u32 %v597_v32, 23  ;;  %v3770_v45 = vpop.f32.mrb[3].mxu0  ;;  %v3772_v46 = vpop.f32.mrb[3].mxu1 }
  0xdf   :  { %v286_v40 = vshrl.u32 %v285_v35, 23  ;;  %v3776_v48 = vand.u32 8388607, %v5857_v37 }
  0xe0   :  { %v3248_v39 = vadd.s32 4294967169, %v182_v34  ;;  %v3264_v42 = vadd.s32 4294967169, %v598_v38  ;;  %v186_v47 = vor.u32 8388608, %v185_v36 }
  0xe1   :  { %v3252_v44 = vadd.s32 4294967169, %v286_v40  ;;  %v602_v56 = vor.u32 8388608, %v3776_v48 }
  0xe2   :  { %v188_v43 = vadd.s32 1, %v3248_v39  ;;  %v604_v49 = vadd.s32 1, %v3264_v42  ;;  %v3780_v55 = vshll.u32 %v186_v47, 8 }
  0xe3   :  { %v3778_v54 = vadd.s32 1, %v3252_v44 }
  0xe4   :  { %vm189_vm2 = vcmp.gt.s32.totalorder %v188_v43, 0  ;;  %vm605_vm3 = vcmp.gt.s32.totalorder %v604_v49, 0 }
  0xe5   :  { %v190_v50 = vsel %vm189_vm2, %v188_v43, 0  ;;  %v606_v53 = vsel %vm605_vm3, %v604_v49, 0  ;;  %vm293_vm5 = vcmp.gt.s32.totalorder %v3778_v54, 0 }
  0xe6   :  { %v191_v51 = vshrl.u32 %v190_v50, 5  ;;  %v192_v52 = vand.u32 31, %v190_v50  ;;  %v3786_v61 = vshrl.u32 %v606_v53, 5  ;;  %v608_v62 = vand.u32 31, %v606_v53 }
  0xe8   :  { %v193_v58 = vsub.s32 32, %v192_v52  ;;  %v195_v60 = vshll.u32 %v5875_v59, %v192_v52  ;;  %v198_v0 = vshll.u32 %v5873_v63, %v192_v52  ;;  %v201_v3 = vshll.u32 %v5867_v1, %v192_v52 }
  0xe9   :  { %v204_v5 = vshll.u32 %v5865_v4, %v192_v52  ;;  %v207_v7 = vshll.u32 %v5863_v6, %v192_v52  ;;  %vm210_vm4 = vcmp.lt.s32.totalorder %v191_v51, 1  ;;  %vm212_vm6 = vcmp.lt.s32.totalorder %v191_v51, 3 }
  0xea   :  { %v196_v8 = vshrl.u32 %v5873_v63, %v193_v58  ;;  %v199_v9 = vshrl.u32 %v5867_v1, %v193_v58  ;;  %v202_v10 = vshrl.u32 %v5865_v4, %v193_v58  ;;  %v194_v11 = vshrl.u32 %v5875_v59, %v193_v58 }
  0xeb   :  { %v205_v12 = vshrl.u32 %v5863_v6, %v193_v58  ;;  %v208_v14 = vshrl.u32 %v5860_v13, %v193_v58  ;;  %v609_v18 = vsub.s32 32, %v608_v62  ;;  %vm213_vm7 = vcmp.lt.s32.totalorder %v191_v51, 4 }
  0xec   :  { %v197_v15 = vor.u32 %v196_v8, %v195_v60  ;;  %v200_v16 = vor.u32 %v199_v9, %v198_v0  ;;  %v203_v17 = vor.u32 %v202_v10, %v201_v3  ;;  %v611_v21 = vshll.u32 %v5875_v59, %v608_v62 }
  0xed   :  { %v206_v19 = vor.u32 %v205_v12, %v204_v5  ;;  %v209_v20 = vor.u32 %v208_v14, %v207_v7  ;;  %v614_v34 = vshll.u32 %v5873_v63, %v608_v62  ;;  %vm211_vm8 = vcmp.lt.s32.totalorder %v191_v51, 2 }
  0xee   :  { %v214_v22 = vsel %vm210_vm4, %v194_v11, %v197_v15  ;;  %v215_v23 = vsel %vm213_vm7, %v203_v17, 2102212464  ;;  %v218_v24 = vsel %vm210_vm4, %v197_v15, %v200_v16  ;;  %v222_v27 = vsel %vm210_vm4, %v200_v16, %v203_v17 }
  0xef   :  { %v216_v28 = vsel %vm212_vm6, %v200_v16, %v215_v23  ;;  %v219_v31 = vsel %vm213_vm7, %v206_v19, 920167782  ;;  %v223_v32 = vsel %vm213_vm7, %v209_v20, 1326507024  ;;  %v612_v38 = vshrl.u32 %v5873_v63, %v609_v18 }
  0xf0   :  { %v220_v35 = vsel %vm212_vm6, %v203_v17, %v219_v31  ;;  %v224_v36 = vsel %vm212_vm6, %v206_v19, %v223_v32  ;;  %v217_v39 = vsel %vm211_vm8, %v214_v22, %v216_v28  ;;  %v615_v43 = vshrl.u32 %v5867_v1, %v609_v18 }
  0xf1   :  { %v221_v40 = vsel %vm211_vm8, %v218_v24, %v220_v35  ;;  %v225_v42 = vsel %vm211_vm8, %v222_v27, %v224_v36  ;;  %v613_v52 = vor.u32 %v612_v38, %v611_v21  ;;  %v617_v51 = vshll.u32 %v5867_v1, %v608_v62 }
  0xf2   :  { %v3810_v44 = vmul.u32.u64.low %v3780_v55, %v225_v42  ;;  %v3811_v47 = vmul.u32.u64.high %v3780_v55, %v225_v42, %v3810_v44  ;;  %v3814_v49 = vmul.u32.u64.low %v3780_v55, %v221_v40  ;;  %v3815_v50 = vmul.u32.u64.high %v3780_v55, %v221_v40, %v3814_v49 }
  0xf3   :  { %v616_v53 = vor.u32 %v615_v43, %v614_v34  ;;  %v618_v58 = vshrl.u32 %v5865_v4, %v609_v18  ;;  %v620_v60 = vshll.u32 %v5865_v4, %v608_v62  ;;  %v621_v0 = vshrl.u32 %v5863_v6, %v609_v18 }
  0xf4   :  { %v623_v3 = vshll.u32 %v5863_v6, %v608_v62  ;;  %v624_v5 = vshrl.u32 %v5860_v13, %v609_v18  ;;  %v610_v7 = vshrl.u32 %v5875_v59, %v609_v18  ;;  %v3827_v9 = vshll.u32 %v602_v56, 8 }
  0xf5   :  { %v619_v8 = vor.u32 %v618_v58, %v617_v51  ;;  %v294_v10 = vsel %vm293_vm5, %v3778_v54, 0  ;;  %vm235_vm9 = vc.u32 %v3811_v47, %v3814_v49  ;;  %v236_v11 = vadd.s32 1, %v3815_v50 }
  0xf6   :  { %v622_v12 = vor.u32 %v621_v0, %v620_v60  ;;  %vm626_vm10 = vcmp.lt.s32.totalorder %v3786_v61, 1  ;;  %v233_v62 = vmul.u32 %v3780_v55, %v217_v39  ;;  %v625_v14 = vor.u32 %v624_v5, %v623_v3 }
  0xf7   :  { %vm629_vm11 = vcmp.lt.s32.totalorder %v3786_v61, 4  ;;  %v634_v48 = vsel %vm626_vm10, %v613_v52, %v616_v53  ;;  %v237_v56 = vsel %vm235_vm9, %v236_v11, %v3815_v50  ;;  %vm628_vm12 = vcmp.lt.s32.totalorder %v3786_v61, 3 }
  0xf8   :  { %v635_v54 = vsel %vm629_vm11, %v622_v12, 920167782  ;;  %v638_v15 = vsel %vm626_vm10, %v616_v53, %v619_v8  ;;  %v238_v16 = vadd.s32 %v237_v56, %v233_v62  ;;  %vm627_vm13 = vcmp.lt.s32.totalorder %v3786_v61, 2 }
  0xf9   :  { %v636_v55 = vsel %vm628_vm12, %v619_v8, %v635_v54  ;;  %v639_v17 = vsel %vm629_vm11, %v625_v14, 1326507024  ;;  %v631_v18 = vsel %vm629_vm11, %v619_v8, 2102212464  ;;  %v5862_v21 = vand.u32 2147483647, %v3757_v29 }
  0xfa   :  { %v637_v19 = vsel %vm627_vm13, %v634_v48, %v636_v55  ;;  %v640_v20 = vsel %vm628_vm12, %v622_v12, %v639_v17  ;;  %v239_v22 = vadd.s32 536870912, %v238_v16  ;;  %v296_v32 = vand.u32 31, %v294_v10 }
  0xfb   :  { %v641_v23 = vsel %vm627_vm13, %v638_v15, %v640_v20  ;;  %v3855_v24 = vmul.u32.u64.low %v3827_v9, %v637_v19  ;;  %v3856_v27 = vmul.u32.u64.high %v3827_v9, %v637_v19, %v3855_v24  ;;  %v701_v34 = vand.u32 2139095040, %v3783_v57 }
  0xfc   :  { %v3860_v28 = vmul.u32.u64.low %v3827_v9, %v641_v23  ;;  %v3861_v31 = vmul.u32.u64.high %v3827_v9, %v641_v23, %v3860_v28  ;;  %v630_v35 = vsel %vm626_vm10, %v610_v7, %v613_v52  ;;  %v632_v36 = vsel %vm628_vm12, %v616_v53, %v631_v18 }
  0xfd   :  { %v297_v38 = vsub.s32 32, %v296_v32  ;;  %v3868_v39 = vshrl.u32 %v239_v22, 30  ;;  %v633_v40 = vsel %vm627_vm13, %v630_v35, %v632_v36  ;;  %v289_v42 = vand.u32 8388607, %v5862_v21 }
  0xfe   :  { %v702_v43 = vshrl.u32 %v701_v34, 23  ;;  %v652_v44 = vadd.s32 1, %v3856_v27  ;;  %v295_v50 = vshrl.u32 %v294_v10, 5  ;;  %vm651_vm14 = vc.u32 %v3861_v31, %v3855_v24 }
  0xff   :  { %v300_v51 = vshrl.u32 %v5873_v63, %v297_v38  ;;  %v303_v52 = vshrl.u32 %v5867_v1, %v297_v38  ;;  %v302_v53 = vshll.u32 %v5873_v63, %v296_v32  ;;  %v305_v58 = vshll.u32 %v5867_v1, %v296_v32 }
 0x100   :  { %v306_v61 = vshrl.u32 %v5865_v4, %v297_v38  ;;  %v241_v60 = vshll.u32 %v3868_v39, 30  ;;  %v299_v0 = vshll.u32 %v5875_v59, %v296_v32  ;;  %v308_v3 = vshll.u32 %v5865_v4, %v296_v32 }
 0x101   :  { %v309_v5 = vshrl.u32 %v5863_v6, %v297_v38  ;;  %v304_v7 = vor.u32 %v303_v52, %v302_v53  ;;  %v311_v10 = vshll.u32 %v5863_v6, %v296_v32  ;;  %v312_v11 = vshrl.u32 %v5860_v13, %v297_v38 }
 0x102   :  { %v307_v8 = vor.u32 %v306_v61, %v305_v58  ;;  %v653_v12 = vsel %vm651_vm14, %v652_v44, %v3856_v27  ;;  %v301_v62 = vor.u32 %v300_v51, %v299_v0  ;;  %v649_v48 = vmul.u32 %v3827_v9, %v633_v40 }
 0x103   :  { %v310_v14 = vor.u32 %v309_v5, %v308_v3  ;;  %v313_v56 = vor.u32 %v312_v11, %v311_v10  ;;  %vm317_vm15 = vcmp.lt.s32.totalorder %v295_v50, 4  ;;  %v290_v54 = vor.u32 8388608, %v289_v42 }
 0x104   :  { %vm314_vm0 = vcmp.lt.s32.totalorder %v295_v50, 1  ;;  %v3268_v55 = vadd.s32 4294967169, %v702_v43  ;;  %v3890_v17 = vsub.s32 %v238_v16, %v241_v60  ;;  %v654_v18 = vadd.s32 %v653_v12, %v649_v48 }
 0x105   :  { %v323_v15 = vsel %vm317_vm15, %v310_v14, 920167782  ;;  %vm316_vm1 = vcmp.lt.s32.totalorder %v295_v50, 3  ;;  %v326_v19 = vsel %vm314_vm0, %v304_v7, %v307_v8  ;;  %v322_v20 = vsel %vm314_vm0, %v301_v62, %v304_v7 }
 0x106   :  { %v324_v22 = vsel %vm316_vm1, %v307_v8, %v323_v15  ;;  %v327_v23 = vsel %vm317_vm15, %v313_v56, 1326507024  ;;  %vm315_vm2 = vcmp.lt.s32.totalorder %v295_v50, 2  ;;  %v298_v27 = vshrl.u32 %v5875_v59, %v297_v38 }
 0x107   :  { %v328_v9 = vsel %vm316_vm1, %v310_v14, %v327_v23  ;;  %v319_v28 = vsel %vm317_vm15, %v307_v8, 2102212464  ;;  %v708_v34 = vadd.s32 1, %v3268_v55  ;;  %v244_v16 = vsub.s32 0, %v3890_v17 }
 0x108   :  { %v329_v32 = vsel %vm315_vm2, %v326_v19, %v328_v9  ;;  %v655_v35 = vadd.s32 536870912, %v654_v18  ;;  %v325_v36 = vsel %vm315_vm2, %v322_v20, %v324_v22  ;;  %v330_v40 = vshll.u32 %v290_v54, 8 }
 0x109   :  { %v318_v42 = vsel %vm314_vm0, %v298_v27, %v301_v62  ;;  %vm709_vm3 = vcmp.gt.s32.totalorder %v708_v34, 0  ;;  %v320_v43 = vsel %vm316_vm1, %v304_v7, %v319_v28  ;;  %v3249_v58 = vmin.u32 %v244_v16, %v3890_v17 }
 0x10a   :  { %v3902_v44 = vmul.u32.u64.low %v330_v40, %v329_v32  ;;  %v3903_v51 = vmul.u32.u64.high %v330_v40, %v329_v32, %v3902_v44  ;;  %v710_v52 = vsel %vm709_vm3, %v708_v34, 0  ;;  %v3910_v61 = vshrl.u32 %v655_v35, 30 }
 0x10b   :  { %v3905_v38 = vmul.u32.u64.low %v330_v40, %v325_v36  ;;  %v3906_v53 = vmul.u32.u64.high %v330_v40, %v325_v36, %v3905_v38  ;;  %v712_v60 = vand.u32 31, %v710_v52  ;;  %v321_v0 = vsel %vm315_vm2, %v318_v42, %v320_v43  ;;  %v3935_v42 = vpop.permute.xlu0 %49 }
 0x10c   :  { %v5855_v3 = vand.u32 2147483647, %v3783_v57  ;;  %v246_v8 = vclz %v3249_v58  ;;  %v657_v10 = vshll.u32 %v3910_v61, 30  ;;  %v337_v11 = vmul.u32 %v330_v40, %v321_v0 }
 0x10d   :  { %vm339_vm4 = vc.u32 %v3903_v51, %v3905_v38  ;;  %v713_v5 = vsub.s32 32, %v712_v60  ;;  %v340_v7 = vadd.s32 1, %v3906_v53  ;;  %v715_v50 = vshll.u32 %v5875_v59, %v712_v60 }
 0x10e   :  { %v705_v62 = vand.u32 8388607, %v5855_v3  ;;  %v718_v56 = vshll.u32 %v5873_v63, %v712_v60  ;;  %v721_v15 = vshll.u32 %v5867_v1, %v712_v60  ;;  %v3250_v55 = vadd.s32 4294967294, %v246_v8 }
 0x10f   :  { %v341_v12 = vsel %vm339_vm4, %v340_v7, %v3906_v53  ;;  %v716_v48 = vshrl.u32 %v5873_v63, %v713_v5  ;;  %v719_v54 = vshrl.u32 %v5867_v1, %v713_v5  ;;  %v3926_v19 = vsub.s32 %v654_v18, %v657_v10 }
 0x110   :  { %v342_v14 = vadd.s32 %v341_v12, %v337_v11  ;;  %v722_v22 = vshrl.u32 %v5865_v4, %v713_v5  ;;  %v706_v23 = vor.u32 8388608, %v705_v62  ;;  %v724_v9 = vshll.u32 %v5865_v4, %v712_v60 }
 0x111   :  { %v725_v27 = vshrl.u32 %v5863_v6, %v713_v5  ;;  %v727_v28 = vshll.u32 %v5863_v6, %v712_v60  ;;  %v711_v34 = vshrl.u32 %v710_v52, 5  ;;  %v717_v16 = vor.u32 %v716_v48, %v715_v50 }
 0x112   :  { %v343_v20 = vadd.s32 536870912, %v342_v14  ;;  %v720_v35 = vor.u32 %v719_v54, %v718_v56  ;;  %v723_v36 = vor.u32 %v722_v22, %v721_v15  ;;  %v728_v18 = vshrl.u32 %v5860_v13, %v713_v5 }
 0x113   :  { %v726_v40 = vor.u32 %v725_v27, %v724_v9  ;;  %v660_v43 = vsub.s32 0, %v3926_v19  ;;  %vm3251_vm5 = vcmp.lt.s32.totalorder %v3250_v55, 0  ;;  %v746_v58 = vshll.u32 %v706_v23, 8 }
 0x114   :  { %v3932_v32 = vshrl.u32 %v343_v20, 30  ;;  %v729_v53 = vor.u32 %v728_v18, %v727_v28  ;;  %v3941_v60 = vadd.f32 %v3762_v33, %v3935_v42  ;;  %v714_v0 = vshrl.u32 %v5875_v59, %v713_v5 }
 0x115   :  { %vm730_vm6 = vcmp.lt.s32.totalorder %v711_v34, 1  ;;  %vm733_vm7 = vcmp.lt.s32.totalorder %v711_v34, 4  ;;  %vm732_vm8 = vcmp.lt.s32.totalorder %v711_v34, 3  ;;  %v3265_v11 = vmin.u32 %v660_v43, %v3926_v19 }
 0x116   :  { %v345_v44 = vshll.u32 %v3932_v32, 30  ;;  %v735_v7 = vsel %vm733_vm7, %v723_v36, 2102212464  ;;  %v738_v8 = vsel %vm730_vm6, %v717_v16, %v720_v35  ;;  %v739_v10 = vsel %vm733_vm7, %v726_v40, 920167782 }
 0x117   :  { %vm731_vm9 = vcmp.lt.s32.totalorder %v711_v34, 2  ;;  %v740_v62 = vsel %vm732_vm8, %v723_v36, %v739_v10  ;;  %v742_v48 = vsel %vm730_vm6, %v720_v35, %v723_v36  ;;  %v743_v33 = vsel %vm733_vm7, %v729_v53, 1326507024 }
 0x118   :  { %v3943_v52 = vsub.s32 %v342_v14, %v345_v44  ;;  %v741_v50 = vsel %vm731_vm9, %v738_v8, %v740_v62  ;;  %v389_v14 = vand.u32 2139095040, %v3941_v60  ;;  %v249_v56 = vsel %vm3251_vm5, 0, %v3250_v55 }
 0x119   :  { %v734_v5 = vsel %vm730_vm6, %v714_v0, %v717_v16  ;;  %v736_v54 = vsel %vm732_vm8, %v720_v35, %v735_v7  ;;  %v744_v15 = vsel %vm732_vm8, %v726_v40, %v743_v33  ;;  %v662_v27 = vclz %v3265_v11  ;;  %v3962_v11 = vpop.permute.xlu1 %59 }
 0x11a   :  { %v348_v12 = vsub.s32 0, %v3943_v52  ;;  %v745_v22 = vsel %vm731_vm9, %v742_v48, %v744_v15  ;;  %v3951_v23 = vmul.u32.u64.low %v746_v58, %v741_v50  ;;  %v3952_v9 = vmul.u32.u64.high %v746_v58, %v741_v50, %v3951_v23 }
 0x11b   :  { %v3955_v28 = vmul.u32.u64.low %v746_v58, %v745_v22  ;;  %v3956_v34 = vmul.u32.u64.high %v746_v58, %v745_v22, %v3955_v28  ;;  %v737_v36 = vsel %vm731_vm9, %v734_v5, %v736_v54  ;;  %v390_v18 = vshrl.u32 %v389_v14, 23 }
 0x11c   :  { %v3253_v20 = vmin.u32 %v348_v12, %v3943_v52  ;;  %v254_v43 = vsub.s32 4294967266, %v249_v56  ;;  %v756_v55 = vadd.s32 1, %v3952_v9  ;;  %v3266_v35 = vadd.s32 4294967294, %v662_v27 }
 0x11d   :  { %v3256_v16 = vadd.s32 4294967169, %v390_v18  ;;  %v753_v40 = vmul.u32 %v746_v58, %v737_v36  ;;  %vm755_vm10 = vc.u32 %v3956_v34, %v3951_v23  ;;  %v250_v7 = vsub.s32 32, %v249_v56 }
 0x11e   :  { %v350_v44 = vclz %v3253_v20  ;;  %v757_v53 = vsel %vm755_vm10, %v756_v55, %v3952_v9  ;;  %v255_v8 = vadd.s32 127, %v254_v43  ;;  %v234_v12 = vadd.s32 %v3814_v49, %v3811_v47 }
 0x11f   :  { %v396_v0 = vadd.s32 1, %v3256_v16  ;;  %v758_v10 = vadd.s32 %v757_v53, %v753_v40  ;;  %v5856_v50 = vand.u32 2147483647, %v3941_v60  ;;  %vm3267_vm12 = vcmp.lt.s32.totalorder %v3266_v35, 0 }
 0x120   :  { %v3254_v62 = vadd.s32 4294967294, %v350_v44  ;;  %v3969_v33 = vadd.f32 %v3768_v41, %v3962_v11  ;;  %v251_v5 = vshll.u32 %v3890_v17, %v249_v56  ;;  %v252_v54 = vshrl.u32 %v234_v12, %v250_v7 }
 0x121   :  { %vm397_vm11 = vcmp.gt.s32.totalorder %v396_v0, 0  ;;  %v759_v58 = vadd.s32 536870912, %v758_v10  ;;  %v256_v15 = vshll.u32 %v255_v8, 23  ;;  %v3974_v22 = vsel %vm3267_vm12, 0, %v3266_v35 }
 0x122   :  { %v398_v48 = vsel %vm397_vm11, %v396_v0, 0  ;;  %vm3255_vm13 = vcmp.lt.s32.totalorder %v3254_v62, 0  ;;  %v393_v47 = vand.u32 8388607, %v5856_v50  ;;  %v805_v28 = vand.u32 2139095040, %v3969_v33 }
 0x123   :  { %v400_v14 = vand.u32 31, %v398_v48  ;;  %v3972_v20 = vshrl.u32 %v759_v58, 30  ;;  %v399_v43 = vshrl.u32 %v398_v48, 5  ;;  %v253_v7 = vor.u32 %v252_v54, %v251_v5 }
 0x124   :  { %v257_v8 = vor.u32 4788187, %v256_v15  ;;  %v264_v12 = vsub.s32 4, %v3868_v39  ;;  %vm180_vm14 = vcmp.lt.s32.totalorder %v3753_v25, 0  ;;  %v670_v48 = vsub.s32 4294967266, %v3974_v22 }
 0x125   :  { %v401_v49 = vsub.s32 32, %v400_v14  ;;  %v403_v9 = vshll.u32 %v5875_v59, %v400_v14  ;;  %v406_v27 = vshll.u32 %v5873_v63, %v400_v14  ;;  %v409_v41 = vshll.u32 %v5867_v1, %v400_v14 }
 0x126   :  { %v761_v17 = vshll.u32 %v3972_v20, 30  ;;  %v412_v44 = vshll.u32 %v5865_v4, %v400_v14  ;;  %v415_v16 = vshll.u32 %v5863_v6, %v400_v14  ;;  %v394_v3 = vor.u32 8388608, %v393_v47 }
 0x127   :  { %v404_v56 = vshrl.u32 %v5873_v63, %v401_v49  ;;  %v407_v36 = vshrl.u32 %v5867_v1, %v401_v49  ;;  %v410_v18 = vshrl.u32 %v5865_v4, %v401_v49  ;;  %v413_v55 = vshrl.u32 %v5863_v6, %v401_v49 }
 0x128   :  { %v416_v0 = vshrl.u32 %v5860_v13, %v401_v49  ;;  %v3993_v2 = vsub.s32 %v758_v10, %v761_v17  ;;  %v3996_v14 = vsel %vm3255_vm13, 0, %v3254_v62  ;;  %vm418_vm15 = vcmp.lt.s32.totalorder %v399_v43, 1 }
 0x129   :  { %v405_v35 = vor.u32 %v404_v56, %v403_v9  ;;  %v408_v40 = vor.u32 %v407_v36, %v406_v27  ;;  %v411_v53 = vor.u32 %v410_v18, %v409_v41  ;;  %v414_v58 = vor.u32 %v413_v55, %v412_v44 }
 0x12a   :  { %v417_v50 = vor.u32 %v416_v0, %v415_v16  ;;  %vm421_vm0 = vcmp.lt.s32.totalorder %v399_v43, 4  ;;  %v806_v9 = vshrl.u32 %v805_v28, 23  ;;  %vm420_vm1 = vcmp.lt.s32.totalorder %v399_v43, 3 }
 0x12b   :  { %v423_v5 = vsel %vm421_vm0, %v411_v53, 2102212464  ;;  %v426_v54 = vsel %vm418_vm15, %v405_v35, %v408_v40  ;;  %v427_v15 = vsel %vm421_vm0, %v414_v58, 920167782  ;;  %v402_v27 = vshrl.u32 %v5875_v59, %v401_v49 }
 0x12c   :  { %vm419_vm2 = vcmp.lt.s32.totalorder %v399_v43, 2  ;;  %v428_v41 = vsel %vm420_vm1, %v411_v53, %v427_v15  ;;  %v430_v56 = vsel %vm418_vm15, %v408_v40, %v411_v53  ;;  %v764_v10 = vsub.s32 0, %v3993_v2 }
 0x12d   :  { %v429_v47 = vsel %vm419_vm2, %v426_v54, %v428_v41  ;;  %v431_v17 = vsel %vm421_vm0, %v417_v50, 1326507024  ;;  %v434_v36 = vshll.u32 %v394_v3, 8  ;;  %v422_v62 = vsel %vm418_vm15, %v402_v27, %v405_v35 }
 0x12e   :  { %v424_v18 = vsel %vm420_vm1, %v408_v40, %v423_v5  ;;  %v432_v44 = vsel %vm420_vm1, %v414_v58, %v431_v17  ;;  %v3272_v55 = vadd.s32 4294967169, %v806_v9  ;;  %v666_v28 = vsub.s32 32, %v3974_v22 }
 0x12f   :  { %v433_v16 = vsel %vm419_vm2, %v430_v56, %v432_v44  ;;  %v4003_v0 = vmul.u32.u64.low %v434_v36, %v429_v47  ;;  %v4004_v37 = vmul.u32.u64.high %v434_v36, %v429_v47, %v4003_v0  ;;  %v650_v49 = vadd.s32 %v3855_v24, %v3861_v31 }
 0x130   :  { %v671_v53 = vadd.s32 127, %v670_v48  ;;  %v4009_v15 = vmul.u32.u64.low %v434_v36, %v433_v16  ;;  %v4010_v54 = vmul.u32.u64.high %v434_v36, %v433_v16, %v4009_v15  ;;  %v358_v3 = vsub.s32 4294967266, %v3996_v14 }
 0x131   :  { %v3269_v50 = vmin.u32 %v764_v10, %v3993_v2  ;;  %v425_v35 = vsel %vm419_vm2, %v422_v62, %v424_v18  ;;  %v812_v40 = vadd.s32 1, %v3272_v55  ;;  %v260_v58 = vcvt.s32.f32 %v253_v7 }
 0x132   :  { %v4018_v9 = vsel %vm180_vm14, %v264_v12, %v3868_v39  ;;  %v4022_v24 = vadd.f32 %v3770_v45, %v3935_v42  ;;  %v258_v31 = vand.u32 2147483647, %v257_v8  ;;  %v668_v48 = vshrl.u32 %v650_v49, %v666_v28 }
 0x133   :  { %v444_v5 = vadd.s32 1, %v4004_v37  ;;  %vm813_vm3 = vcmp.gt.s32.totalorder %v812_v40, 0  ;;  %v672_v27 = vshll.u32 %v671_v53, 23  ;;  %v441_v41 = vmul.u32 %v434_v36, %v425_v35 }
 0x134   :  { %vm443_vm4 = vc.u32 %v4010_v54, %v4003_v0  ;;  %v5858_v43 = vand.u32 2147483647, %v3969_v33  ;;  %v359_v7 = vadd.s32 127, %v358_v3  ;;  %v766_v56 = vclz %v3269_v50 }
 0x135   :  { %v445_v39 = vsel %vm443_vm4, %v444_v5, %v4004_v37  ;;  %v814_v12 = vsel %vm813_vm3, %v812_v40, 0  ;;  %vm4031_vm5 = vcmp.le.f32.partialorder %v178_v30, 0.7853982  ;;  %v667_v42 = vshll.u32 %v3926_v19, %v3974_v22 }
 0x136   :  { %v446_v8 = vadd.s32 %v445_v39, %v441_v41  ;;  %v493_v10 = vand.u32 2139095040, %v4022_v24  ;;  %v4038_v47 = vmul.f32 %v260_v58, %v258_v31  ;;  %v338_v37 = vadd.s32 %v3905_v38, %v3903_v51 }
 0x137   :  { %v816_v36 = vand.u32 31, %v814_v12  ;;  %v4045_v30 = vor.u32 %v668_v48, %v667_v42  ;;  %v4047_v62 = vor.u32 4788187, %v672_v27  ;;  %v354_v18 = vsub.s32 32, %v3996_v14 }
 0x138   :  { %v447_v19 = vadd.s32 536870912, %v446_v8  ;;  %v360_v22 = vshll.u32 %v359_v7, 23  ;;  %v3270_v44 = vadd.s32 4294967294, %v766_v56  ;;  %v809_v55 = vand.u32 8388607, %v5858_v43 }
 0x139   :  { %v817_v28 = vsub.s32 32, %v816_v36  ;;  %v819_v49 = vshll.u32 %v5875_v59, %v816_v36  ;;  %v822_v51 = vshll.u32 %v5873_v63, %v816_v36  ;;  %v494_v38 = vshrl.u32 %v493_v10, 23 }
 0x13a   :  { %v4052_v16 = vshrl.u32 %v447_v19, 30  ;;  %v825_v3 = vshll.u32 %v5867_v1, %v816_v36  ;;  %v815_v40 = vshrl.u32 %v814_v12, 5  ;;  %v828_v58 = vshll.u32 %v5865_v4, %v816_v36 }
 0x13b   :  { %v820_v53 = vshrl.u32 %v5873_v63, %v817_v28  ;;  %v823_v15 = vshrl.u32 %v5867_v1, %v817_v28  ;;  %v826_v50 = vshrl.u32 %v5865_v4, %v817_v28  ;;  %v829_v31 = vshrl.u32 %v5863_v6, %v817_v28 }
 0x13c   :  { %v449_v35 = vshll.u32 %v4052_v16, 30  ;;  %v832_v41 = vshrl.u32 %v5860_v13, %v817_v28  ;;  %v810_v56 = vor.u32 8388608, %v809_v55  ;;  %v831_v42 = vshll.u32 %v5863_v6, %v816_v36 }
 0x13d   :  { %v821_v48 = vor.u32 %v820_v53, %v819_v49  ;;  %v824_v5 = vor.u32 %v823_v15, %v822_v51  ;;  %v827_v27 = vor.u32 %v826_v50, %v825_v3  ;;  %v830_v39 = vor.u32 %v829_v31, %v828_v58 }
 0x13e   :  { %v4064_v7 = vsub.s32 %v446_v8, %v449_v35  ;;  %v355_v10 = vshll.u32 %v3943_v52, %v3996_v14  ;;  %v356_v19 = vshrl.u32 %v338_v37, %v354_v18  ;;  %v361_v12 = vor.u32 4788187, %v360_v22 }
 0x13f   :  { %vm3271_vm6 = vcmp.lt.s32.totalorder %v3270_v44, 0  ;;  %v833_v17 = vor.u32 %v832_v41, %v831_v42  ;;  %vm834_vm7 = vcmp.lt.s32.totalorder %v815_v40, 1  ;;  %vm837_vm8 = vcmp.lt.s32.totalorder %v815_v40, 4 }
 0x140   :  { %v452_v43 = vsub.s32 0, %v4064_v7  ;;  %v818_v49 = vshrl.u32 %v5875_v59, %v817_v28  ;;  %v839_v8 = vsel %vm837_vm8, %v827_v27, 2102212464  ;;  %v842_v51 = vsel %vm834_vm7, %v821_v48, %v824_v5 }
 0x141   :  { %v3260_v55 = vadd.s32 4294967169, %v494_v38  ;;  %vm836_vm9 = vcmp.lt.s32.totalorder %v815_v40, 3  ;;  %v843_v36 = vsel %vm837_vm8, %v830_v39, 920167782  ;;  %v850_v52 = vshll.u32 %v810_v56, 8 }
 0x142   :  { %v3257_v53 = vmin.u32 %v452_v43, %v4064_v7  ;;  %vm835_vm10 = vcmp.lt.s32.totalorder %v815_v40, 2  ;;  %v838_v14 = vsel %vm834_vm7, %v818_v49, %v821_v48  ;;  %v844_v37 = vsel %vm836_vm9, %v827_v27, %v843_v36 }
 0x143   :  { %v846_v18 = vsel %vm834_vm7, %v824_v5, %v827_v27  ;;  %v840_v15 = vsel %vm836_vm9, %v824_v5, %v839_v8  ;;  %v845_v3 = vsel %vm835_vm10, %v842_v51, %v844_v37  ;;  %v847_v28 = vsel %vm837_vm8, %v833_v17, 1326507024 }
 0x144   :  { %v454_v22 = vclz %v3257_v53  ;;  %v848_v50 = vsel %vm836_vm9, %v830_v39, %v847_v28  ;;  %v4076_v35 = vmul.u32.u64.low %v850_v52, %v845_v3  ;;  %v4077_v58 = vmul.u32.u64.high %v850_v52, %v845_v3, %v4076_v35 }
 0x145   :  { %v500_v43 = vadd.s32 1, %v3260_v55  ;;  %v357_v38 = vor.u32 %v356_v19, %v355_v10  ;;  %v4081_v31 = vsel %vm3271_vm6, 0, %v3270_v44  ;;  %v849_v48 = vsel %vm835_vm10, %v846_v18, %v848_v50 }
 0x146   :  { %v5859_v27 = vand.u32 2147483647, %v4022_v24  ;;  %v4086_v41 = vmul.u32.u64.low %v850_v52, %v849_v48  ;;  %v4087_v56 = vmul.u32.u64.high %v850_v52, %v849_v48, %v4086_v41  ;;  %v362_v17 = vand.u32 2147483647, %v361_v12 }
 0x147   :  { %vm501_vm11 = vcmp.gt.s32.totalorder %v500_v43, 0  ;;  %v3258_v39 = vadd.s32 4294967294, %v454_v22  ;;  %v841_v42 = vsel %vm835_vm10, %v838_v14, %v840_v15  ;;  %v676_v10 = vcvt.s32.f32 %v4045_v30 }
 0x148   :  { %v502_v49 = vsel %vm501_vm11, %v500_v43, 0  ;;  %v774_v44 = vsub.s32 4294967266, %v4081_v31  ;;  %v860_v19 = vadd.s32 1, %v4077_v58  ;;  %v674_v51 = vand.u32 2147483647, %v4047_v62 }
 0x149   :  { %v504_v8 = vand.u32 31, %v502_v49  ;;  %v364_v55 = vcvt.s32.f32 %v357_v38  ;;  %v497_v53 = vand.u32 8388607, %v5859_v27  ;;  %v4098_v12 = vadd.f32 %v3772_v46, %v3962_v11 }
 0x14a   :  { %v4102_v40 = vadd.s32 %v3951_v23, %v3956_v34  ;;  %v857_v36 = vmul.u32 %v850_v52, %v841_v42  ;;  %vm859_vm12 = vc.u32 %v4087_v56, %v4076_v35  ;;  %v770_v18 = vsub.s32 32, %v4081_v31 }
 0x14b   :  { %v505_v14 = vsub.s32 32, %v504_v8  ;;  %v4106_v37 = vmul.f32 %v364_v55, %v362_v17  ;;  %vm3259_vm13 = vcmp.lt.s32.totalorder %v3258_v39, 0  ;;  %v861_v22 = vsel %vm859_vm12, %v860_v19, %v4077_v58 }
 0x14c   :  { %v4110_v15 = vadd.s32 127, %v774_v44  ;;  %v862_v46 = vadd.s32 %v861_v22, %v857_v36  ;;  %v498_v34 = vor.u32 8388608, %v497_v53  ;;  %v507_v52 = vshll.u32 %v5875_v59, %v504_v8 }
 0x14d   :  { %v508_v11 = vshrl.u32 %v5873_v63, %v505_v14  ;;  %v511_v23 = vshrl.u32 %v5867_v1, %v505_v14  ;;  %v510_v3 = vshll.u32 %v5873_v63, %v504_v8  ;;  %v514_v28 = vshrl.u32 %v5865_v4, %v505_v14 }
 0x14e   :  { %v457_v50 = vsel %vm3259_vm13, 0, %v3258_v39  ;;  %v863_v43 = vadd.s32 536870912, %v862_v46  ;;  %v503_v38 = vshrl.u32 %v502_v49, 5  ;;  %v513_v48 = vshll.u32 %v5867_v1, %v504_v8 }
 0x14f   :  { %v509_v58 = vor.u32 %v508_v11, %v507_v52  ;;  %v512_v41 = vor.u32 %v511_v23, %v510_v3  ;;  %v516_v17 = vshll.u32 %v5865_v4, %v504_v8  ;;  %v517_v42 = vshrl.u32 %v5863_v6, %v505_v14 }
 0x150   :  { %v442_v44 = vadd.s32 %v4003_v0, %v4010_v54  ;;  %v4122_v19 = vshrl.u32 %v863_v43, 30  ;;  %v520_v55 = vshrl.u32 %v5860_v13, %v505_v14  ;;  %v909_v53 = vand.u32 2139095040, %v4098_v12 }
 0x151   :  { %v462_v39 = vsub.s32 4294967266, %v457_v50  ;;  %v515_v36 = vor.u32 %v514_v28, %v513_v48  ;;  %v518_v49 = vor.u32 %v517_v42, %v516_v17  ;;  %v519_v22 = vshll.u32 %v5863_v6, %v504_v8 }
 0x152   :  { %v776_v11 = vshll.u32 %v4110_v15, 23  ;;  %v865_v23 = vshll.u32 %v4122_v19, 30  ;;  %vm522_vm15 = vcmp.lt.s32.totalorder %v503_v38, 1  ;;  %v538_v52 = vshll.u32 %v498_v34, 8 }
 0x153   :  { %v458_v3 = vsub.s32 32, %v457_v50  ;;  %v521_v27 = vor.u32 %v520_v55, %v519_v22  ;;  %vm525_vm0 = vcmp.lt.s32.totalorder %v503_v38, 4  ;;  %v530_v0 = vsel %vm522_vm15, %v509_v58, %v512_v41 }
 0x154   :  { %v4130_v54 = vsub.s32 %v862_v46, %v865_v23  ;;  %vm524_vm1 = vcmp.lt.s32.totalorder %v503_v38, 3  ;;  %v531_v43 = vsel %vm525_vm0, %v518_v49, 920167782  ;;  %v910_v5 = vshrl.u32 %v909_v53, 23 }
 0x155   :  { %v463_v28 = vadd.s32 127, %v462_v39  ;;  %vm523_vm2 = vcmp.lt.s32.totalorder %v503_v38, 2  ;;  %v527_v48 = vsel %vm525_vm0, %v515_v36, 2102212464  ;;  %v532_v8 = vsel %vm524_vm1, %v515_v36, %v531_v43 }
 0x156   :  { %v868_v15 = vsub.s32 0, %v4130_v54  ;;  %v506_v17 = vshrl.u32 %v5875_v59, %v505_v14  ;;  %v533_v34 = vsel %vm523_vm2, %v530_v0, %v532_v8  ;;  %v534_v42 = vsel %vm522_vm15, %v512_v41, %v515_v36 }
 0x157   :  { %vm284_vm3 = vcmp.lt.s32.totalorder %v3757_v29, 0  ;;  %v535_v46 = vsel %vm525_vm0, %v521_v27, 1326507024  ;;  %v4138_v55 = vmul.u32.u64.low %v538_v52, %v533_v34  ;;  %v4139_v22 = vmul.u32.u64.high %v538_v52, %v533_v34, %v4138_v55 }
 0x158   :  { %v906_v53 = vand.u32 2147483647, %v4098_v12  ;;  %v3273_v39 = vmin.u32 %v868_v15, %v4130_v54  ;;  %v526_v23 = vsel %vm522_vm15, %v506_v17, %v509_v58  ;;  %v528_v43 = vsel %vm524_vm1, %v512_v41, %v527_v48 }
 0x159   :  { %v536_v14 = vsel %vm524_vm1, %v518_v49, %v535_v46  ;;  %v460_v0 = vshrl.u32 %v442_v44, %v458_v3  ;;  %v464_v8 = vshll.u32 %v463_v28, 23  ;;  %v3276_v13 = vadd.s32 4294967169, %v910_v5 }
 0x15a   :  { %v537_v36 = vsel %vm523_vm2, %v534_v42, %v536_v14  ;;  %v366_v27 = vxor.u32 2147483648, %v4106_v37  ;;  %v870_v34 = vclz %v3273_v39  ;;  %v459_v4 = vshll.u32 %v4064_v7, %v457_v50 }
 0x15b   :  { %v4149_v21 = vmul.u32.u64.low %v538_v52, %v537_v36  ;;  %v4150_v6 = vmul.u32.u64.high %v538_v52, %v537_v36, %v4149_v21  ;;  %v529_v15 = vsel %vm523_vm2, %v526_v23, %v528_v43  ;;  %v548_v58 = vadd.s32 1, %v4139_v22 }
 0x15c   :  { %v916_v41 = vadd.s32 1, %v3276_v13  ;;  %v771_v44 = vshll.u32 %v3993_v2, %v4081_v31  ;;  %v772_v5 = vshrl.u32 %v4102_v40, %v770_v18  ;;  %v4160_v49 = vor.u32 4788187, %v776_v11 }
 0x15d   :  { %v3274_v3 = vadd.s32 4294967294, %v870_v34  ;;  %v461_v28 = vor.u32 %v460_v0, %v459_v4  ;;  %v465_v48 = vor.u32 4788187, %v464_v8  ;;  %v913_v21 = vand.u32 8388607, %v906_v53 }
 0x15e   :  { %vm917_vm4 = vcmp.gt.s32.totalorder %v916_v41, 0  ;;  %v545_v7 = vmul.u32 %v538_v52, %v529_v15  ;;  %vm547_vm7 = vc.u32 %v4150_v6, %v4138_v55  ;;  %v4170_v2 = vmul.f32 %v676_v10, %v674_v51 }
 0x15f   :  { %vm3275_vm6 = vcmp.lt.s32.totalorder %v3274_v3, 0  ;;  %v918_v13 = vsel %vm917_vm4, %v916_v41, 0  ;;  %v549_v4 = vsel %vm547_vm7, %v548_v58, %v4139_v22  ;;  %v367_v18 = vsel %vm284_vm3, %v366_v27, %v4106_v37 }
 0x160   :  { %v4172_v31 = vsel %vm3275_vm6, 0, %v3274_v3  ;;  %v920_v40 = vand.u32 31, %v918_v13  ;;  %v4178_v50 = vor.u32 %v772_v5, %v771_v44  ;;  %v778_v38 = vand.u32 2147483647, %v4160_v49 }
 0x161   :  { %v550_v11 = vadd.s32 %v549_v4, %v545_v7  ;;  %v466_v52 = vand.u32 2147483647, %v465_v48  ;;  %v468_v62 = vcvt.s32.f32 %v461_v28  ;;  %v914_v17 = vor.u32 8388608, %v913_v21 }
 0x162   :  { %v921_v30 = vsub.s32 32, %v920_v40  ;;  %v878_v10 = vsub.s32 4294967266, %v4172_v31  ;;  %v923_v42 = vshll.u32 %v5875_v59, %v920_v40  ;;  %v926_v46 = vshll.u32 %v5873_v63, %v920_v40 }
 0x163   :  { %v551_v51 = vadd.s32 536870912, %v550_v11  ;;  %v929_v39 = vshll.u32 %v5867_v1, %v920_v40  ;;  %v5886_v23 = vmov 2102212464   ;;  %v919_v0 = vshrl.u32 %v918_v13, 5 }
 0x164   :  { %v924_v22 = vshrl.u32 %v5873_v63, %v921_v30  ;;  %v927_v37 = vshrl.u32 %v5867_v1, %v921_v30  ;;  %v930_v43 = vshrl.u32 %v5886_v23, %v921_v30  ;;  %v932_v8 = vshll.u32 %v5886_v23, %v920_v40 }
 0x165   :  { %v4188_v14 = vshrl.u32 %v551_v51, 30  ;;  %v5887_v36 = vmov 920167782   ;;  %v5888_v34 = vand.u32 2147483647, %v3757_v29  ;;  %v858_v58 = vadd.s32 %v4076_v35, %v4087_v56 }
 0x166   :  { %v933_v27 = vshrl.u32 %v5887_v36, %v921_v30  ;;  %v925_v41 = vor.u32 %v924_v22, %v923_v42  ;;  %v928_v44 = vor.u32 %v927_v37, %v926_v46  ;;  %v931_v5 = vor.u32 %v930_v43, %v929_v39 }
 0x167   :  { %vm4194_vm8 = vcmp.le.f32.partialorder %v5888_v34, 0.7853982  ;;  %v469_v3 = vmul.f32 %v468_v62, %v466_v52  ;;  %v553_v28 = vshll.u32 %v4188_v14, 30  ;;  %v954_v21 = vshll.u32 %v914_v17, 8 }
 0x168   :  { %v934_v48 = vor.u32 %v933_v27, %v932_v8  ;;  %v874_v7 = vsub.s32 32, %v4172_v31  ;;  %v879_v13 = vadd.s32 127, %v878_v10  ;;  %v935_v4 = vshll.u32 %v5887_v36, %v920_v40 }
 0x169   :  { %v5891_v51 = vmov 1326507024   ;;  %v4204_v1 = vsub.s32 %v550_v11, %v553_v28  ;;  %vm938_vm9 = vcmp.lt.s32.totalorder %v919_v0, 1  ;;  %vm940_vm10 = vcmp.lt.s32.totalorder %v919_v0, 3 }
 0x16a   :  { %v936_v34 = vshrl.u32 %v5891_v51, %v921_v30  ;;  %vm941_vm11 = vcmp.lt.s32.totalorder %v919_v0, 4  ;;  %v946_v52 = vsel %vm938_vm9, %v925_v41, %v928_v44  ;;  %vm388_vm12 = vcmp.lt.s32.totalorder %v3941_v60, 0 }
 0x16b   :  { %v943_v56 = vsel %vm941_vm11, %v931_v5, 2102212464  ;;  %v947_v62 = vsel %vm941_vm11, %v934_v48, 920167782  ;;  %v556_v17 = vsub.s32 0, %v4204_v1  ;;  %v922_v10 = vshrl.u32 %v5875_v59, %v921_v30 }
 0x16c   :  { %v937_v35 = vor.u32 %v936_v34, %v935_v4  ;;  %vm939_vm13 = vcmp.lt.s32.totalorder %v919_v0, 2  ;;  %v948_v40 = vsel %vm940_vm10, %v931_v5, %v947_v62  ;;  %v880_v42 = vshll.u32 %v879_v13, 23 }
 0x16d   :  { %v949_v11 = vsel %vm939_vm13, %v946_v52, %v948_v40  ;;  %v950_v46 = vsel %vm938_vm9, %v928_v44, %v931_v5  ;;  %v3261_v37 = vmin.u32 %v556_v17, %v4204_v1  ;;  %v942_v39 = vsel %vm938_vm9, %v922_v10, %v925_v41 }
 0x16e   :  { %v951_v22 = vsel %vm941_vm11, %v937_v35, 1326507024  ;;  %v944_v43 = vsel %vm940_vm10, %v928_v44, %v943_v56  ;;  %v876_v27 = vshrl.u32 %v858_v58, %v874_v7  ;;  %vm596_vm15 = vcmp.lt.s32.totalorder %v3755_v26, 0 }
 0x16f   :  { %v952_v8 = vsel %vm940_vm10, %v934_v48, %v951_v22  ;;  %v4218_v28 = vmul.u32.u64.low %v954_v21, %v949_v11  ;;  %v4219_v4 = vmul.u32.u64.high %v954_v21, %v949_v11, %v4218_v28  ;;  %v370_v5 = vsel %vm4194_vm8, %v3757_v29, %v367_v18 }
 0x170   :  { %v953_v30 = vsel %vm939_vm13, %v950_v46, %v952_v8  ;;  %v558_v13 = vclz %v3261_v37  ;;  %v780_v44 = vcvt.s32.f32 %v4178_v50  ;;  %v470_v48 = vxor.u32 2147483648, %v469_v3 }
 0x171   :  { %v4226_v34 = vmul.u32.u64.low %v954_v21, %v953_v30  ;;  %v4227_v41 = vmul.u32.u64.high %v954_v21, %v953_v30, %v4226_v34  ;;  %v875_v58 = vshll.u32 %v4130_v54, %v4172_v31  ;;  %v945_v7 = vsel %vm939_vm13, %v942_v39, %v944_v43 }
 0x172   :  { %v5892_v35 = vxor.u32 2147483648, %v4038_v47  ;;  %v678_v18 = vxor.u32 2147483648, %v4170_v2  ;;  %v881_v52 = vor.u32 4788187, %v880_v42  ;;  %v3262_v62 = vadd.s32 4294967294, %v558_v13 }
 0x173   :  { %3502 = vcosq.f32 %v370_v5  ;;  %v781_v50 = vmul.f32 %v780_v44, %v778_v38  ;;  %v877_v17 = vor.u32 %v876_v27, %v875_v58  ;;  %v964_v10 = vadd.s32 1, %v4219_v4 }
 0x174   :  { %v263_v56 = vsel %vm180_vm14, %v5892_v35, %v4038_v47  ;;  %v5893_v54 = vand.u32 2147483647, %v3755_v26  ;;  %vm700_vm1 = vcmp.lt.s32.totalorder %v3783_v57, 0  ;;  %vm3263_vm14 = vcmp.lt.s32.totalorder %v3262_v62, 0 }
 0x175   :  { %v961_v47 = vmul.u32 %v954_v21, %v945_v7  ;;  %vm963_vm2 = vc.u32 %v4227_v41, %v4218_v28  ;;  %v368_v0 = vsub.s32 4, %v3932_v32  ;;  %v471_v49 = vsel %vm388_vm12, %v470_v48, %v469_v3 }
 0x176   :  { %vm4244_vm0 = vcmp.le.f32.partialorder %v5893_v54, 0.7853982  ;;  %v546_v38 = vadd.s32 %v4138_v55, %v4150_v6  ;;  %v561_v40 = vsel %vm3263_vm14, 0, %v3262_v62  ;;  %v965_v42 = vsel %vm963_vm2, %v964_v10, %v4219_v4 }
 0x177   :  { %v882_v11 = vand.u32 2147483647, %v881_v52  ;;  %v562_v46 = vsub.s32 32, %v561_v40  ;;  %v566_v22 = vsub.s32 4294967266, %v561_v40  ;;  %v966_v37 = vadd.s32 %v965_v42, %v961_v47 }
 0x178   :  { %v266_v21 = vsel %vm4031_vm5, %v3753_v25, %v263_v56  ;;  %3504 = vsinq.f32 %v370_v5  ;;  %v5896_v39 = vand.u32 2147483647, %v3941_v60  ;;  %v884_v3 = vcvt.s32.f32 %v877_v17 }
 0x179   :  { %v563_v6 = vshll.u32 %v4204_v1, %v561_v40  ;;  %v564_v55 = vshrl.u32 %v546_v38, %v562_v46  ;;  %v567_v8 = vadd.s32 127, %v566_v22  ;;  %v967_v27 = vadd.s32 536870912, %v966_v37 }
 0x17a   :  { %vm4262_vm4 = vcmp.le.f32.partialorder %v5896_v39, 0.7853982  ;;  %v679_v30 = vsel %vm596_vm15, %v678_v18, %v4170_v2  ;;  %v782_v4 = vxor.u32 2147483648, %v781_v50  ;;  %v369_v13 = vsel %vm284_vm3, %v368_v0, %v3932_v32 }
 0x17b   :  { %v474_v5 = vsel %vm4262_vm4, %v3941_v60, %v471_v49  ;;  %v885_v34 = vmul.f32 %v884_v3, %v882_v11  ;;  %v565_v44 = vor.u32 %v564_v55, %v563_v6  ;;  %v568_v48 = vshll.u32 %v567_v8, 23 }
 0x17c   :  { %v4276_v1 = vshrl.u32 %v967_v27, 30  ;;  %3506 = vsinq.f32 %v266_v21  ;;  %v5899_v58 = vsel %vm4031_vm5, 0, %v4018_v9  ;;  %v5900_v7 = vand.u32 2147483647, %v3783_v57 }
 0x17d   :  { %v4282_v2 = vadd.s32 3, %v5899_v58  ;;  %v472_v32 = vsub.s32 4, %v4052_v16  ;;  %3508 = vcosq.f32 %v474_v5  ;;  %v569_v56 = vor.u32 4788187, %v568_v48  ;;  %v3503_v45 = vpop.eup %3502 }
 0x17e   :  { %vm4286_vm6 = vcmp.le.f32.partialorder %v5900_v7, 0.7853982  ;;  %v969_v18 = vshll.u32 %v4276_v1, 30  ;;  %v371_v52 = vsel %vm4194_vm8, 0, %v369_v13  ;;  %v680_v9 = vsub.s32 4, %v3910_v61 }
 0x17f   :  { %v682_v62 = vsel %vm4244_vm0, %v3755_v26, %v679_v30  ;;  %v783_v17 = vsel %vm700_vm1, %v782_v4, %v781_v50  ;;  %3510 = vsinq.f32 %v474_v5  ;;  %v886_v10 = vxor.u32 2147483648, %v885_v34 }
 0x180   :  { %v570_v54 = vand.u32 2147483647, %v569_v56  ;;  %v572_v47 = vcvt.s32.f32 %v565_v44  ;;  %v4300_v0 = vsub.s32 %v966_v37, %v969_v18  ;;  %3512 = vcosq.f32 %v266_v21 }
 0x181   :  { %v473_v15 = vsel %vm388_vm12, %v472_v32, %v4052_v16  ;;  %v375_v49 = vadd.s32 3, %v371_v52  ;;  %v576_v38 = vsub.s32 4, %v4188_v14  ;;  %3514 = vcosq.f32 %v682_v62 }
 0x182   :  { %v786_v40 = vsel %vm4286_vm6, %v3783_v57, %v783_v17  ;;  %v573_v50 = vmul.f32 %v572_v47, %v570_v54  ;;  %v972_v42 = vsub.s32 0, %v4300_v0  ;;  %v3505_v11 = vpop.eup %3504  ;;  %3516 = vsinq.f32 %v682_v62 }
 0x183   :  { %v5903_v46 = vand.u32 2147483647, %v3969_v33  ;;  %vm804_vm3 = vcmp.lt.s32.totalorder %v3969_v33, 0  ;;  %vm492_vm7 = vcmp.lt.s32.totalorder %v4022_v24, 0  ;;  %v475_v16 = vsel %vm4262_vm4, 0, %v473_v15 }
 0x184   :  { %v887_v37 = vsel %vm804_vm3, %v886_v10, %v885_v34  ;;  %v574_v21 = vxor.u32 2147483648, %v573_v50  ;;  %v3277_v39 = vmin.u32 %v972_v42, %v4300_v0  ;;  %3518 = vcosq.f32 %v786_v40 }
 0x185   :  { %vm4312_vm5 = vcmp.le.f32.partialorder %v5903_v46, 0.7853982  ;;  %v888_v3 = vsub.s32 4, %v4122_v19  ;;  %v376_v6 = vand.u32 3, %v375_v49  ;;  %v577_v55 = vsel %vm492_vm7, %v576_v38, %v4188_v14 }
 0x186   :  { %3520 = vsinq.f32 %v786_v40  ;;  %v5906_v8 = vand.u32 2147483647, %v4022_v24  ;;  %v575_v43 = vsel %vm492_vm7, %v574_v21, %v573_v50  ;;  %v974_v30 = vclz %v3277_v39  ;;  %v3507_v4 = vpop.eup %3506 }
 0x187   :  { %v890_v5 = vsel %vm4312_vm5, %v3969_v33, %v887_v37  ;;  %v379_v34 = vxor.u32 2147483648, %v3505_v11  ;;  %v382_v14 = vxor.u32 2147483648, %v3503_v45  ;;  %v3509_v44 = vpop.eup %3508  ;;  %v479_v48 = vadd.s32 3, %v475_v16 }
 0x188   :  { %vm4327_vm8 = vcmp.le.f32.partialorder %v5906_v8, 0.7853982  ;;  %v3278_v58 = vadd.s32 4294967294, %v974_v30  ;;  %v4342_v56 = vsel %vm596_vm15, %v680_v9, %v3910_v61  ;;  %v4347_v18 = vsel %vm804_vm3, %v888_v3, %v4122_v19 }
 0x189   :  { %v578_v13 = vsel %vm4327_vm8, %v4022_v24, %v575_v43  ;;  %v579_v7 = vsel %vm4327_vm8, 0, %v577_v55  ;;  %v3511_v32 = vpop.eup %3510  ;;  %vm377_vm9 = vcmp.lt.s32.totalorder %v376_v6, 2  ;;  %vm378_vm11 = vcmp.eq.s32.totalorder %v376_v6, 0 }
 0x18a   :  { %3522 = vcosq.f32 %v578_v13  ;;  %vm3279_vm10 = vcmp.lt.s32.totalorder %v3278_v58, 0  ;;  %vm381_vm12 = vcmp.eq.s32.totalorder %v376_v6, 2  ;;  %v3513_v52 = vpop.eup %3512  ;;  %v380_v17 = vsel %vm378_vm11, %v3503_v45, %v379_v34 }
 0x18b   :  { %3524 = vsinq.f32 %v578_v13  ;;  %v977_v62 = vsel %vm3279_vm10, 0, %v3278_v58  ;;  %v383_v10 = vsel %vm381_vm12, %v382_v14, %v3505_v11  ;;  %v583_v54 = vadd.s32 3, %v579_v7  ;;  %v4349_v47 = vpop.eup %3514 }
 0x18c   :  { %3526 = vcosq.f32 %v890_v5  ;;  %v962_v61 = vadd.s32 %v4218_v28, %v4227_v41  ;;  %v978_v9 = vsub.s32 32, %v977_v62  ;;  %v982_v15 = vsub.s32 4294967266, %v977_v62  ;;  %v4353_v49 = vpop.eup %3516 }
 0x18d   :  { %v480_v19 = vand.u32 3, %v479_v48  ;;  %v272_v38 = vand.u32 3, %v4282_v2  ;;  %v275_v40 = vxor.u32 2147483648, %v3507_v4  ;;  %v483_v50 = vxor.u32 2147483648, %v3511_v32 }
 0x18e   :  { %v486_v42 = vxor.u32 2147483648, %v3509_v44  ;;  %v979_v46 = vshll.u32 %v4300_v0, %v977_v62  ;;  %v980_v45 = vshrl.u32 %v962_v61, %v978_v9  ;;  %v983_v11 = vadd.s32 127, %v982_v15  ;;  %v4357_v37 = vpop.eup %3518 }
 0x18f   :  { %v278_v16 = vxor.u32 2147483648, %v3513_v52  ;;  %3528 = vsinq.f32 %v890_v5  ;;  %vm374_vm13 = vweird.f32 %v3757_v29  ;;  %v384_v28 = vsel %vm377_vm9, %v380_v17, %v383_v10 }
 0x190   :  { %v584_v41 = vand.u32 3, %v583_v54  ;;  %v4361_v21 = vpop.eup %3520  ;;  %v981_v39 = vor.u32 %v980_v45, %v979_v46  ;;  %v984_v2 = vshll.u32 %v983_v11, 23  ;;  %vm482_vm15 = vcmp.eq.s32.totalorder %v480_v19, 0 }
 0x191   :  { %vm485_vm14 = vcmp.eq.s32.totalorder %v480_v19, 2  ;;  %vm274_vm2 = vcmp.eq.s32.totalorder %v272_v38, 0  ;;  %vm277_vm4 = vcmp.eq.s32.totalorder %v272_v38, 2  ;;  %v484_v0 = vsel %vm482_vm15, %v3509_v44, %v483_v50 }
 0x192   :  { %v487_v3 = vsel %vm485_vm14, %v486_v42, %v3511_v32  ;;  %vm4365_vm3 = vcmp.le.f32.partialorder %v906_v53, 0.7853982  ;;  %v985_v6 = vor.u32 4788187, %v984_v2  ;;  %vm273_vm7 = vcmp.lt.s32.totalorder %v272_v38, 2 }
 0x193   :  { %v276_v27 = vsel %vm274_vm2, %v3513_v52, %v275_v40  ;;  %v279_v43 = vsel %vm277_vm4, %v278_v16, %v3507_v4  ;;  %vm589_vm8 = vcmp.eq.s32.totalorder %v584_v41, 2  ;;  %vm481_vm9 = vcmp.lt.s32.totalorder %v480_v19, 2 }
 0x194   :  { %v3523_v55 = vpop.eup %3522  ;;  %v784_v13 = vsub.s32 4, %v3972_v20  ;;  %v986_v14 = vand.u32 2147483647, %v985_v6  ;;  %v988_v44 = vcvt.s32.f32 %v981_v39  ;;  %v488_v58 = vsel %vm481_vm9, %v484_v0, %v487_v3 }
 0x195   :  { %v3525_v30 = vpop.eup %3524  ;;  %v590_v5 = vxor.u32 2147483648, %v3523_v55  ;;  %vm585_vm10 = vcmp.lt.s32.totalorder %v584_v41, 2  ;;  %vm586_vm11 = vcmp.eq.s32.totalorder %v584_v41, 0  ;;  %vm478_vm12 = vweird.f32 %v3941_v60 }
 0x196   :  { %v3527_v34 = vpop.eup %3526  ;;  %v587_v48 = vxor.u32 2147483648, %v3525_v30  ;;  %v989_v7 = vmul.f32 %v988_v44, %v986_v14  ;;  %v280_v4 = vsel %vm273_vm7, %v276_v27, %v279_v43  ;;  %v992_v52 = vsub.s32 4, %v4276_v1 }
 0x197   :  { %v591_v53 = vsel %vm589_vm8, %v590_v5, %v3525_v30  ;;  %vm582_vm15 = vweird.f32 %v4022_v24  ;;  %v489_v17 = vsel %vm478_vm12, nan, %v488_v58  ;;  %v785_v10 = vsel %vm700_vm1, %v784_v13, %v3972_v20 }
 0x198   :  { %v588_v32 = vsel %vm586_vm11, %v3523_v55, %v587_v48  ;;  %v990_v54 = vxor.u32 2147483648, %v989_v7  ;;  %v385_v61 = vsel %vm374_vm13, nan, %v384_v28  ;;  %vm270_vm14 = vweird.f32 %v3753_v25 }
 0x199   :  { %v592_v62 = vsel %vm585_vm10, %v588_v32, %v591_v53  ;;  %v3529_v60 = vpop.eup %3528  ;;  %v891_v15 = vsel %vm4312_vm5, 0, %v4347_v18  ;;  %vm908_vm2 = vcmp.lt.s32.totalorder %v4098_v12, 0  ;;  %v281_v19 = vsel %vm270_vm14, nan, %v280_v4  ;;  %v1010_v4 = vld [vmem:[%s5846_s3] sm:$0xff] }
 0x19a   :  { %v593_v9 = vsel %vm582_vm15, nan, %v592_v62  ;;  %v991_v38 = vsel %vm908_vm2, %v990_v54, %v989_v7  ;;  %v3363_v40 = vpack.c.bf16 %v489_v17, %v281_v19  ;;  %v787_v20 = vsel %vm4286_vm6, 0, %v785_v10 }
 0x19b   :  { %v3361_v24 = vpack.c.bf16 %v593_v9, %v385_v61  ;;  %v993_v29 = vsel %vm908_vm2, %v992_v52, %v4276_v1  ;;  %v683_v25 = vsel %vm4244_vm0, 0, %v4342_v56  ;;  %v994_v22 = vsel %vm4365_vm3, %v4098_v12, %v991_v38  ;;  %v1021_v52 = vpop.permute.xlu0 %1020 }
 0x19c   :  { %v895_v18 = vadd.s32 3, %v891_v15  ;;  %3530 = vcosq.f32 %v994_v22  ;;  %v791_v50 = vadd.s32 3, %v787_v20  ;;  %v995_v35 = vsel %vm4365_vm3, 0, %v993_v29 }
 0x19d   :  { %3362 = vmatprep.subr.bf16.mxu1 %v3361_v24  ;;  %3532 = vsinq.f32 %v994_v22  ;;  %v687_v42 = vadd.s32 3, %v683_v25  ;;  %v999_v46 = vadd.s32 3, %v995_v35  ;;  %v899_v11 = vxor.u32 2147483648, %v3529_v60 }
 0x19e   :  { %3364 = vmatpush1.bf16.msra.mxu1 %v3363_v40  ;;  %v896_v1 = vand.u32 3, %v895_v18  ;;  %v792_v45 = vand.u32 3, %v791_v50  ;;  %v902_v31 = vxor.u32 2147483648, %v3527_v34  ;;  %v795_v56 = vxor.u32 2147483648, %v4361_v21 }
 0x19f   :  { %v798_v16 = vxor.u32 2147483648, %v4357_v37  ;;  %v688_v28 = vand.u32 3, %v687_v42  ;;  %v691_v41 = vxor.u32 2147483648, %v4353_v49  ;;  %v694_v39 = vxor.u32 2147483648, %v4349_v47 }
 0x1a0   :  { %v1000_v2 = vand.u32 3, %v999_v46  ;;  %vm898_vm0 = vcmp.eq.s32.totalorder %v896_v1, 0  ;;  %vm901_vm1 = vcmp.eq.s32.totalorder %v896_v1, 2  ;;  %vm794_vm6 = vcmp.eq.s32.totalorder %v792_v45, 0 }
 0x1a1   :  { %vm797_vm5 = vcmp.eq.s32.totalorder %v792_v45, 2  ;;  %v900_v0 = vsel %vm898_vm0, %v3527_v34, %v899_v11  ;;  %v903_v3 = vsel %vm901_vm1, %v902_v31, %v3529_v60  ;;  %v796_v8 = vsel %vm794_vm6, %v4357_v37, %v795_v56  ;;  %v1026_v60 = vpop.permute.xlu1 %1025 }
 0x1a2   :  { %v799_v6 = vsel %vm797_vm5, %v798_v16, %v4361_v21  ;;  %vm690_vm13 = vcmp.eq.s32.totalorder %v688_v28, 0  ;;  %vm693_vm4 = vcmp.eq.s32.totalorder %v688_v28, 2  ;;  %vm897_vm3 = vcmp.lt.s32.totalorder %v896_v1, 2 }
 0x1a3   :  { %v692_v30 = vsel %vm690_vm13, %v4349_v47, %v691_v41  ;;  %v695_v5 = vsel %vm693_vm4, %v694_v39, %v4353_v49  ;;  %vm793_vm7 = vcmp.lt.s32.totalorder %v792_v45, 2  ;;  %vm1005_vm8 = vcmp.eq.s32.totalorder %v1000_v2, 2 }
 0x1a4   :  { %v904_v14 = vsel %vm897_vm3, %v900_v0, %v903_v3  ;;  %v800_v34 = vsel %vm793_vm7, %v796_v8, %v799_v6  ;;  %vm1002_vm9 = vcmp.eq.s32.totalorder %v1000_v2, 0  ;;  %vm689_vm10 = vcmp.lt.s32.totalorder %v688_v28, 2 }
 0x1a5   :  { %vm1001_vm11 = vcmp.lt.s32.totalorder %v1000_v2, 2  ;;  %v696_v21 = vsel %vm689_vm10, %v692_v30, %v695_v5  ;;  %vm894_vm12 = vweird.f32 %v3969_v33  ;;  %vm790_vm15 = vweird.f32 %v3783_v57  ;;  %v1011_v33 = vld [vmem:[%s5846_s3 + $0x8] sm:$0xff] }
 0x1a6   :  { %v3531_v55 = vpop.eup %3530  ;;  %vm998_vm14 = vweird.f32 %v4098_v12  ;;  %v905_v49 = vsel %vm894_vm12, nan, %v904_v14  ;;  %v801_v48 = vsel %vm790_vm15, nan, %v800_v34  ;;  %vm686_vm2 = vweird.f32 %v3755_v26  ;;  %v1012_v26 = vld [vmem:[%s5846_s3 + $0x10] sm:$0xff]  ;;  %v1013_v12 = vld [vmem:[%s5846_s3 + $0x18] sm:$0xff] }
 0x1a7   :  { %v3533_v27 = vpop.eup %3532  ;;  %v1006_v43 = vxor.u32 2147483648, %v3531_v55  ;;  %v697_v7 = vsel %vm686_vm2, nan, %v696_v21  ;;  %vm1038_vm0 = vcmask 261120   ;;  %v5911_v57 = vmov 0.0  }
 0x1a8   :  { %v1003_v13 = vxor.u32 2147483648, %v3533_v27  ;;  %v3367_v32 = vpack.c.bf16 %v905_v49, %v697_v7 }
 0x1a9   :  { %v1007_v44 = vsel %vm1005_vm8, %v1006_v43, %v3533_v27 }
 0x1aa   :  { %v1004_v37 = vsel %vm1002_vm9, %v3531_v55, %v1003_v13 }
 0x1ab   :  { %v1008_v47 = vsel %vm1001_vm11, %v1004_v37, %v1007_v44  ;;  %v5912_v44 = vmov 2131351028  }
 0x1ac   :  { %v1009_v58 = vsel %vm998_vm14, nan, %v1008_v47 }
 0x1ad   :  { %v3365_v53 = vpack.c.bf16 %v1009_v58, %v801_v48 }
 0x1af   :  { %3366 = vmatprep.subr.bf16.mxu1 %v3365_v53 }
 0x1b0   :  { %3368 = vmatpush1.bf16.msra.mxu1 %v3367_v32 }
 0x1b3   :  { %3280 = vmatmul.mubr.msk.f32.vlgmr.msra.gmra.mrb[4].mxu1 %vm1038_vm0, %v1010_v4 }
 0x1b4   :  { %1121 = vmatprep.mubr.f32.mxu1 %v5911_v57 }
 0x1b7   :  { %3281 = vmatmul.mubr.msk.f32.gmra.mrb[6].mxu1 %vm1038_vm0, %v1011_v33 }
 0x1b8   :  { %1127 = vmatprep.mubr.f32.mxu1 %v5911_v57 }
 0x1bb   :  { %3282 = vmatmul.mubr.msk.f32.gmra.mrb[8].mxu1 %vm1038_vm0, %v1012_v26 }
 0x1bc   :  { %1133 = vmatprep.mubr.f32.mxu1 %v5911_v57 }
 0x1bf   :  { %3283 = vmatmul.mubr.msk.f32.gmra.mrb[10].mxu1 %vm1038_vm0, %v1013_v12 }
 0x1c0   :  { %3007 = vmatprep.mubr.f32.mxu1 %v5911_v57 }
 0x286   :  { %v1117_v62 = vpop.f32.mrb[4].mxu1 }
 0x287   :  { %v4427_v17 = vadd.f32 %v1117_v62, %v1021_v52  ;;  %v1119_v10 = vpop.f32.mrb[5].mxu1 }
 0x288   :  { %v4429_v54 = vadd.f32 %v1119_v10, %v1021_v52 }
 0x289   :  { %v1140_v61 = vand.u32 2147483647, %v4427_v17  ;;  %v1143_v9 = vand.u32 2139095040, %v4427_v17 }
 0x28a   :  { %v1244_v15 = vand.u32 2147483647, %v4429_v54  ;;  %v1247_v24 = vand.u32 2139095040, %v4429_v54  ;;  %v1123_v19 = vpop.f32.mrb[6].mxu1 }
 0x28b   :  { %v1144_v38 = vshrl.u32 %v1143_v9, 23  ;;  %v4435_v40 = vadd.f32 %v1123_v19, %v1026_v60  ;;  %v1125_v20 = vpop.f32.mrb[7].mxu1  ;;  %v1147_v29 = vand.u32 8388607, %v1140_v61 }
 0x28c   :  { %v1248_v25 = vshrl.u32 %v1247_v24, 23  ;;  %v1251_v22 = vand.u32 8388607, %v1244_v15  ;;  %v4448_v3 = vadd.f32 %v1125_v20, %v1026_v60 }
 0x28d   :  { %v3284_v18 = vadd.s32 4294967169, %v1144_v38  ;;  %v1351_v35 = vand.u32 2139095040, %v4435_v40  ;;  %v1148_v1 = vor.u32 8388608, %v1147_v29  ;;  %v5872_v43 = vand.u32 2147483647, %v4435_v40 }
 0x28e   :  { %v3288_v50 = vadd.s32 4294967169, %v1248_v25  ;;  %v4442_v42 = vpop.f32.mrb[8].mxu1  ;;  %v1252_v45 = vor.u32 8388608, %v1251_v22 }
 0x28f   :  { %v1150_v46 = vadd.s32 1, %v3284_v18  ;;  %v1352_v31 = vshrl.u32 %v1351_v35, 23  ;;  %v4444_v56 = vpop.f32.mrb[9].mxu1  ;;  %v4452_v8 = vshll.u32 %v1148_v1, 8 }
 0x290   :  { %v1254_v11 = vadd.s32 1, %v3288_v50  ;;  %v4456_v27 = vshll.u32 %v1252_v45, 8 }
 0x291   :  { %vm1151_vm1 = vcmp.gt.s32.totalorder %v1150_v46, 0  ;;  %v3292_v28 = vadd.s32 4294967169, %v1352_v31 }
 0x292   :  { %v1152_v16 = vsel %vm1151_vm1, %v1150_v46, 0  ;;  %vm1255_vm6 = vcmp.gt.s32.totalorder %v1254_v11, 0  ;;  %v4446_v41 = vpop.f32.mrb[10].mxu1 }
 0x293   :  { %v1153_v39 = vshrl.u32 %v1152_v16, 5  ;;  %v1154_v2 = vand.u32 31, %v1152_v16  ;;  %v1256_v0 = vsel %vm1255_vm6, %v1254_v11, 0  ;;  %v4450_v55 = vpop.f32.mrb[11].mxu1  ;;  %v4460_v14 = vadd.s32 1, %v3292_v28 }
 0x294   :  { %v4454_v6 = vshrl.u32 %v1256_v0, 5  ;;  %v1258_v13 = vand.u32 31, %v1256_v0 }
 0x295   :  { %v1155_v30 = vsub.s32 32, %v1154_v2  ;;  %v1157_v5 = vshll.u32 %v5875_v59, %v1154_v2  ;;  %v1160_v34 = vshll.u32 %v5873_v63, %v1154_v2  ;;  %v1163_v37 = vshll.u32 %v5912_v44, %v1154_v2 }
 0x296   :  { %v1166_v21 = vshll.u32 %v5886_v23, %v1154_v2  ;;  %v1169_v47 = vshll.u32 %v5887_v36, %v1154_v2  ;;  %vm1172_vm5 = vcmp.lt.s32.totalorder %v1153_v39, 1  ;;  %vm1173_vm13 = vcmp.lt.s32.totalorder %v1153_v39, 2 }
 0x297   :  { %v1158_v49 = vshrl.u32 %v5873_v63, %v1155_v30  ;;  %v1161_v48 = vshrl.u32 %v5912_v44, %v1155_v30  ;;  %v1164_v58 = vshrl.u32 %v5886_v23, %v1155_v30  ;;  %v1156_v53 = vshrl.u32 %v5875_v59, %v1155_v30 }
 0x298   :  { %v1167_v7 = vshrl.u32 %v5887_v36, %v1155_v30  ;;  %v1170_v32 = vshrl.u32 %v5891_v51, %v1155_v30  ;;  %v1259_v12 = vsub.s32 32, %v1258_v13  ;;  %vm1174_vm4 = vcmp.lt.s32.totalorder %v1153_v39, 3 }
 0x299   :  { %v1159_v4 = vor.u32 %v1158_v49, %v1157_v5  ;;  %v1162_v33 = vor.u32 %v1161_v48, %v1160_v34  ;;  %v1165_v26 = vor.u32 %v1164_v58, %v1163_v37  ;;  %vm1175_vm3 = vcmp.lt.s32.totalorder %v1153_v39, 4 }
 0x29a   :  { %v1168_v52 = vor.u32 %v1167_v7, %v1166_v21  ;;  %v1171_v62 = vor.u32 %v1170_v32, %v1169_v47  ;;  %v1261_v29 = vshll.u32 %v5875_v59, %v1258_v13  ;;  %v1262_v18 = vshrl.u32 %v5873_v63, %v1259_v12 }
 0x29b   :  { %v1176_v10 = vsel %vm1172_vm5, %v1156_v53, %v1159_v4  ;;  %v1177_v9 = vsel %vm1175_vm3, %v1165_v26, 2102212464  ;;  %v1180_v60 = vsel %vm1172_vm5, %v1159_v4, %v1162_v33  ;;  %v1184_v24 = vsel %vm1172_vm5, %v1162_v33, %v1165_v26 }
 0x29c   :  { %v1178_v19 = vsel %vm1174_vm4, %v1162_v33, %v1177_v9  ;;  %v1181_v38 = vsel %vm1175_vm3, %v1168_v52, 920167782  ;;  %v1185_v20 = vsel %vm1175_vm3, %v1171_v62, 1326507024  ;;  %v1264_v50 = vshll.u32 %v5873_v63, %v1258_v13 }
 0x29d   :  { %v1182_v25 = vsel %vm1174_vm4, %v1165_v26, %v1181_v38  ;;  %v1186_v22 = vsel %vm1174_vm4, %v1168_v52, %v1185_v20  ;;  %v1179_v35 = vsel %vm1173_vm13, %v1176_v10, %v1178_v19  ;;  %v1265_v45 = vshrl.u32 %v5912_v44, %v1259_v12 }
 0x29e   :  { %v1183_v46 = vsel %vm1173_vm13, %v1180_v60, %v1182_v25  ;;  %v1187_v1 = vsel %vm1173_vm13, %v1184_v24, %v1186_v22  ;;  %v1263_v2 = vor.u32 %v1262_v18, %v1261_v29  ;;  %v1267_v30 = vshll.u32 %v5912_v44, %v1258_v13 }
 0x29f   :  { %v4483_v11 = vmul.u32.u64.low %v4452_v8, %v1187_v1  ;;  %v4484_v31 = vmul.u32.u64.high %v4452_v8, %v1187_v1, %v4483_v11  ;;  %v4487_v16 = vmul.u32.u64.low %v4452_v8, %v1183_v46  ;;  %v4488_v28 = vmul.u32.u64.high %v4452_v8, %v1183_v46, %v4487_v16 }
 0x2a0   :  { %v1266_v0 = vor.u32 %v1265_v45, %v1264_v50  ;;  %v1268_v5 = vshrl.u32 %v5886_v23, %v1259_v12  ;;  %v1260_v39 = vshrl.u32 %v5875_v59, %v1259_v12  ;;  %v1270_v34 = vshll.u32 %v5886_v23, %v1258_v13 }
 0x2a1   :  { %v1271_v37 = vshrl.u32 %v5887_v36, %v1259_v12  ;;  %v1274_v21 = vshrl.u32 %v5891_v51, %v1259_v12  ;;  %v1195_v47 = vmul.u32 %v4452_v8, %v1179_v35  ;;  %v1273_v48 = vshll.u32 %v5887_v36, %v1258_v13 }
 0x2a2   :  { %v1269_v49 = vor.u32 %v1268_v5, %v1267_v30  ;;  %vm1276_vm7 = vcmp.lt.s32.totalorder %v4454_v6, 1  ;;  %vm1197_vm8 = vc.u32 %v4484_v31, %v4487_v16  ;;  %v1198_v58 = vadd.s32 1, %v4488_v28 }
 0x2a3   :  { %v1272_v53 = vor.u32 %v1271_v37, %v1270_v34  ;;  %vm1277_vm9 = vcmp.lt.s32.totalorder %v4454_v6, 2  ;;  %v1275_v7 = vor.u32 %v1274_v21, %v1273_v48  ;;  %vm1278_vm10 = vcmp.lt.s32.totalorder %v4454_v6, 3 }
 0x2a4   :  { %vm1279_vm11 = vcmp.lt.s32.totalorder %v4454_v6, 4  ;;  %v1284_v32 = vsel %vm1276_vm7, %v1263_v2, %v1266_v0  ;;  %v1199_v8 = vsel %vm1197_vm8, %v1198_v58, %v4488_v28  ;;  %v1288_v33 = vsel %vm1276_vm7, %v1266_v0, %v1269_v49 }
 0x2a5   :  { %v1281_v4 = vsel %vm1279_vm11, %v1269_v49, 2102212464  ;;  %v1285_v13 = vsel %vm1279_vm11, %v1272_v53, 920167782  ;;  %v1200_v26 = vadd.s32 %v1199_v8, %v1195_v47  ;;  %v1280_v12 = vsel %vm1276_vm7, %v1260_v39, %v1263_v2 }
 0x2a6   :  { %v1286_v52 = vsel %vm1278_vm10, %v1269_v49, %v1285_v13  ;;  %v1289_v62 = vsel %vm1279_vm11, %v1275_v7, 1326507024  ;;  %v1282_v10 = vsel %vm1278_vm10, %v1266_v0, %v1281_v4  ;;  %vm1359_vm12 = vcmp.gt.s32.totalorder %v4460_v14, 0 }
 0x2a7   :  { %v1287_v9 = vsel %vm1277_vm9, %v1284_v32, %v1286_v52  ;;  %v1290_v60 = vsel %vm1278_vm10, %v1272_v53, %v1289_v62  ;;  %v1201_v24 = vadd.s32 536870912, %v1200_v26  ;;  %v1355_v22 = vand.u32 8388607, %v5872_v43 }
 0x2a8   :  { %v1291_v19 = vsel %vm1277_vm9, %v1288_v33, %v1290_v60  ;;  %v4513_v38 = vmul.u32.u64.low %v4456_v27, %v1287_v9  ;;  %v4514_v20 = vmul.u32.u64.high %v4456_v27, %v1287_v9, %v4513_v38  ;;  %v1360_v18 = vsel %vm1359_vm12, %v4460_v14, 0 }
 0x2a9   :  { %v4518_v29 = vmul.u32.u64.low %v4456_v27, %v1291_v19  ;;  %v4519_v25 = vmul.u32.u64.high %v4456_v27, %v1291_v19, %v4518_v29  ;;  %v4524_v50 = vshrl.u32 %v1201_v24, 30  ;;  %v1283_v35 = vsel %vm1277_vm9, %v1280_v12, %v1282_v10 }
 0x2aa   :  { %v1362_v46 = vand.u32 31, %v1360_v18  ;;  %v1455_v1 = vand.u32 2139095040, %v4448_v3  ;;  %v1302_v11 = vadd.s32 1, %v4514_v20  ;;  %v1299_v2 = vmul.u32 %v4456_v27, %v1283_v35 }
 0x2ab   :  { %v1203_v45 = vshll.u32 %v4524_v50, 30  ;;  %vm1301_vm15 = vc.u32 %v4519_v25, %v4513_v38  ;;  %v1356_v0 = vor.u32 8388608, %v1355_v22  ;;  %v1361_v47 = vshrl.u32 %v1360_v18, 5 }
 0x2ac   :  { %v1363_v28 = vsub.s32 32, %v1362_v46  ;;  %v1303_v30 = vsel %vm1301_vm15, %v1302_v11, %v4514_v20  ;;  %v1456_v6 = vshrl.u32 %v1455_v1, 23  ;;  %v1365_v39 = vshll.u32 %v5875_v59, %v1362_v46 }
 0x2ad   :  { %v4534_v14 = vsub.s32 %v1200_v26, %v1203_v45  ;;  %v1304_v5 = vadd.s32 %v1303_v30, %v1299_v2  ;;  %v1368_v27 = vshll.u32 %v5873_v63, %v1362_v46  ;;  %v1371_v53 = vshll.u32 %v5912_v44, %v1362_v46 }
 0x2ae   :  { %v1366_v34 = vshrl.u32 %v5873_v63, %v1363_v28  ;;  %v1369_v37 = vshrl.u32 %v5912_v44, %v1363_v28  ;;  %v1372_v49 = vshrl.u32 %v5886_v23, %v1363_v28  ;;  %v1396_v7 = vshll.u32 %v1356_v0, 8 }
 0x2af   :  { %v1206_v21 = vsub.s32 0, %v4534_v14  ;;  %v1305_v48 = vadd.s32 536870912, %v1304_v5  ;;  %v1374_v4 = vshll.u32 %v5886_v23, %v1362_v46  ;;  %v1375_v13 = vshrl.u32 %v5887_v36, %v1363_v28 }
 0x2b0   :  { %v1367_v58 = vor.u32 %v1366_v34, %v1365_v39  ;;  %v1370_v8 = vor.u32 %v1369_v37, %v1368_v27  ;;  %v1373_v26 = vor.u32 %v1372_v49, %v1371_v53  ;;  %v1377_v12 = vshll.u32 %v5887_v36, %v1362_v46 }
 0x2b1   :  { %v3285_v32 = vmin.u32 %v1206_v21, %v4534_v14  ;;  %v4547_v33 = vshrl.u32 %v1305_v48, 30  ;;  %v1378_v52 = vshrl.u32 %v5891_v51, %v1363_v28  ;;  %v1376_v10 = vor.u32 %v1375_v13, %v1374_v4 }
 0x2b2   :  { %vm1380_vm14 = vcmp.lt.s32.totalorder %v1361_v47, 1  ;;  %v3296_v9 = vadd.s32 4294967169, %v1456_v6  ;;  %vm1381_vm2 = vcmp.lt.s32.totalorder %v1361_v47, 2  ;;  %vm1383_vm1 = vcmp.lt.s32.totalorder %v1361_v47, 4 }
 0x2b3   :  { %v1208_v62 = vclz %v3285_v32  ;;  %v1307_v60 = vshll.u32 %v4547_v33, 30  ;;  %v1379_v24 = vor.u32 %v1378_v52, %v1377_v12  ;;  %vm1382_vm6 = vcmp.lt.s32.totalorder %v1361_v47, 3 }
 0x2b4   :  { %v1388_v20 = vsel %vm1380_vm14, %v1367_v58, %v1370_v8  ;;  %v1389_v29 = vsel %vm1383_vm1, %v1376_v10, 920167782  ;;  %v1385_v18 = vsel %vm1383_vm1, %v1373_v26, 2102212464  ;;  %v1392_v46 = vsel %vm1380_vm14, %v1370_v8, %v1373_v26 }
 0x2b5   :  { %v3286_v19 = vadd.s32 4294967294, %v1208_v62  ;;  %v4553_v22 = vsub.s32 %v1304_v5, %v1307_v60  ;;  %v1390_v35 = vsel %vm1382_vm6, %v1373_v26, %v1389_v29  ;;  %v1364_v1 = vshrl.u32 %v5875_v59, %v1363_v28  ;;  %v1031_v29 = vpop.permute.xlu0 %1030 }
 0x2b6   :  { %v1391_v45 = vsel %vm1381_vm2, %v1388_v20, %v1390_v35  ;;  %v1393_v11 = vsel %vm1383_vm1, %v1379_v24, 1326507024  ;;  %v1462_v6 = vadd.s32 1, %v3296_v9  ;;  %v1386_v34 = vsel %vm1382_vm6, %v1370_v8, %v1385_v18 }
 0x2b7   :  { %vm3287_vm5 = vcmp.lt.s32.totalorder %v3286_v19, 0  ;;  %v1310_v0 = vsub.s32 0, %v4553_v22  ;;  %v1394_v30 = vsel %vm1382_vm6, %v1376_v10, %v1393_v11  ;;  %v1384_v5 = vsel %vm1380_vm14, %v1364_v1, %v1367_v58 }
 0x2b8   :  { %v1211_v2 = vsel %vm3287_vm5, 0, %v3286_v19  ;;  %v1395_v37 = vsel %vm1381_vm2, %v1392_v46, %v1394_v30  ;;  %vm1463_vm13 = vcmp.gt.s32.totalorder %v1462_v6, 0  ;;  %v5871_v32 = vand.u32 2147483647, %v4448_v3 }
 0x2b9   :  { %v1216_v39 = vsub.s32 4294967266, %v1211_v2  ;;  %v3289_v21 = vmin.u32 %v1310_v0, %v4553_v22  ;;  %v4565_v27 = vmul.u32.u64.low %v1396_v7, %v1395_v37  ;;  %v4566_v28 = vmul.u32.u64.high %v1396_v7, %v1395_v37, %v4565_v27 }
 0x2ba   :  { %v4568_v49 = vmul.u32.u64.low %v1396_v7, %v1391_v45  ;;  %v4569_v48 = vmul.u32.u64.high %v1396_v7, %v1391_v45, %v4568_v49  ;;  %v1464_v4 = vsel %vm1463_vm13, %v1462_v6, 0  ;;  %v1212_v13 = vsub.s32 32, %v1211_v2 }
 0x2bb   :  { %v1312_v53 = vclz %v3289_v21  ;;  %v1217_v58 = vadd.s32 127, %v1216_v39  ;;  %v1387_v8 = vsel %vm1381_vm2, %v1384_v5, %v1386_v34  ;;  %v1466_v26 = vand.u32 31, %v1464_v4 }
 0x2bc   :  { %vm1405_vm4 = vc.u32 %v4566_v28, %v4568_v49  ;;  %v1196_v52 = vadd.s32 %v4487_v16, %v4484_v31  ;;  %v1406_v62 = vadd.s32 1, %v4569_v48  ;;  %v1403_v10 = vmul.u32 %v1396_v7, %v1387_v8 }
 0x2bd   :  { %v3290_v12 = vadd.s32 4294967294, %v1312_v53  ;;  %v1459_v9 = vand.u32 8388607, %v5871_v32  ;;  %v1218_v24 = vshll.u32 %v1217_v58, 23  ;;  %v1467_v19 = vsub.s32 32, %v1466_v26 }
 0x2be   :  { %v1214_v60 = vshrl.u32 %v1196_v52, %v1212_v13  ;;  %v1407_v47 = vsel %vm1405_vm4, %v1406_v62, %v4569_v48  ;;  %v1213_v18 = vshll.u32 %v4534_v14, %v1211_v2  ;;  %v4584_v31 = vadd.f32 %v4442_v42, %v1031_v29 }
 0x2bf   :  { %vm3291_vm3 = vcmp.lt.s32.totalorder %v3290_v12, 0  ;;  %v1408_v20 = vadd.s32 %v1407_v47, %v1403_v10  ;;  %v1460_v1 = vor.u32 8388608, %v1459_v9  ;;  %v1219_v7 = vor.u32 4788187, %v1218_v24 }
 0x2c0   :  { %v1315_v35 = vsel %vm3291_vm3, 0, %v3290_v12  ;;  %v1215_v16 = vor.u32 %v1214_v60, %v1213_v18  ;;  %v1470_v45 = vshrl.u32 %v5873_v63, %v1467_v19  ;;  %v1473_v11 = vshrl.u32 %v5912_v44, %v1467_v19 }
 0x2c1   :  { %v1409_v46 = vadd.s32 536870912, %v1408_v20  ;;  %v1320_v0 = vsub.s32 4294967266, %v1315_v35  ;;  %v1476_v6 = vshrl.u32 %v5886_v23, %v1467_v19  ;;  %v1479_v39 = vshrl.u32 %v5887_v36, %v1467_v19 }
 0x2c2   :  { %v1469_v14 = vshll.u32 %v5875_v59, %v1466_v26  ;;  %v1472_v2 = vshll.u32 %v5873_v63, %v1466_v26  ;;  %v1478_v42 = vshll.u32 %v5886_v23, %v1466_v26  ;;  %v1482_v5 = vshrl.u32 %v5891_v51, %v1467_v19 }
 0x2c3   :  { %v4588_v30 = vshrl.u32 %v1409_v46, 30  ;;  %v1465_v37 = vshrl.u32 %v1464_v4, 5  ;;  %v1475_v21 = vshll.u32 %v5912_v44, %v1466_v26  ;;  %v4599_v27 = vadd.f32 %v4444_v56, %v1031_v29 }
 0x2c4   :  { %v1471_v48 = vor.u32 %v1470_v45, %v1469_v14  ;;  %v1474_v53 = vor.u32 %v1473_v11, %v1472_v2  ;;  %v1480_v13 = vor.u32 %v1479_v39, %v1478_v42  ;;  %v1481_v58 = vshll.u32 %v5887_v36, %v1466_v26 }
 0x2c5   :  { %v1411_v34 = vshll.u32 %v4588_v30, 30  ;;  %v1300_v8 = vadd.s32 %v4513_v38, %v4519_v25  ;;  %v1321_v12 = vadd.s32 127, %v1320_v0  ;;  %v1477_v62 = vor.u32 %v1476_v6, %v1475_v21 }
 0x2c6   :  { %v1220_v10 = vand.u32 2147483647, %v1219_v7  ;;  %v1222_v9 = vcvt.s32.f32 %v1215_v16  ;;  %v1483_v4 = vor.u32 %v1482_v5, %v1481_v58  ;;  %v1500_v60 = vshll.u32 %v1460_v1, 8 }
 0x2c7   :  { %v4604_v52 = vsub.s32 %v1408_v20, %v1411_v34  ;;  %v1316_v24 = vsub.s32 32, %v1315_v35  ;;  %vm1484_vm7 = vcmp.lt.s32.totalorder %v1465_v37, 1  ;;  %vm1487_vm8 = vcmp.lt.s32.totalorder %v1465_v37, 4 }
 0x2c8   :  { %v1468_v47 = vshrl.u32 %v5875_v59, %v1467_v19  ;;  %vm1486_vm9 = vcmp.lt.s32.totalorder %v1465_v37, 3  ;;  %v1492_v26 = vsel %vm1484_vm7, %v1471_v48, %v1474_v53  ;;  %v1493_v29 = vsel %vm1487_vm8, %v1480_v13, 920167782 }
 0x2c9   :  { %v1414_v56 = vsub.s32 0, %v4604_v52  ;;  %v1322_v38 = vshll.u32 %v1321_v12, 23  ;;  %vm1485_vm10 = vcmp.lt.s32.totalorder %v1465_v37, 2  ;;  %v1489_v25 = vsel %vm1487_vm8, %v1477_v62, 2102212464 }
 0x2ca   :  { %v1494_v20 = vsel %vm1486_vm9, %v1477_v62, %v1493_v29  ;;  %v1496_v1 = vsel %vm1484_vm7, %v1474_v53, %v1477_v62  ;;  %v1497_v16 = vsel %vm1487_vm8, %v1483_v4, 1326507024  ;;  %v1317_v7 = vshll.u32 %v4553_v22, %v1315_v35 }
 0x2cb   :  { %v3293_v18 = vmin.u32 %v1414_v56, %v4604_v52  ;;  %v1495_v46 = vsel %vm1485_vm10, %v1492_v26, %v1494_v20  ;;  %v1318_v45 = vshrl.u32 %v1300_v8, %v1316_v24  ;;  %v1488_v19 = vsel %vm1484_vm7, %v1468_v47, %v1471_v48 }
 0x2cc   :  { %v1498_v11 = vsel %vm1486_vm9, %v1480_v13, %v1497_v16  ;;  %v1490_v0 = vsel %vm1486_vm9, %v1474_v53, %v1489_v25  ;;  %v4615_v39 = vmul.u32.u64.low %v1500_v60, %v1495_v46  ;;  %v4616_v14 = vmul.u32.u64.high %v1500_v60, %v1495_v46, %v4615_v39 }
 0x2cd   :  { %v1499_v6 = vsel %vm1485_vm10, %v1496_v1, %v1498_v11  ;;  %v1223_v2 = vmul.f32 %v1222_v9, %v1220_v10  ;;  %v1323_v42 = vor.u32 4788187, %v1322_v38  ;;  %v1416_v21 = vclz %v3293_v18  ;;  %v4639_v18 = vpop.permute.xlu1 %1035 }
 0x2ce   :  { %v4619_v5 = vmul.u32.u64.low %v1500_v60, %v1499_v6  ;;  %v4620_v34 = vmul.u32.u64.high %v1500_v60, %v1499_v6, %v4619_v5  ;;  %v1559_v58 = vand.u32 2139095040, %v4584_v31  ;;  %v1319_v22 = vor.u32 %v1318_v45, %v1317_v7 }
 0x2cf   :  { %v1491_v35 = vsel %vm1485_vm10, %v1488_v19, %v1490_v0  ;;  %v1663_v48 = vand.u32 2139095040, %v4599_v27  ;;  %v1510_v53 = vadd.s32 1, %v4616_v14  ;;  %v1224_v8 = vxor.u32 2147483648, %v1223_v2 }
 0x2d0   :  { %v1560_v13 = vshrl.u32 %v1559_v58, 23  ;;  %v1226_v12 = vsub.s32 4, %v4524_v50  ;;  %v1324_v62 = vand.u32 2147483647, %v1323_v42  ;;  %v5869_v10 = vand.u32 2147483647, %v4584_v31 }
 0x2d1   :  { %v3294_v9 = vadd.s32 4294967294, %v1416_v21  ;;  %v1507_v4 = vmul.u32 %v1500_v60, %v1491_v35  ;;  %vm1509_vm11 = vc.u32 %v4620_v34, %v4615_v39  ;;  %v1326_v56 = vcvt.s32.f32 %v1319_v22 }
 0x2d2   :  { %v3300_v24 = vadd.s32 4294967169, %v1560_v13  ;;  %v1511_v37 = vsel %vm1509_vm11, %v1510_v53, %v4616_v14  ;;  %v1664_v47 = vshrl.u32 %v1663_v48, 23  ;;  %vm1142_vm12 = vcmp.lt.s32.totalorder %v4427_v17, 0 }
 0x2d3   :  { %v1512_v26 = vadd.s32 %v1511_v37, %v1507_v4  ;;  %v1225_v38 = vsel %vm1142_vm12, %v1224_v8, %v1223_v2  ;;  %v4633_v25 = vsel %vm1142_vm12, %v1226_v12, %v4524_v50  ;;  %v4635_v20 = vmul.f32 %v1326_v56, %v1324_v62 }
 0x2d4   :  { %v1566_v29 = vadd.s32 1, %v3300_v24  ;;  %v1563_v60 = vand.u32 8388607, %v5869_v10  ;;  %vm3295_vm15 = vcmp.lt.s32.totalorder %v3294_v9, 0  ;;  %v3304_v1 = vadd.s32 4294967169, %v1664_v47 }
 0x2d5   :  { %v1513_v46 = vadd.s32 536870912, %v1512_v26  ;;  %vm4643_vm2 = vcmp.le.f32.partialorder %v1140_v61, 0.7853982  ;;  %v4649_v50 = vadd.f32 %v4446_v41, %v4639_v18  ;;  %v4656_v19 = vadd.s32 %v4568_v49, %v4566_v28 }
 0x2d6   :  { %vm1567_vm14 = vcmp.gt.s32.totalorder %v1566_v29, 0  ;;  %v4663_v61 = vsel %vm4643_vm2, %v4427_v17, %v1225_v38  ;;  %v1328_v6 = vxor.u32 2147483648, %v4635_v20  ;;  %v4666_v41 = vsel %vm3295_vm15, 0, %v3294_v9 }
 0x2d7   :  { %v1568_v7 = vsel %vm1567_vm14, %v1566_v29, 0  ;;  %v4658_v11 = vshrl.u32 %v1513_v46, 30  ;;  %v1564_v42 = vor.u32 8388608, %v1563_v60  ;;  %v1670_v28 = vadd.s32 1, %v3304_v1 }
 0x2d8   :  { %v1570_v0 = vand.u32 31, %v1568_v7  ;;  %v1569_v49 = vshrl.u32 %v1568_v7, 5  ;;  %v5870_v37 = vand.u32 2147483647, %v4599_v27  ;;  %vm1246_vm1 = vcmp.lt.s32.totalorder %v4429_v54, 0 }
 0x2d9   :  { %v1515_v2 = vshll.u32 %v4658_v11, 30  ;;  %v1424_v47 = vsub.s32 4294967266, %v4666_v41  ;;  %v1604_v46 = vshll.u32 %v1564_v42, 8  ;;  %vm1671_vm5 = vcmp.gt.s32.totalorder %v1670_v28, 0 }
 0x2da   :  { %v1571_v5 = vsub.s32 32, %v1570_v0  ;;  %v1573_v21 = vshll.u32 %v5875_v59, %v1570_v0  ;;  %v1576_v58 = vshll.u32 %v5873_v63, %v1570_v0  ;;  %v1579_v22 = vshll.u32 %v5912_v44, %v1570_v0 }
 0x2db   :  { %v4673_v35 = vsub.s32 %v1512_v26, %v1515_v2  ;;  %v1582_v13 = vshll.u32 %v5886_v23, %v1570_v0  ;;  %v1585_v62 = vshll.u32 %v5887_v36, %v1570_v0  ;;  %vm1588_vm6 = vcmp.lt.s32.totalorder %v1569_v49, 1 }
 0x2dc   :  { %v1574_v48 = vshrl.u32 %v5873_v63, %v1571_v5  ;;  %v1577_v53 = vshrl.u32 %v5912_v44, %v1571_v5  ;;  %v1580_v8 = vshrl.u32 %v5886_v23, %v1571_v5  ;;  %v1583_v12 = vshrl.u32 %v5887_v36, %v1571_v5 }
 0x2dd   :  { %v1586_v9 = vshrl.u32 %v5891_v51, %v1571_v5  ;;  %v1518_v4 = vsub.s32 0, %v4673_v35  ;;  %v1572_v1 = vshrl.u32 %v5875_v59, %v1571_v5  ;;  %vm1589_vm13 = vcmp.lt.s32.totalorder %v1569_v49, 2 }
 0x2de   :  { %v1575_v24 = vor.u32 %v1574_v48, %v1573_v21  ;;  %v1578_v56 = vor.u32 %v1577_v53, %v1576_v58  ;;  %v1581_v26 = vor.u32 %v1580_v8, %v1579_v22  ;;  %v1584_v29 = vor.u32 %v1583_v12, %v1582_v13 }
 0x2df   :  { %v1587_v38 = vor.u32 %v1586_v9, %v1585_v62  ;;  %v3297_v60 = vmin.u32 %v1518_v4, %v4673_v35  ;;  %vm1591_vm4 = vcmp.lt.s32.totalorder %v1569_v49, 4  ;;  %vm1590_vm3 = vcmp.lt.s32.totalorder %v1569_v49, 3 }
 0x2e0   :  { %v1596_v7 = vsel %vm1588_vm6, %v1575_v24, %v1578_v56  ;;  %v1593_v2 = vsel %vm1591_vm4, %v1581_v26, 2102212464  ;;  %v1597_v21 = vsel %vm1591_vm4, %v1584_v29, 920167782  ;;  %v1592_v58 = vsel %vm1588_vm6, %v1572_v1, %v1575_v24 }
 0x2e1   :  { %v1520_v0 = vclz %v3297_v60  ;;  %v1598_v48 = vsel %vm1590_vm3, %v1581_v26, %v1597_v21  ;;  %v1600_v53 = vsel %vm1588_vm6, %v1578_v56, %v1581_v26  ;;  %v1601_v22 = vsel %vm1591_vm4, %v1587_v38, 1326507024 }
 0x2e2   :  { %v1594_v8 = vsel %vm1590_vm3, %v1578_v56, %v1593_v2  ;;  %v1599_v12 = vsel %vm1589_vm13, %v1596_v7, %v1598_v48  ;;  %v1602_v62 = vsel %vm1590_vm3, %v1584_v29, %v1601_v22  ;;  %v1425_v42 = vadd.s32 127, %v1424_v47 }
 0x2e3   :  { %v3298_v13 = vadd.s32 4294967294, %v1520_v0  ;;  %v1603_v9 = vsel %vm1589_vm13, %v1600_v53, %v1602_v62  ;;  %v4690_v5 = vmul.u32.u64.low %v1604_v46, %v1599_v12  ;;  %v4691_v4 = vmul.u32.u64.high %v1604_v46, %v1599_v12, %v4690_v5 }
 0x2e4   :  { %v4694_v60 = vmul.u32.u64.low %v1604_v46, %v1603_v9  ;;  %v4695_v10 = vmul.u32.u64.high %v1604_v46, %v1603_v9, %v4694_v60  ;;  %v1672_v24 = vsel %vm1671_vm5, %v1670_v28, 0  ;;  %v1595_v56 = vsel %vm1589_vm13, %v1592_v58, %v1594_v8 }
 0x2e5   :  { %vm3299_vm7 = vcmp.lt.s32.totalorder %v3298_v13, 0  ;;  %v1667_v29 = vand.u32 8388607, %v5870_v37  ;;  %v1674_v47 = vand.u32 31, %v1672_v24  ;;  %v4706_v38 = vsel %vm1246_vm1, %v1328_v6, %v4635_v20 }
 0x2e6   :  { %v4698_v26 = vsel %vm3299_vm7, 0, %v3298_v13  ;;  %v1420_v1 = vsub.s32 32, %v4666_v41  ;;  %v1767_v0 = vand.u32 2139095040, %v4649_v50  ;;  %v1614_v2 = vadd.s32 1, %v4691_v4 }
 0x2e7   :  { %v1528_v49 = vsub.s32 4294967266, %v4698_v26  ;;  %v1675_v21 = vsub.s32 32, %v1674_v47  ;;  %v1426_v58 = vshll.u32 %v1425_v42, 23  ;;  %v1508_v48 = vadd.s32 %v4615_v39, %v4620_v34 }
 0x2e8   :  { %v1611_v20 = vmul.u32 %v1604_v46, %v1595_v56  ;;  %vm1613_vm8 = vc.u32 %v4695_v10, %v4690_v5  ;;  %v1668_v53 = vor.u32 8388608, %v1667_v29  ;;  %v1524_v8 = vsub.s32 32, %v4698_v26 }
 0x2e9   :  { %v1615_v6 = vsel %vm1613_vm8, %v1614_v2, %v4691_v4  ;;  %v1678_v22 = vshrl.u32 %v5873_v63, %v1675_v21  ;;  %v1681_v13 = vshrl.u32 %v5912_v44, %v1675_v21  ;;  %v1673_v62 = vshrl.u32 %v1672_v24, 5 }
 0x2ea   :  { %v1616_v12 = vadd.s32 %v1615_v6, %v1611_v20  ;;  %v1768_v9 = vshrl.u32 %v1767_v0, 23  ;;  %v1529_v42 = vadd.s32 127, %v1528_v49  ;;  %v1677_v60 = vshll.u32 %v5875_v59, %v1674_v47 }
 0x2eb   :  { %v1680_v39 = vshll.u32 %v5873_v63, %v1674_v47  ;;  %v1684_v34 = vshrl.u32 %v5886_v23, %v1675_v21  ;;  %v1683_v4 = vshll.u32 %v5912_v44, %v1674_v47  ;;  %v1686_v56 = vshll.u32 %v5886_v23, %v1674_v47 }
 0x2ec   :  { %v1617_v46 = vadd.s32 536870912, %v1616_v12  ;;  %v1687_v29 = vshrl.u32 %v5887_v36, %v1675_v21  ;;  %vm4731_vm9 = vcmp.le.f32.partialorder %v1244_v15, 0.7853982  ;;  %v1679_v24 = vor.u32 %v1678_v22, %v1677_v60 }
 0x2ed   :  { %v1682_v0 = vor.u32 %v1681_v13, %v1680_v39  ;;  %v1689_v49 = vshll.u32 %v5887_v36, %v1674_v47  ;;  %v1690_v20 = vshrl.u32 %v5891_v51, %v1675_v21  ;;  %v1422_v6 = vshrl.u32 %v4656_v19, %v1420_v1 }
 0x2ee   :  { %v4738_v37 = vshrl.u32 %v1617_v46, 30  ;;  %v1685_v45 = vor.u32 %v1684_v34, %v1683_v4  ;;  %v1688_v32 = vor.u32 %v1687_v29, %v1686_v56  ;;  %v1427_v43 = vor.u32 4788187, %v1426_v58 }
 0x2ef   :  { %v1691_v63 = vor.u32 %v1690_v20, %v1689_v49  ;;  %v1708_v14 = vshll.u32 %v1668_v53, 8  ;;  %v3308_v7 = vadd.s32 4294967169, %v1768_v9  ;;  %v1530_v15 = vshll.u32 %v1529_v42, 23 }
 0x2f0   :  { %v1619_v28 = vshll.u32 %v4738_v37, 30  ;;  %vm1692_vm10 = vcmp.lt.s32.totalorder %v1673_v62, 1  ;;  %vm1695_vm11 = vcmp.lt.s32.totalorder %v1673_v62, 4  ;;  %vm1350_vm12 = vcmp.lt.s32.totalorder %v4435_v40, 0 }
 0x2f1   :  { %v1525_v47 = vshll.u32 %v4673_v35, %v4698_v26  ;;  %v1526_v22 = vshrl.u32 %v1508_v48, %v1524_v8  ;;  %v1700_v19 = vsel %vm1692_vm10, %v1679_v24, %v1682_v0  ;;  %v1701_v1 = vsel %vm1695_vm11, %v1688_v32, 920167782 }
 0x2f2   :  { %v4745_v13 = vsub.s32 %v1616_v12, %v1619_v28  ;;  %v1676_v58 = vshrl.u32 %v5875_v59, %v1675_v21  ;;  %vm1694_vm15 = vcmp.lt.s32.totalorder %v1673_v62, 3  ;;  %v1697_v53 = vsel %vm1695_vm11, %v1685_v45, 2102212464 }
 0x2f3   :  { %vm1693_vm14 = vcmp.lt.s32.totalorder %v1673_v62, 2  ;;  %v1702_v9 = vsel %vm1694_vm15, %v1685_v45, %v1701_v1  ;;  %v1704_v42 = vsel %vm1692_vm10, %v1682_v0, %v1685_v45  ;;  %v1705_v60 = vsel %vm1695_vm11, %v1691_v63, 1326507024 }
 0x2f4   :  { %v1531_v39 = vor.u32 4788187, %v1530_v15  ;;  %v1622_v34 = vsub.s32 0, %v4745_v13  ;;  %v1696_v35 = vsel %vm1692_vm10, %v1676_v58, %v1679_v24  ;;  %v1703_v26 = vsel %vm1693_vm14, %v1700_v19, %v1702_v9 }
 0x2f5   :  { %v1698_v48 = vsel %vm1694_vm15, %v1682_v0, %v1697_v53  ;;  %v1706_v8 = vsel %vm1694_vm15, %v1688_v32, %v1705_v60  ;;  %v4752_v28 = vmul.u32.u64.low %v1708_v14, %v1703_v26  ;;  %v4753_v12 = vmul.u32.u64.high %v1708_v14, %v1703_v26, %v4752_v28 }
 0x2f6   :  { %v1332_v21 = vsel %vm4731_vm9, %v4429_v54, %v4706_v38  ;;  %v3301_v63 = vmin.u32 %v1622_v34, %v4745_v13  ;;  %v1707_v45 = vsel %vm1693_vm14, %v1704_v42, %v1706_v8  ;;  %v1774_v46 = vadd.s32 1, %v3308_v7 }
 0x2f7   :  { %v5917_v4 = vshll.u32 %v4604_v52, %v4666_v41  ;;  %v1527_v29 = vor.u32 %v1526_v22, %v1525_v47  ;;  %v4765_v32 = vmul.u32.u64.low %v1708_v14, %v1707_v45  ;;  %v4766_v24 = vmul.u32.u64.high %v1708_v14, %v1707_v45, %v4765_v32 }
 0x2f8   :  { %v1428_v0 = vand.u32 2147483647, %v1427_v43  ;;  %v1624_v49 = vclz %v3301_v63  ;;  %v1699_v20 = vsel %vm1693_vm14, %v1696_v35, %v1698_v48  ;;  %vm1775_vm6 = vcmp.gt.s32.totalorder %v1774_v46, 0 }
 0x2f9   :  { %v1423_v56 = vor.u32 %v1422_v6, %v5917_v4  ;;  %v1532_v15 = vand.u32 2147483647, %v1531_v39  ;;  %v1718_v38 = vadd.s32 1, %v4753_v12  ;;  %v5918_v19 = vand.u32 2147483647, %v4649_v50 }
 0x2fa   :  { %v1776_v7 = vsel %vm1775_vm6, %v1774_v46, 0  ;;  %3534 = vcosq.f32 %v1332_v21  ;;  %v5919_v52 = vsub.s32 4, %v4588_v30  ;;  %v3302_v43 = vadd.s32 4294967294, %v1624_v49 }
 0x2fb   :  { %v1771_v1 = vand.u32 8388607, %v5918_v19  ;;  %v1778_v6 = vand.u32 31, %v1776_v7  ;;  %v1430_v62 = vcvt.s32.f32 %v1423_v56  ;;  %v1534_v47 = vcvt.s32.f32 %v1527_v29 }
 0x2fc   :  { %v4777_v41 = vsel %vm1350_vm12, %v5919_v52, %v4588_v30  ;;  %v1715_v22 = vmul.u32 %v1708_v14, %v1699_v20  ;;  %vm1717_vm5 = vc.u32 %v4766_v24, %v4752_v28  ;;  %3536 = vsinq.f32 %v1332_v21 }
 0x2fd   :  { %vm3303_vm13 = vcmp.lt.s32.totalorder %v3302_v43, 0  ;;  %v1719_v58 = vsel %vm1717_vm5, %v1718_v38, %v4753_v12  ;;  %v1779_v53 = vsub.s32 32, %v1778_v6  ;;  %v1431_v9 = vmul.f32 %v1430_v62, %v1428_v0 }
 0x2fe   :  { %v4782_v42 = vmul.f32 %v1534_v47, %v1532_v15  ;;  %v1720_v60 = vadd.s32 %v1719_v58, %v1715_v22  ;;  %v1772_v39 = vor.u32 8388608, %v1771_v1  ;;  %v4784_v30 = vsel %vm3303_vm13, 0, %v3302_v43 }
 0x2ff   :  { %v4786_v34 = vshrl.u32 %v1776_v7, 5  ;;  %v1787_v35 = vshll.u32 %v5912_v44, %v1778_v6  ;;  %v4791_v14 = vadd.f32 %v4450_v55, %v4639_v18  ;;  %v5920_v48 = vmov 2475754826  }
 0x300   :  { %v1721_v26 = vadd.s32 536870912, %v1720_v60  ;;  %v1782_v8 = vshrl.u32 %v5920_v48, %v1779_v53  ;;  %v1785_v12 = vshrl.u32 %v5912_v44, %v1779_v53  ;;  %v1788_v21 = vshrl.u32 %v5886_v23, %v1779_v53 }
 0x301   :  { %v1781_v63 = vshll.u32 %v5875_v59, %v1778_v6  ;;  %v1784_v45 = vshll.u32 %v5920_v48, %v1778_v6  ;;  %v1790_v46 = vshll.u32 %v5886_v23, %v1778_v6  ;;  %v1791_v4 = vshrl.u32 %v5887_v36, %v1779_v53 }
 0x302   :  { %v1432_v56 = vxor.u32 2147483648, %v1431_v9  ;;  %v1536_v29 = vxor.u32 2147483648, %v4782_v42  ;;  %v4801_v55 = vshrl.u32 %v1721_v26, 30  ;;  %v1789_v18 = vor.u32 %v1788_v21, %v1787_v35 }
 0x303   :  { %v1632_v32 = vsub.s32 4294967266, %v4784_v30  ;;  %v1783_v0 = vor.u32 %v1782_v8, %v1781_v63  ;;  %v1786_v49 = vor.u32 %v1785_v12, %v1784_v45  ;;  %v1792_v20 = vor.u32 %v1791_v4, %v1790_v46 }
 0x304   :  { %v5921_v15 = vand.u32 2147483647, %v4435_v40  ;;  %v1723_v19 = vshll.u32 %v4801_v55, 30  ;;  %v1793_v1 = vshll.u32 %v5887_v36, %v1778_v6  ;;  %v1794_v7 = vshrl.u32 %v5891_v51, %v1779_v53  ;;  %v4813_v43 = vpop.eup %3534 }
 0x305   :  { %v1812_v52 = vshll.u32 %v1772_v39, 8  ;;  %vm1454_vm3 = vcmp.lt.s32.totalorder %v4448_v3, 0  ;;  %v1628_v62 = vsub.s32 32, %v4784_v30  ;;  %v1780_v47 = vshrl.u32 %v5875_v59, %v1779_v53 }
 0x306   :  { %vm4806_vm4 = vcmp.le.f32.partialorder %v5921_v15, 0.7853982  ;;  %vm1799_vm7 = vcmp.lt.s32.totalorder %v4786_v34, 4  ;;  %v1871_v22 = vand.u32 2139095040, %v4791_v14  ;;  %v4820_v58 = vsub.s32 %v1720_v60, %v1723_v19  ;;  %v4825_v39 = vpop.eup %3536 }
 0x307   :  { %v1795_v35 = vor.u32 %v1794_v7, %v1793_v1  ;;  %vm1796_vm8 = vcmp.lt.s32.totalorder %v4786_v34, 1  ;;  %v1801_v6 = vsel %vm1799_vm7, %v1789_v18, 2102212464  ;;  %v1633_v26 = vadd.s32 127, %v1632_v32 }
 0x308   :  { %vm1798_vm10 = vcmp.lt.s32.totalorder %v4786_v34, 3  ;;  %v1804_v8 = vsel %vm1796_vm8, %v1783_v0, %v1786_v49  ;;  %v1805_v53 = vsel %vm1799_vm7, %v1792_v20, 920167782  ;;  %v5924_v12 = vand.u32 2147483647, %v4448_v3 }
 0x309   :  { %v1726_v21 = vsub.s32 0, %v4820_v58  ;;  %vm1797_vm15 = vcmp.lt.s32.totalorder %v4786_v34, 2  ;;  %v1806_v63 = vsel %vm1798_vm10, %v1789_v18, %v1805_v53  ;;  %v1808_v45 = vsel %vm1796_vm8, %v1786_v49, %v1789_v18 }
 0x30a   :  { %vm4832_vm11 = vcmp.le.f32.partialorder %v5924_v12, 0.7853982  ;;  %v1800_v46 = vsel %vm1796_vm8, %v1780_v47, %v1783_v0  ;;  %v1802_v4 = vsel %vm1798_vm10, %v1786_v49, %v1801_v6  ;;  %v1807_v32 = vsel %vm1797_vm15, %v1804_v8, %v1806_v63 }
 0x30b   :  { %v1809_v15 = vsel %vm1799_vm7, %v1795_v35, 1326507024  ;;  %v3305_v19 = vmin.u32 %v1726_v21, %v4820_v58  ;;  %v4843_v7 = vmul.u32.u64.low %v1812_v52, %v1807_v32  ;;  %v4844_v12 = vmul.u32.u64.high %v1812_v52, %v1807_v32, %v4843_v7 }
 0x30c   :  { %v1810_v1 = vsel %vm1798_vm10, %v1792_v20, %v1809_v15  ;;  %v5927_v59 = vsel %vm4643_vm2, 0, %v4633_v25  ;;  %v1433_v18 = vsel %vm1350_vm12, %v1432_v56, %v1431_v9  ;;  %v1872_v49 = vshrl.u32 %v1871_v22, 23 }
 0x30d   :  { %v4850_v53 = vadd.s32 3, %v5927_v59  ;;  %v1811_v0 = vsel %vm1797_vm15, %v1808_v45, %v1810_v1  ;;  %v1612_v47 = vadd.s32 %v4690_v5, %v4695_v10  ;;  %v1728_v20 = vclz %v3305_v19 }
 0x30e   :  { %v4858_v35 = vmul.u32.u64.low %v1812_v52, %v1811_v0  ;;  %v4859_v6 = vmul.u32.u64.high %v1812_v52, %v1811_v0, %v4858_v35  ;;  %3538 = vcosq.f32 %v4663_v61  ;;  %v1437_v59 = vsel %vm4806_vm4, 0, %v4777_v41 }
 0x30f   :  { %v1803_v25 = vsel %vm1797_vm15, %v1800_v46, %v1802_v4  ;;  %v3312_v16 = vadd.s32 4294967169, %v1872_v49  ;;  %v1537_v9 = vsel %vm1454_vm3, %v1536_v29, %v4782_v42  ;;  %v1630_v56 = vshrl.u32 %v1612_v47, %v1628_v62 }
 0x310   :  { %v1634_v10 = vshll.u32 %v1633_v26, 23  ;;  %v1822_v5 = vadd.s32 1, %v4844_v12  ;;  %v1436_v22 = vsel %vm4806_vm4, %v4435_v40, %v1433_v18  ;;  %v5877_v8 = vand.u32 2147483647, %v4791_v14 }
 0x311   :  { %v1878_v21 = vadd.s32 1, %v3312_v16  ;;  %v1330_v41 = vsub.s32 4, %v4547_v33  ;;  %v1629_v34 = vshll.u32 %v4745_v13, %v4784_v30  ;;  %v3306_v63 = vadd.s32 4294967294, %v1728_v20 }
 0x312   :  { %v1819_v45 = vmul.u32 %v1812_v52, %v1803_v25  ;;  %vm1821_vm2 = vc.u32 %v4859_v6, %v4843_v7  ;;  %3540 = vsinq.f32 %v4663_v61  ;;  %v1540_v42 = vsel %vm4832_vm11, %v4448_v3, %v1537_v9 }
 0x313   :  { %v1823_v29 = vsel %vm1821_vm2, %v1822_v5, %v4844_v12  ;;  %vm1879_vm12 = vcmp.gt.s32.totalorder %v1878_v21, 0  ;;  %3542 = vcosq.f32 %v1436_v22  ;;  %v4884_v38 = vor.u32 %v1630_v56, %v1629_v34 }
 0x314   :  { %v4886_v62 = vor.u32 4788187, %v1634_v10  ;;  %v1824_v26 = vadd.s32 %v1823_v29, %v1819_v45  ;;  %3544 = vsinq.f32 %v1436_v22  ;;  %v4888_v13 = vadd.s32 3, %v1437_v59 }
 0x315   :  { %v1875_v30 = vand.u32 8388607, %v5877_v8  ;;  %v1880_v61 = vsel %vm1879_vm12, %v1878_v21, 0  ;;  %3546 = vcosq.f32 %v1540_v42  ;;  %vm3307_vm14 = vcmp.lt.s32.totalorder %v3306_v63, 0 }
 0x316   :  { %v1825_v52 = vadd.s32 536870912, %v1824_v26  ;;  %v1331_v46 = vsel %vm1246_vm1, %v1330_v41, %v4547_v33  ;;  %3548 = vsinq.f32 %v1540_v42  ;;  %v4897_v4 = vadd.s32 %v4752_v28, %v4766_v24 }
 0x317   :  { %v1882_v32 = vand.u32 31, %v1880_v61  ;;  %v4907_v49 = vsel %vm3307_vm14, 0, %v3306_v63  ;;  %v1876_v33 = vor.u32 8388608, %v1875_v30  ;;  %v1333_v28 = vsel %vm4731_vm9, 0, %v1331_v46 }
 0x318   :  { %v4902_v12 = vshrl.u32 %v1825_v52, 30  ;;  %v4905_v0 = vpop.eup %3538  ;;  %v4912_v24 = vadd.s32 %v4843_v7, %v4859_v6  ;;  %v5928_v35 = vmov 683565275   ;;  %v1538_v25 = vsub.s32 4, %v4658_v11 }
 0x319   :  { %v1883_v47 = vsub.s32 32, %v1882_v32  ;;  %v1885_v59 = vshll.u32 %v5928_v35, %v1882_v32  ;;  %v1888_v9 = vshll.u32 %v5920_v48, %v1882_v32  ;;  %v1736_v2 = vsub.s32 4294967266, %v4907_v49 }
 0x31a   :  { %v1827_v20 = vshll.u32 %v4902_v12, 30  ;;  %v1881_v7 = vshrl.u32 %v1880_v61, 5  ;;  %v1891_v6 = vshll.u32 %v5912_v44, %v1882_v32  ;;  %v1732_v21 = vsub.s32 32, %v4907_v49 }
 0x31b   :  { %v1886_v16 = vshrl.u32 %v5920_v48, %v1883_v47  ;;  %v1889_v56 = vshrl.u32 %v5912_v44, %v1883_v47  ;;  %v1892_v10 = vshrl.u32 %v5886_v23, %v1883_v47  ;;  %v4928_v63 = vshll.u32 %v1876_v33, 8 }
 0x31c   :  { %v4922_v5 = vsub.s32 %v1824_v26, %v1827_v20  ;;  %v4925_v22 = vpop.eup %3540  ;;  %v1894_v30 = vshll.u32 %v5886_v23, %v1882_v32  ;;  %v1895_v26 = vshrl.u32 %v5887_v36, %v1883_v47  ;;  %v1897_v52 = vshll.u32 %v5887_v36, %v1882_v32 }
 0x31d   :  { %v1887_v41 = vor.u32 %v1886_v16, %v1885_v59  ;;  %v1890_v34 = vor.u32 %v1889_v56, %v1888_v9  ;;  %v4930_v45 = vpop.eup %3542  ;;  %v1893_v29 = vor.u32 %v1892_v10, %v1891_v6  ;;  %v1898_v46 = vshrl.u32 %v5891_v51, %v1883_v47 }
 0x31e   :  { %v1830_v42 = vsub.s32 0, %v4922_v5  ;;  %v4935_v61 = vpop.eup %3544  ;;  %v1337_v20 = vadd.s32 3, %v1333_v28  ;;  %v1539_v33 = vsel %vm1454_vm3, %v1538_v25, %v4658_v11  ;;  %v1737_v16 = vadd.s32 127, %v1736_v2 }
 0x31f   :  { %v4942_v59 = vpop.eup %3546  ;;  %v1896_v56 = vor.u32 %v1895_v26, %v1894_v30  ;;  %vm1900_vm1 = vcmp.lt.s32.totalorder %v1881_v7, 1  ;;  %v1884_v6 = vshrl.u32 %v5928_v35, %v1883_v47  ;;  %v1899_v8 = vor.u32 %v1898_v46, %v1897_v52 }
 0x320   :  { %v3309_v9 = vmin.u32 %v1830_v42, %v4922_v5  ;;  %v3549_v10 = vpop.eup %3548  ;;  %vm1903_vm9 = vcmp.lt.s32.totalorder %v1881_v7, 4  ;;  %v1908_v32 = vsel %vm1900_vm1, %v1887_v41, %v1890_v34  ;;  %vm1902_vm6 = vcmp.lt.s32.totalorder %v1881_v7, 3 }
 0x321   :  { %v1905_v28 = vsel %vm1903_vm9, %v1893_v29, 2102212464  ;;  %v1909_v19 = vsel %vm1903_vm9, %v1896_v56, 920167782  ;;  %vm1901_vm5 = vcmp.lt.s32.totalorder %v1881_v7, 2  ;;  %v1912_v11 = vsel %vm1900_vm1, %v1890_v34, %v1893_v29 }
 0x322   :  { %v1832_v1 = vclz %v3309_v9  ;;  %v1910_v18 = vsel %vm1902_vm6, %v1893_v29, %v1909_v19  ;;  %v1338_v25 = vand.u32 3, %v1337_v20  ;;  %v1904_v2 = vsel %vm1900_vm1, %v1884_v6, %v1887_v41 }
 0x323   :  { %v1911_v42 = vsel %vm1901_vm5, %v1908_v32, %v1910_v18  ;;  %v1913_v30 = vsel %vm1903_vm9, %v1899_v8, 1326507024  ;;  %v1906_v26 = vsel %vm1902_vm6, %v1890_v34, %v1905_v28  ;;  %v1733_v46 = vshll.u32 %v4820_v58, %v4907_v49 }
 0x324   :  { %v3310_v15 = vadd.s32 4294967294, %v1832_v1  ;;  %v1914_v51 = vsel %vm1902_vm6, %v1896_v56, %v1913_v30  ;;  %v4948_v47 = vmul.u32.u64.low %v4928_v63, %v1911_v42  ;;  %v4949_v52 = vmul.u32.u64.high %v4928_v63, %v1911_v42, %v4948_v47 }
 0x325   :  { %v1915_v19 = vsel %vm1901_vm5, %v1912_v11, %v1914_v51  ;;  %v1541_v1 = vsel %vm4832_vm11, 0, %v1539_v33  ;;  %v1734_v41 = vshrl.u32 %v4897_v4, %v1732_v21  ;;  %vm1336_vm4 = vweird.f32 %v4429_v54 }
 0x326   :  { %vm3311_vm13 = vcmp.lt.s32.totalorder %v3310_v15, 0  ;;  %v4959_v8 = vmul.u32.u64.low %v4928_v63, %v1915_v19  ;;  %v4960_v34 = vmul.u32.u64.high %v4928_v63, %v1915_v19, %v4959_v8  ;;  %vm1544_vm3 = vweird.f32 %v4448_v3 }
 0x327   :  { %v1835_v18 = vsel %vm3311_vm13, 0, %v3310_v15  ;;  %v1738_v29 = vshll.u32 %v1737_v16, 23  ;;  %v1907_v58 = vsel %vm1901_vm5, %v1904_v2, %v1906_v26  ;;  %v1549_v49 = vxor.u32 2147483648, %v3549_v10 }
 0x328   :  { %v1840_v20 = vsub.s32 4294967266, %v1835_v18  ;;  %v1926_v51 = vadd.s32 1, %v4949_v52  ;;  %vm1340_vm7 = vcmp.eq.s32.totalorder %v1338_v25, 0  ;;  %vm1343_vm8 = vcmp.eq.s32.totalorder %v1338_v25, 2 }
 0x329   :  { %v1545_v60 = vadd.s32 3, %v1541_v1  ;;  %v5929_v15 = vxor.u32 2147483648, %v4825_v39  ;;  %v5930_v33 = vxor.u32 2147483648, %v4813_v43  ;;  %v1552_v16 = vxor.u32 2147483648, %v4942_v59 }
 0x32a   :  { %v1841_v4 = vadd.s32 127, %v1840_v20  ;;  %v1735_v56 = vor.u32 %v1734_v41, %v1733_v46  ;;  %v1923_v7 = vmul.u32 %v4928_v63, %v1907_v58  ;;  %vm1925_vm10 = vc.u32 %v4960_v34, %v4948_v47 }
 0x32b   :  { %v1342_v21 = vsel %vm1340_vm7, %v4813_v43, %v5929_v15  ;;  %v1345_v9 = vsel %vm1343_vm8, %v5930_v33, %v4825_v39  ;;  %v1546_v6 = vand.u32 3, %v1545_v60  ;;  %v1739_v32 = vor.u32 4788187, %v1738_v29 }
 0x32c   :  { %v1836_v28 = vsub.s32 32, %v1835_v18  ;;  %v1927_v11 = vsel %vm1925_vm10, %v1926_v51, %v4949_v52  ;;  %vm1339_vm11 = vcmp.lt.s32.totalorder %v1338_v25, 2  ;;  %v1842_v43 = vshll.u32 %v1841_v4, 23 }
 0x32d   :  { %v1928_v2 = vadd.s32 %v1927_v11, %v1923_v7  ;;  %v1346_v42 = vsel %vm1339_vm11, %v1342_v21, %v1345_v9  ;;  %vm1548_vm15 = vcmp.eq.s32.totalorder %v1546_v6, 0  ;;  %vm1551_vm2 = vcmp.eq.s32.totalorder %v1546_v6, 2 }
 0x32e   :  { %vm1547_vm12 = vcmp.lt.s32.totalorder %v1546_v6, 2  ;;  %v1550_v39 = vsel %vm1548_vm15, %v4942_v59, %v1549_v49  ;;  %v1553_v30 = vsel %vm1551_vm2, %v1552_v16, %v3549_v10  ;;  %v1234_v46 = vand.u32 3, %v4850_v53 }
 0x32f   :  { %v1929_v26 = vadd.s32 536870912, %v1928_v2  ;;  %v1554_v63 = vsel %vm1547_vm12, %v1550_v39, %v1553_v30  ;;  %v1237_v19 = vxor.u32 2147483648, %v4925_v22  ;;  %v1838_v1 = vshrl.u32 %v4912_v24, %v1836_v28 }
 0x330   :  { %v1347_v25 = vsel %vm1336_vm4, nan, %v1346_v42  ;;  %v1555_v52 = vsel %vm1544_vm3, nan, %v1554_v63  ;;  %v1240_v41 = vxor.u32 2147483648, %v4905_v0  ;;  %v1837_v8 = vshll.u32 %v4922_v5, %v1835_v18 }
 0x331   :  { %v4987_v59 = vshrl.u32 %v1929_v26, 30  ;;  %v3369_v10 = vpack.c.bf16 %v1555_v52, %v1347_v25  ;;  %vm1236_vm14 = vcmp.eq.s32.totalorder %v1234_v46, 0  ;;  %v1843_v29 = vor.u32 4788187, %v1842_v43 }
 0x332   :  { %v1238_v53 = vsel %vm1236_vm14, %v4905_v0, %v1237_v19  ;;  %vm1239_vm1 = vcmp.eq.s32.totalorder %v1234_v46, 2  ;;  %v1442_v24 = vand.u32 3, %v4888_v13  ;;  %v1445_v20 = vxor.u32 2147483648, %v4935_v61 }
 0x333   :  { %v1931_v54 = vshll.u32 %v4987_v59, 30  ;;  %3370 = vmatprep.subr.bf16.mxu0 %v3369_v10  ;;  %v1241_v3 = vsel %vm1239_vm1, %v1240_v41, %v4925_v22  ;;  %v1448_v58 = vxor.u32 2147483648, %v4930_v45  ;;  %v1740_v5 = vand.u32 2147483647, %v1739_v32 }
 0x334   :  { %v1839_v18 = vor.u32 %v1838_v1, %v1837_v8  ;;  %vm1235_vm9 = vcmp.lt.s32.totalorder %v1234_v46, 2  ;;  %vm1444_vm6 = vcmp.eq.s32.totalorder %v1442_v24, 0  ;;  %vm1447_vm5 = vcmp.eq.s32.totalorder %v1442_v24, 2 }
 0x335   :  { %v1932_v49 = vsub.s32 %v1928_v2, %v1931_v54  ;;  %v1242_v51 = vsel %vm1235_vm9, %v1238_v53, %v1241_v3  ;;  %v1446_v0 = vsel %vm1444_vm6, %v4930_v45, %v1445_v20  ;;  %v1742_v60 = vcvt.s32.f32 %v1735_v56 }
 0x336   :  { %v1844_v13 = vand.u32 2147483647, %v1843_v29  ;;  %vm1443_vm13 = vcmp.lt.s32.totalorder %v1442_v24, 2  ;;  %v1449_v4 = vsel %vm1447_vm5, %v1448_v58, %v4935_v61  ;;  %vm1232_vm4 = vweird.f32 %v4427_v17 }
 0x337   :  { %v1934_v15 = vsub.s32 0, %v1932_v49  ;;  %vm1440_vm3 = vweird.f32 %v4435_v40  ;;  %v1450_v22 = vsel %vm1443_vm13, %v1446_v0, %v1449_v4  ;;  %v5931_v21 = vand.u32 2147483647, %v4886_v62 }
 0x338   :  { %v5932_v33 = vcvt.s32.f32 %v4884_v38  ;;  %v1846_v16 = vcvt.s32.f32 %v1839_v18  ;;  %v1243_v7 = vsel %vm1232_vm4, nan, %v1242_v51  ;;  %v1451_v45 = vsel %vm1440_vm3, nan, %v1450_v22 }
 0x339   :  { %v1743_v6 = vmul.f32 %v1742_v60, %v1740_v5  ;;  %v3313_v56 = vmin.u32 %v1934_v15, %v1932_v49  ;;  %v3371_v32 = vpack.c.bf16 %v1451_v45, %v1243_v7  ;;  %vm1558_vm7 = vcmp.lt.s32.totalorder %v4584_v31, 0 }
 0x33a   :  { %v1639_v9 = vmul.f32 %v5932_v33, %v5931_v21  ;;  %v1847_v28 = vmul.f32 %v1846_v16, %v1844_v13  ;;  %vm1662_vm10 = vcmp.lt.s32.totalorder %v4599_v27, 0  ;;  %vm1766_vm11 = vcmp.lt.s32.totalorder %v4649_v50, 0 }
 0x33b   :  { %v1936_v11 = vclz %v3313_v56  ;;  %3372 = vmatpush1.bf16.msra.mxu0 %v3371_v32  ;;  %v1744_v2 = vxor.u32 2147483648, %v1743_v6  ;;  %v1924_v43 = vadd.s32 %v4948_v47, %v4960_v34  ;;  %v5933_v26 = vand.u32 2147483647, %v4584_v31 }
 0x33c   :  { %v1640_v61 = vxor.u32 2147483648, %v1639_v9  ;;  %v1848_v42 = vxor.u32 2147483648, %v1847_v28  ;;  %v5936_v46 = vand.u32 2147483647, %v4599_v27  ;;  %v5939_v8 = vand.u32 2147483647, %v4649_v50 }
 0x33d   :  { %v3314_v17 = vadd.s32 4294967294, %v1936_v11  ;;  %v1745_v62 = vsel %vm1662_vm10, %v1744_v2, %v1743_v6  ;;  %vm5014_vm15 = vcmp.le.f32.partialorder %v5933_v26, 0.7853982  ;;  %v1850_v54 = vsub.s32 4, %v4902_v12 }
 0x33e   :  { %v1641_v40 = vsel %vm1558_vm7, %v1640_v61, %v1639_v9  ;;  %vm5020_vm2 = vcmp.le.f32.partialorder %v5936_v46, 0.7853982  ;;  %v1849_v1 = vsel %vm1766_vm11, %v1848_v42, %v1847_v28  ;;  %vm5034_vm12 = vcmp.le.f32.partialorder %v5939_v8, 0.7853982 }
 0x33f   :  { %vm3315_vm8 = vcmp.lt.s32.totalorder %v3314_v17, 0  ;;  %v1644_v47 = vsel %vm5014_vm15, %v4584_v31, %v1641_v40  ;;  %v1748_v41 = vsel %vm5020_vm2, %v4599_v27, %v1745_v62  ;;  %v1852_v29 = vsel %vm5034_vm12, %v4649_v50, %v1849_v1 }
 0x340   :  { %v1939_v38 = vsel %vm3315_vm8, 0, %v3314_v17  ;;  %3550 = vcosq.f32 %v1644_v47  ;;  %v1746_v20 = vsub.s32 4, %v4801_v55  ;;  %v1642_v58 = vsub.s32 4, %v4738_v37 }
 0x341   :  { %v1940_v39 = vsub.s32 32, %v1939_v38  ;;  %v1944_v30 = vsub.s32 4294967266, %v1939_v38  ;;  %v1941_v34 = vshll.u32 %v1932_v49, %v1939_v38  ;;  %3552 = vcosq.f32 %v1748_v41 }
 0x342   :  { %3554 = vcosq.f32 %v1852_v29  ;;  %v1851_v49 = vsel %vm1766_vm11, %v1850_v54, %v4902_v12  ;;  %v1954_v0 = vsub.s32 4, %v4987_v59  ;;  %v1747_v60 = vsel %vm1662_vm10, %v1746_v20, %v4801_v55 }
 0x343   :  { %v1942_v25 = vshrl.u32 %v1924_v43, %v1940_v39  ;;  %v1945_v52 = vadd.s32 127, %v1944_v30  ;;  %3556 = vsinq.f32 %v1852_v29  ;;  %v1643_v13 = vsel %vm1558_vm7, %v1642_v58, %v4738_v37 }
 0x344   :  { %3558 = vsinq.f32 %v1748_v41  ;;  %v1853_v15 = vsel %vm5034_vm12, 0, %v1851_v49  ;;  %vm1870_vm14 = vcmp.lt.s32.totalorder %v4791_v14, 0  ;;  %v5942_v22 = vand.u32 2147483647, %v4791_v14 }
 0x345   :  { %v1943_v53 = vor.u32 %v1942_v25, %v1941_v34  ;;  %v1946_v24 = vshll.u32 %v1945_v52, 23  ;;  %3560 = vsinq.f32 %v1644_v47  ;;  %v1749_v55 = vsel %vm5020_vm2, 0, %v1747_v60  ;;  %v1972_v60 = vld [vmem:[%s5848_s5] sm:$0xff] }
 0x346   :  { %vm5059_vm1 = vcmp.le.f32.partialorder %v5942_v22, 0.7853982  ;;  %v1955_v33 = vsel %vm1870_vm14, %v1954_v0, %v4987_v59  ;;  %v1645_v37 = vsel %vm5014_vm15, 0, %v1643_v13  ;;  %v1857_v45 = vadd.s32 3, %v1853_v15 }
 0x347   :  { %v1947_v3 = vor.u32 4788187, %v1946_v24  ;;  %v1950_v18 = vcvt.s32.f32 %v1943_v53  ;;  %v1753_v56 = vadd.s32 3, %v1749_v55  ;;  %v1957_v32 = vsel %vm5059_vm1, 0, %v1955_v33  ;;  %v1988_v55 = vpop.permute.xlu1 %1987 }
 0x348   :  { %v1649_v11 = vadd.s32 3, %v1645_v37  ;;  %v1961_v2 = vadd.s32 3, %v1957_v32  ;;  %v1858_v17 = vand.u32 3, %v1857_v45  ;;  %vm1856_vm12 = vweird.f32 %v4649_v50  ;;  %v1975_v50 = vld [vmem:[%s5848_s5 + $0x18] sm:$0xff] }
 0x349   :  { %v1948_v5 = vand.u32 2147483647, %v1947_v3  ;;  %v1754_v42 = vand.u32 3, %v1753_v56 }
 0x34a   :  { %v3551_v9 = vpop.eup %3550  ;;  %v1650_v39 = vand.u32 3, %v1649_v11  ;;  %v1962_v63 = vand.u32 3, %v1961_v2  ;;  %vm1860_vm9 = vcmp.eq.s32.totalorder %v1858_v17, 0  ;;  %vm1863_vm6 = vcmp.eq.s32.totalorder %v1858_v17, 2 }
 0x34b   :  { %v1951_v51 = vmul.f32 %v1950_v18, %v1948_v5  ;;  %v3553_v7 = vpop.eup %3552  ;;  %v1656_v26 = vxor.u32 2147483648, %v3551_v9  ;;  %vm1756_vm5 = vcmp.eq.s32.totalorder %v1754_v42, 0  ;;  %vm1759_vm13 = vcmp.eq.s32.totalorder %v1754_v42, 2 }
 0x34c   :  { %v3555_v6 = vpop.eup %3554  ;;  %v1760_v43 = vxor.u32 2147483648, %v3553_v7  ;;  %vm1652_vm4 = vcmp.eq.s32.totalorder %v1650_v39, 0  ;;  %vm1655_vm3 = vcmp.eq.s32.totalorder %v1650_v39, 2  ;;  %vm1859_vm7 = vcmp.lt.s32.totalorder %v1858_v17, 2 }
 0x34d   :  { %v1952_v4 = vxor.u32 2147483648, %v1951_v51  ;;  %v3557_v28 = vpop.eup %3556  ;;  %v1864_v38 = vxor.u32 2147483648, %v3555_v6  ;;  %vm1755_vm8 = vcmp.lt.s32.totalorder %v1754_v42, 2  ;;  %vm1967_vm10 = vcmp.eq.s32.totalorder %v1962_v63, 2 }
 0x34e   :  { %v3559_v59 = vpop.eup %3558  ;;  %v1861_v40 = vxor.u32 2147483648, %v3557_v28  ;;  %vm1964_vm11 = vcmp.eq.s32.totalorder %v1962_v63, 0  ;;  %vm1651_vm15 = vcmp.lt.s32.totalorder %v1650_v39, 2  ;;  %vm1963_vm2 = vcmp.lt.s32.totalorder %v1962_v63, 2 }
 0x34f   :  { %v1953_v21 = vsel %vm1870_vm14, %v1952_v4, %v1951_v51  ;;  %v3561_v61 = vpop.eup %3560  ;;  %v1757_v62 = vxor.u32 2147483648, %v3559_v59  ;;  %v1865_v19 = vsel %vm1863_vm6, %v1864_v38, %v3557_v28  ;;  %v1761_v34 = vsel %vm1759_vm13, %v1760_v43, %v3559_v59 }
 0x350   :  { %v1956_v16 = vsel %vm5059_vm1, %v4791_v14, %v1953_v21  ;;  %v1653_v30 = vxor.u32 2147483648, %v3561_v61  ;;  %v1862_v46 = vsel %vm1860_vm9, %v3555_v6, %v1861_v40  ;;  %v1657_v8 = vsel %vm1655_vm3, %v1656_v26, %v3561_v61 }
 0x351   :  { %3562 = vcosq.f32 %v1956_v16  ;;  %v1758_v47 = vsel %vm1756_vm5, %v3553_v7, %v1757_v62  ;;  %v1866_v29 = vsel %vm1859_vm7, %v1862_v46, %v1865_v19  ;;  %vm1752_vm14 = vweird.f32 %v4599_v27  ;;  %v1973_v27 = vld [vmem:[%s5848_s5 + $0x8] sm:$0xff] }
 0x352   :  { %3564 = vsinq.f32 %v1956_v16  ;;  %v1654_v41 = vsel %vm1652_vm4, %v3551_v9, %v1653_v30  ;;  %v1762_v53 = vsel %vm1755_vm8, %v1758_v47, %v1761_v34  ;;  %vm1960_vm1 = vweird.f32 %v4791_v14  ;;  %v1983_v14 = vpop.permute.xlu0 %1982 }
 0x353   :  { %v1658_v3 = vsel %vm1651_vm15, %v1654_v41, %v1657_v8  ;;  %v1867_v58 = vsel %vm1856_vm12, nan, %v1866_v29  ;;  %v1763_v5 = vsel %vm1752_vm14, nan, %v1762_v53  ;;  %vm1648_vm9 = vweird.f32 %v4584_v31  ;;  %v1974_v31 = vld [vmem:[%s5848_s5 + $0x10] sm:$0xff] }
 0x354   :  { %v1659_v51 = vsel %vm1648_vm9, nan, %v1658_v3 }
 0x355   :  { %v3375_v0 = vpack.c.bf16 %v1867_v58, %v1659_v51 }
 0x35b   :  { %v3563_v1 = vpop.eup %3562 }
 0x35c   :  { %v3565_v25 = vpop.eup %3564  ;;  %v1968_v52 = vxor.u32 2147483648, %v3563_v1 }
 0x35d   :  { %v1965_v10 = vxor.u32 2147483648, %v3565_v25 }
 0x35e   :  { %v1969_v24 = vsel %vm1967_vm10, %v1968_v52, %v3565_v25 }
 0x35f   :  { %v1966_v54 = vsel %vm1964_vm11, %v3563_v1, %v1965_v10 }
 0x360   :  { %v1970_v20 = vsel %vm1963_vm2, %v1966_v54, %v1969_v24 }
 0x361   :  { %v1971_v18 = vsel %vm1960_vm1, nan, %v1970_v20 }
 0x362   :  { %v3373_v49 = vpack.c.bf16 %v1971_v18, %v1763_v5 }
 0x364   :  { %3374 = vmatprep.subr.bf16.mxu0 %v3373_v49  ;;  %v5945_v49 = vmov 1326507024  }
 0x365   :  { %3376 = vmatpush1.bf16.msra.mxu0 %v3375_v0 }
 0x368   :  { %3316 = vmatmul.mubr.msk.f32.vlgmr.msra.gmra.mrb[4].mxu0 %vm1038_vm0, %v1972_v60 }
 0x369   :  { %2082 = vmatprep.mubr.f32.mxu0 %v5911_v57 }
 0x36c   :  { %3317 = vmatmul.mubr.msk.f32.gmra.mrb[6].mxu0 %vm1038_vm0, %v1973_v27 }
 0x36d   :  { %2088 = vmatprep.mubr.f32.mxu0 %v5911_v57 }
 0x370   :  { %3318 = vmatmul.mubr.msk.f32.gmra.mrb[8].mxu0 %vm1038_vm0, %v1974_v31 }
 0x371   :  { %2094 = vmatprep.mubr.f32.mxu0 %v5911_v57 }
 0x374   :  { %3319 = vmatmul.mubr.msk.f32.gmra.mrb[10].mxu0 %vm1038_vm0, %v1975_v50 }
 0x43b   :  { %v2078_v13 = vpop.f32.mrb[4].mxu0 }
 0x43c   :  { %v5096_v4 = vadd.f32 %v2078_v13, %v1983_v14  ;;  %v2080_v15 = vpop.f32.mrb[5].mxu0 }
 0x43d   :  { %v5098_v22 = vadd.f32 %v2080_v15, %v1983_v14 }
 0x43e   :  { %v2101_v12 = vand.u32 2147483647, %v5096_v4  ;;  %v2104_v21 = vand.u32 2139095040, %v5096_v4 }
 0x43f   :  { %v2205_v57 = vand.u32 2147483647, %v5098_v22  ;;  %v2208_v33 = vand.u32 2139095040, %v5098_v22  ;;  %v2084_v9 = vpop.f32.mrb[6].mxu0 }
 0x440   :  { %v2105_v37 = vshrl.u32 %v2104_v21, 23  ;;  %v5104_v16 = vadd.f32 %v2084_v9, %v1988_v55  ;;  %v2086_v7 = vpop.f32.mrb[7].mxu0  ;;  %v2108_v45 = vand.u32 8388607, %v2101_v12 }
 0x441   :  { %v2209_v6 = vshrl.u32 %v2208_v33, 23  ;;  %v2212_v56 = vand.u32 8388607, %v2205_v57  ;;  %v5117_v46 = vadd.f32 %v2086_v7, %v1988_v55 }
 0x442   :  { %v3320_v32 = vadd.s32 4294967169, %v2105_v37  ;;  %v2312_v11 = vand.u32 2139095040, %v5104_v16  ;;  %v2109_v2 = vor.u32 8388608, %v2108_v45  ;;  %v5882_v25 = vand.u32 2147483647, %v5104_v16 }
 0x443   :  { %v3324_v28 = vadd.s32 4294967169, %v2209_v6  ;;  %v5111_v59 = vpop.f32.mrb[8].mxu0  ;;  %v2213_v17 = vor.u32 8388608, %v2212_v56 }
 0x444   :  { %v2111_v61 = vadd.s32 1, %v3320_v32  ;;  %v2313_v40 = vshrl.u32 %v2312_v11, 23  ;;  %v5113_v38 = vpop.f32.mrb[9].mxu0  ;;  %v5121_v1 = vshll.u32 %v2109_v2, 8 }
 0x445   :  { %v2215_v42 = vadd.s32 1, %v3324_v28  ;;  %v5125_v34 = vshll.u32 %v2213_v17, 8 }
 0x446   :  { %vm2112_vm6 = vcmp.gt.s32.totalorder %v2111_v61, 0  ;;  %v3328_v43 = vadd.s32 4294967169, %v2313_v40 }
 0x447   :  { %v2113_v62 = vsel %vm2112_vm6, %v2111_v61, 0  ;;  %vm2216_vm5 = vcmp.gt.s32.totalorder %v2215_v42, 0  ;;  %v5115_v39 = vpop.f32.mrb[10].mxu0 }
 0x448   :  { %v2114_v30 = vshrl.u32 %v2113_v62, 5  ;;  %v2115_v26 = vand.u32 31, %v2113_v62  ;;  %v2217_v63 = vsel %vm2216_vm5, %v2215_v42, 0  ;;  %v5119_v19 = vpop.f32.mrb[11].mxu0  ;;  %v5129_v10 = vadd.s32 1, %v3328_v43 }
 0x449   :  { %v5123_v47 = vshrl.u32 %v2217_v63, 5  ;;  %v2219_v8 = vand.u32 31, %v2217_v63 }
 0x44a   :  { %v2116_v52 = vsub.s32 32, %v2115_v26  ;;  %v2118_v41 = vshll.u32 %v5928_v35, %v2115_v26  ;;  %v2121_v29 = vshll.u32 %v5920_v48, %v2115_v26  ;;  %v2124_v53 = vshll.u32 %v5912_v44, %v2115_v26 }
 0x44b   :  { %v2127_v24 = vshll.u32 %v5886_v23, %v2115_v26  ;;  %v2130_v54 = vshll.u32 %v5887_v36, %v2115_v26  ;;  %vm2133_vm13 = vcmp.lt.s32.totalorder %v2114_v30, 1  ;;  %vm2134_vm4 = vcmp.lt.s32.totalorder %v2114_v30, 2 }
 0x44c   :  { %v2119_v3 = vshrl.u32 %v5920_v48, %v2116_v52  ;;  %v2122_v20 = vshrl.u32 %v5912_v44, %v2116_v52  ;;  %v2125_v58 = vshrl.u32 %v5886_v23, %v2116_v52  ;;  %v2117_v5 = vshrl.u32 %v5928_v35, %v2116_v52 }
 0x44d   :  { %v2128_v18 = vshrl.u32 %v5887_v36, %v2116_v52  ;;  %v2131_v51 = vshrl.u32 %v5945_v49, %v2116_v52  ;;  %v2220_v31 = vsub.s32 32, %v2219_v8  ;;  %vm2135_vm3 = vcmp.lt.s32.totalorder %v2114_v30, 3 }
 0x44e   :  { %v2120_v0 = vor.u32 %v2119_v3, %v2118_v41  ;;  %v2123_v60 = vor.u32 %v2122_v20, %v2121_v29  ;;  %v2126_v27 = vor.u32 %v2125_v58, %v2124_v53  ;;  %vm2136_vm7 = vcmp.lt.s32.totalorder %v2114_v30, 4 }
 0x44f   :  { %v2129_v50 = vor.u32 %v2128_v18, %v2127_v24  ;;  %v2132_v14 = vor.u32 %v2131_v51, %v2130_v54  ;;  %v2222_v7 = vshll.u32 %v5928_v35, %v2219_v8  ;;  %v2223_v56 = vshrl.u32 %v5920_v48, %v2220_v31 }
 0x450   :  { %v2137_v13 = vsel %vm2133_vm13, %v2117_v5, %v2120_v0  ;;  %v2138_v15 = vsel %vm2136_vm7, %v2126_v27, 2102212464  ;;  %v2141_v21 = vsel %vm2133_vm13, %v2120_v0, %v2123_v60  ;;  %v2145_v55 = vsel %vm2133_vm13, %v2123_v60, %v2126_v27 }
 0x451   :  { %v2139_v33 = vsel %vm2135_vm3, %v2123_v60, %v2138_v15  ;;  %v2142_v9 = vsel %vm2136_vm7, %v2129_v50, 920167782  ;;  %v2146_v37 = vsel %vm2136_vm7, %v2132_v14, 1326507024  ;;  %v2225_v32 = vshll.u32 %v5920_v48, %v2219_v8 }
 0x452   :  { %v2143_v45 = vsel %vm2135_vm3, %v2126_v27, %v2142_v9  ;;  %v2147_v6 = vsel %vm2135_vm3, %v2129_v50, %v2146_v37  ;;  %v2140_v28 = vsel %vm2134_vm4, %v2137_v13, %v2139_v33  ;;  %v2226_v2 = vshrl.u32 %v5912_v44, %v2220_v31 }
 0x453   :  { %v2144_v11 = vsel %vm2134_vm4, %v2141_v21, %v2143_v45  ;;  %v2148_v61 = vsel %vm2134_vm4, %v2145_v55, %v2147_v6  ;;  %v2224_v43 = vor.u32 %v2223_v56, %v2222_v7  ;;  %v2228_v63 = vshll.u32 %v5912_v44, %v2219_v8 }
 0x454   :  { %v5152_v17 = vmul.u32.u64.low %v5121_v1, %v2148_v61  ;;  %v5153_v42 = vmul.u32.u64.high %v5121_v1, %v2148_v61, %v5152_v17  ;;  %v5156_v40 = vmul.u32.u64.low %v5121_v1, %v2144_v11  ;;  %v5157_v62 = vmul.u32.u64.high %v5121_v1, %v2144_v11, %v5156_v40 }
 0x455   :  { %v2227_v26 = vor.u32 %v2226_v2, %v2225_v32  ;;  %v2229_v52 = vshrl.u32 %v5886_v23, %v2220_v31  ;;  %v2221_v30 = vshrl.u32 %v5928_v35, %v2220_v31  ;;  %v2231_v41 = vshll.u32 %v5886_v23, %v2219_v8 }
 0x456   :  { %v2232_v29 = vshrl.u32 %v5887_v36, %v2220_v31  ;;  %v2235_v53 = vshrl.u32 %v5945_v49, %v2220_v31  ;;  %v2156_v24 = vmul.u32 %v5121_v1, %v2140_v28  ;;  %v2234_v3 = vshll.u32 %v5887_v36, %v2219_v8 }
 0x457   :  { %v2230_v54 = vor.u32 %v2229_v52, %v2228_v63  ;;  %vm2237_vm8 = vcmp.lt.s32.totalorder %v5123_v47, 1  ;;  %vm2158_vm10 = vc.u32 %v5153_v42, %v5156_v40  ;;  %v2159_v20 = vadd.s32 1, %v5157_v62 }
 0x458   :  { %v2233_v58 = vor.u32 %v2232_v29, %v2231_v41  ;;  %vm2238_vm11 = vcmp.lt.s32.totalorder %v5123_v47, 2  ;;  %v2236_v5 = vor.u32 %v2235_v53, %v2234_v3  ;;  %vm2239_vm15 = vcmp.lt.s32.totalorder %v5123_v47, 3 }
 0x459   :  { %vm2240_vm2 = vcmp.lt.s32.totalorder %v5123_v47, 4  ;;  %v2245_v18 = vsel %vm2237_vm8, %v2224_v43, %v2227_v26  ;;  %v2160_v1 = vsel %vm2158_vm10, %v2159_v20, %v5157_v62  ;;  %v2249_v0 = vsel %vm2237_vm8, %v2227_v26, %v2230_v54 }
 0x45a   :  { %v2242_v51 = vsel %vm2240_vm2, %v2230_v54, 2102212464  ;;  %v2246_v8 = vsel %vm2240_vm2, %v2233_v58, 920167782  ;;  %v2161_v60 = vadd.s32 %v2160_v1, %v2156_v24  ;;  %v2241_v27 = vsel %vm2237_vm8, %v2221_v30, %v2224_v43 }
 0x45b   :  { %v2247_v31 = vsel %vm2239_vm15, %v2230_v54, %v2246_v8  ;;  %v2250_v50 = vsel %vm2240_vm2, %v2236_v5, 1326507024  ;;  %v2243_v14 = vsel %vm2239_vm15, %v2227_v26, %v2242_v51  ;;  %vm2320_vm12 = vcmp.gt.s32.totalorder %v5129_v10, 0 }
 0x45c   :  { %v2248_v13 = vsel %vm2238_vm11, %v2245_v18, %v2247_v31  ;;  %v2251_v15 = vsel %vm2239_vm15, %v2233_v58, %v2250_v50  ;;  %v2162_v21 = vadd.s32 536870912, %v2161_v60  ;;  %v2316_v45 = vand.u32 8388607, %v5882_v25 }
 0x45d   :  { %v2252_v55 = vsel %vm2238_vm11, %v2249_v0, %v2251_v15  ;;  %v5182_v33 = vmul.u32.u64.low %v5125_v34, %v2248_v13  ;;  %v5183_v9 = vmul.u32.u64.high %v5125_v34, %v2248_v13, %v5182_v33  ;;  %v2321_v6 = vsel %vm2320_vm12, %v5129_v10, 0 }
 0x45e   :  { %v5187_v37 = vmul.u32.u64.low %v5125_v34, %v2252_v55  ;;  %v5188_v7 = vmul.u32.u64.high %v5125_v34, %v2252_v55, %v5187_v37  ;;  %v5193_v56 = vshrl.u32 %v2162_v21, 30  ;;  %v2244_v32 = vsel %vm2238_vm11, %v2241_v27, %v2243_v14 }
 0x45f   :  { %v2323_v28 = vand.u32 31, %v2321_v6  ;;  %v2416_v11 = vand.u32 2139095040, %v5117_v46  ;;  %v2263_v2 = vadd.s32 1, %v5183_v9  ;;  %v2260_v62 = vmul.u32 %v5125_v34, %v2244_v32 }
 0x460   :  { %v2164_v61 = vshll.u32 %v5193_v56, 30  ;;  %vm2262_vm14 = vc.u32 %v5188_v7, %v5182_v33  ;;  %v2317_v43 = vor.u32 8388608, %v2316_v45  ;;  %v2322_v53 = vshrl.u32 %v2321_v6, 5 }
 0x461   :  { %v2324_v17 = vsub.s32 32, %v2323_v28  ;;  %v2264_v26 = vsel %vm2262_vm14, %v2263_v2, %v5183_v9  ;;  %v2417_v47 = vshrl.u32 %v2416_v11, 23  ;;  %v2326_v52 = vshll.u32 %v5928_v35, %v2323_v28 }
 0x462   :  { %v5203_v10 = vsub.s32 %v2161_v60, %v2164_v61  ;;  %v2265_v63 = vadd.s32 %v2264_v26, %v2260_v62  ;;  %v2329_v34 = vshll.u32 %v5920_v48, %v2323_v28  ;;  %v2332_v20 = vshll.u32 %v5912_v44, %v2323_v28 }
 0x463   :  { %v2327_v30 = vshrl.u32 %v5920_v48, %v2324_v17  ;;  %v2330_v41 = vshrl.u32 %v5912_v44, %v2324_v17  ;;  %v2333_v24 = vshrl.u32 %v5886_v23, %v2324_v17  ;;  %v2357_v58 = vshll.u32 %v2317_v43, 8 }
 0x464   :  { %v2167_v29 = vsub.s32 0, %v5203_v10  ;;  %v2266_v54 = vadd.s32 536870912, %v2265_v63  ;;  %v2335_v1 = vshll.u32 %v5886_v23, %v2323_v28  ;;  %v2336_v51 = vshrl.u32 %v5887_v36, %v2324_v17 }
 0x465   :  { %v2328_v3 = vor.u32 %v2327_v30, %v2326_v52  ;;  %v2331_v18 = vor.u32 %v2330_v41, %v2329_v34  ;;  %v2334_v0 = vor.u32 %v2333_v24, %v2332_v20  ;;  %v2338_v60 = vshll.u32 %v5887_v36, %v2323_v28 }
 0x466   :  { %v3321_v5 = vmin.u32 %v2167_v29, %v5203_v10  ;;  %v5216_v8 = vshrl.u32 %v2266_v54, 30  ;;  %v2339_v27 = vshrl.u32 %v5945_v49, %v2324_v17  ;;  %v2337_v50 = vor.u32 %v2336_v51, %v2335_v1 }
 0x467   :  { %vm2341_vm1 = vcmp.lt.s32.totalorder %v2322_v53, 1  ;;  %v3332_v14 = vadd.s32 4294967169, %v2417_v47  ;;  %vm2342_vm9 = vcmp.lt.s32.totalorder %v2322_v53, 2  ;;  %vm2344_vm6 = vcmp.lt.s32.totalorder %v2322_v53, 4 }
 0x468   :  { %v2169_v31 = vclz %v3321_v5  ;;  %v2268_v13 = vshll.u32 %v5216_v8, 30  ;;  %v2340_v15 = vor.u32 %v2339_v27, %v2338_v60  ;;  %vm2343_vm5 = vcmp.lt.s32.totalorder %v2322_v53, 3 }
 0x469   :  { %v2349_v55 = vsel %vm2341_vm1, %v2328_v3, %v2331_v18  ;;  %v2350_v9 = vsel %vm2344_vm6, %v2337_v50, 920167782  ;;  %v2346_v45 = vsel %vm2344_vm6, %v2334_v0, 2102212464  ;;  %v2353_v32 = vsel %vm2341_vm1, %v2331_v18, %v2334_v0 }
 0x46a   :  { %v3322_v21 = vadd.s32 4294967294, %v2169_v31  ;;  %v5222_v37 = vsub.s32 %v2265_v63, %v2268_v13  ;;  %v2351_v6 = vsel %vm2343_vm5, %v2334_v0, %v2350_v9  ;;  %v2325_v28 = vshrl.u32 %v5928_v35, %v2324_v17 }
 0x46b   :  { %v2352_v11 = vsel %vm2342_vm9, %v2349_v55, %v2351_v6  ;;  %v2354_v61 = vsel %vm2344_vm6, %v2340_v15, 1326507024  ;;  %v2423_v26 = vadd.s32 1, %v3332_v14  ;;  %v2347_v52 = vsel %vm2343_vm5, %v2331_v18, %v2346_v45  ;;  %v1993_v55 = vpop.permute.xlu0 %1992 }
 0x46c   :  { %vm3323_vm13 = vcmp.lt.s32.totalorder %v3322_v21, 0  ;;  %v2271_v62 = vsub.s32 0, %v5222_v37  ;;  %v2355_v43 = vsel %vm2343_vm5, %v2337_v50, %v2354_v61  ;;  %v2345_v63 = vsel %vm2341_vm1, %v2325_v28, %v2328_v3 }
 0x46d   :  { %v2172_v2 = vsel %vm3323_vm13, 0, %v3322_v21  ;;  %v2356_v30 = vsel %vm2342_vm9, %v2353_v32, %v2355_v43  ;;  %vm2424_vm4 = vcmp.gt.s32.totalorder %v2423_v26, 0  ;;  %v5881_v20 = vand.u32 2147483647, %v5117_v46 }
 0x46e   :  { %v2177_v47 = vsub.s32 4294967266, %v2172_v2  ;;  %v3325_v41 = vmin.u32 %v2271_v62, %v5222_v37  ;;  %v5234_v29 = vmul.u32.u64.low %v2357_v58, %v2356_v30  ;;  %v5235_v17 = vmul.u32.u64.high %v2357_v58, %v2356_v30, %v5234_v29 }
 0x46f   :  { %v5237_v34 = vmul.u32.u64.low %v2357_v58, %v2352_v11  ;;  %v5238_v24 = vmul.u32.u64.high %v2357_v58, %v2352_v11, %v5237_v34  ;;  %v2425_v5 = vsel %vm2424_vm4, %v2423_v26, 0  ;;  %v2173_v1 = vsub.s32 32, %v2172_v2 }
 0x470   :  { %v2273_v54 = vclz %v3325_v41  ;;  %v2178_v3 = vadd.s32 127, %v2177_v47  ;;  %v2348_v18 = vsel %vm2342_vm9, %v2345_v63, %v2347_v52  ;;  %v2427_v51 = vand.u32 31, %v2425_v5 }
 0x471   :  { %vm2366_vm3 = vc.u32 %v5235_v17, %v5237_v34  ;;  %v2157_v60 = vadd.s32 %v5156_v40, %v5153_v42  ;;  %v2367_v27 = vadd.s32 1, %v5238_v24  ;;  %v2364_v31 = vmul.u32 %v2357_v58, %v2348_v18 }
 0x472   :  { %v3326_v0 = vadd.s32 4294967294, %v2273_v54  ;;  %v2420_v50 = vand.u32 8388607, %v5881_v20  ;;  %v2179_v13 = vshll.u32 %v2178_v3, 23  ;;  %v2428_v15 = vsub.s32 32, %v2427_v51 }
 0x473   :  { %v2175_v14 = vshrl.u32 %v2157_v60, %v2173_v1  ;;  %v2368_v53 = vsel %vm2366_vm3, %v2367_v27, %v5238_v24  ;;  %v2174_v9 = vshll.u32 %v5203_v10, %v2172_v2  ;;  %v5253_v42 = vadd.f32 %v5111_v59, %v1993_v55 }
 0x474   :  { %vm3327_vm7 = vcmp.lt.s32.totalorder %v3326_v0, 0  ;;  %v2369_v21 = vadd.s32 %v2368_v53, %v2364_v31  ;;  %v2421_v32 = vor.u32 8388608, %v2420_v50  ;;  %v2180_v58 = vor.u32 4788187, %v2179_v13 }
 0x475   :  { %v2276_v45 = vsel %vm3327_vm7, 0, %v3326_v0  ;;  %v2176_v40 = vor.u32 %v2175_v14, %v2174_v9  ;;  %v2431_v28 = vshrl.u32 %v5920_v48, %v2428_v15  ;;  %v2434_v11 = vshrl.u32 %v5912_v44, %v2428_v15 }
 0x476   :  { %v2370_v6 = vadd.s32 536870912, %v2369_v21  ;;  %v2281_v61 = vsub.s32 4294967266, %v2276_v45  ;;  %v2437_v43 = vshrl.u32 %v5886_v23, %v2428_v15  ;;  %v2440_v26 = vshrl.u32 %v5887_v36, %v2428_v15 }
 0x477   :  { %v2430_v10 = vshll.u32 %v5928_v35, %v2427_v51  ;;  %v2433_v2 = vshll.u32 %v5920_v48, %v2427_v51  ;;  %v2439_v59 = vshll.u32 %v5886_v23, %v2427_v51  ;;  %v2443_v47 = vshrl.u32 %v5945_v49, %v2428_v15 }
 0x478   :  { %v5257_v62 = vshrl.u32 %v2370_v6, 30  ;;  %v2426_v52 = vshrl.u32 %v2425_v5, 5  ;;  %v2436_v30 = vshll.u32 %v5912_v44, %v2427_v51  ;;  %v5268_v41 = vadd.f32 %v5113_v38, %v1993_v55 }
 0x479   :  { %v2432_v29 = vor.u32 %v2431_v28, %v2430_v10  ;;  %v2435_v24 = vor.u32 %v2434_v11, %v2433_v2  ;;  %v2441_v54 = vor.u32 %v2440_v26, %v2439_v59  ;;  %v2442_v1 = vshll.u32 %v5887_v36, %v2427_v51 }
 0x47a   :  { %v2372_v63 = vshll.u32 %v5257_v62, 30  ;;  %v2261_v3 = vadd.s32 %v5182_v33, %v5188_v7  ;;  %v2282_v18 = vadd.s32 127, %v2281_v61  ;;  %v2438_v60 = vor.u32 %v2437_v43, %v2436_v30 }
 0x47b   :  { %v2181_v27 = vand.u32 2147483647, %v2180_v58  ;;  %v2183_v31 = vcvt.s32.f32 %v2176_v40  ;;  %v2444_v5 = vor.u32 %v2443_v47, %v2442_v1  ;;  %v2461_v50 = vshll.u32 %v2421_v32, 8 }
 0x47c   :  { %v5273_v0 = vsub.s32 %v2369_v21, %v2372_v63  ;;  %v2277_v14 = vsub.s32 32, %v2276_v45  ;;  %vm2445_vm8 = vcmp.lt.s32.totalorder %v2426_v52, 1  ;;  %vm2448_vm10 = vcmp.lt.s32.totalorder %v2426_v52, 4 }
 0x47d   :  { %v2429_v13 = vshrl.u32 %v5928_v35, %v2428_v15  ;;  %vm2447_vm11 = vcmp.lt.s32.totalorder %v2426_v52, 3  ;;  %v2453_v51 = vsel %vm2445_vm8, %v2432_v29, %v2435_v24  ;;  %v2454_v53 = vsel %vm2448_vm10, %v2441_v54, 920167782 }
 0x47e   :  { %v2375_v38 = vsub.s32 0, %v5273_v0  ;;  %v2283_v33 = vshll.u32 %v2282_v18, 23  ;;  %vm2446_vm15 = vcmp.lt.s32.totalorder %v2426_v52, 2  ;;  %v2450_v7 = vsel %vm2448_vm10, %v2438_v60, 2102212464 }
 0x47f   :  { %v2455_v21 = vsel %vm2447_vm11, %v2438_v60, %v2454_v53  ;;  %v2457_v6 = vsel %vm2445_vm8, %v2435_v24, %v2438_v60  ;;  %v2458_v32 = vsel %vm2448_vm10, %v2444_v5, 1326507024  ;;  %v2278_v40 = vshll.u32 %v5222_v37, %v2276_v45 }
 0x480   :  { %v3329_v55 = vmin.u32 %v2375_v38, %v5273_v0  ;;  %v2456_v9 = vsel %vm2446_vm15, %v2453_v51, %v2455_v21  ;;  %v2279_v58 = vshrl.u32 %v2261_v3, %v2277_v14  ;;  %v2449_v15 = vsel %vm2445_vm8, %v2429_v13, %v2432_v29  ;;  %v5308_v21 = vpop.permute.xlu1 %1997 }
 0x481   :  { %v2459_v28 = vsel %vm2447_vm11, %v2441_v54, %v2458_v32  ;;  %v2451_v11 = vsel %vm2447_vm11, %v2435_v24, %v2450_v7  ;;  %v5284_v43 = vmul.u32.u64.low %v2461_v50, %v2456_v9  ;;  %v5285_v26 = vmul.u32.u64.high %v2461_v50, %v2456_v9, %v5284_v43 }
 0x482   :  { %v2460_v61 = vsel %vm2446_vm15, %v2457_v6, %v2459_v28  ;;  %v2184_v10 = vmul.f32 %v2183_v31, %v2181_v27  ;;  %v2284_v2 = vor.u32 4788187, %v2283_v33  ;;  %v2377_v63 = vclz %v3329_v55 }
 0x483   :  { %v5288_v59 = vmul.u32.u64.low %v2461_v50, %v2460_v61  ;;  %v5289_v47 = vmul.u32.u64.high %v2461_v50, %v2460_v61, %v5288_v59  ;;  %v2520_v30 = vand.u32 2139095040, %v5253_v42  ;;  %v2280_v37 = vor.u32 %v2279_v58, %v2278_v40 }
 0x484   :  { %v2452_v45 = vsel %vm2446_vm15, %v2449_v15, %v2451_v11  ;;  %v2624_v29 = vand.u32 2139095040, %v5268_v41  ;;  %v2471_v24 = vadd.s32 1, %v5285_v26  ;;  %v2185_v1 = vxor.u32 2147483648, %v2184_v10 }
 0x485   :  { %v2521_v54 = vshrl.u32 %v2520_v30, 23  ;;  %v2187_v3 = vsub.s32 4, %v5193_v56  ;;  %v2285_v18 = vand.u32 2147483647, %v2284_v2  ;;  %v5880_v60 = vand.u32 2147483647, %v5253_v42 }
 0x486   :  { %v3330_v27 = vadd.s32 4294967294, %v2377_v63  ;;  %v2468_v31 = vmul.u32 %v2461_v50, %v2452_v45  ;;  %vm2470_vm2 = vc.u32 %v5289_v47, %v5284_v43  ;;  %v2287_v14 = vcvt.s32.f32 %v2280_v37 }
 0x487   :  { %v3336_v5 = vadd.s32 4294967169, %v2521_v54  ;;  %v2472_v52 = vsel %vm2470_vm2, %v2471_v24, %v5285_v26  ;;  %v2625_v38 = vshrl.u32 %v2624_v29, 23  ;;  %vm2103_vm12 = vcmp.lt.s32.totalorder %v5096_v4, 0 }
 0x488   :  { %v2473_v13 = vadd.s32 %v2472_v52, %v2468_v31  ;;  %v2186_v53 = vsel %vm2103_vm12, %v2185_v1, %v2184_v10  ;;  %v5302_v33 = vsel %vm2103_vm12, %v2187_v3, %v5193_v56  ;;  %v5304_v7 = vmul.f32 %v2287_v14, %v2285_v18 }
 0x489   :  { %v2527_v51 = vadd.s32 1, %v3336_v5  ;;  %v2524_v50 = vand.u32 8388607, %v5880_v60  ;;  %vm3331_vm14 = vcmp.lt.s32.totalorder %v3330_v27, 0  ;;  %v3340_v9 = vadd.s32 4294967169, %v2625_v38 }
 0x48a   :  { %v2474_v55 = vadd.s32 536870912, %v2473_v13  ;;  %vm5312_vm9 = vcmp.le.f32.partialorder %v2101_v12, 0.7853982  ;;  %v5318_v56 = vadd.f32 %v5115_v39, %v5308_v21  ;;  %v5325_v58 = vadd.s32 %v5237_v34, %v5235_v17 }
 0x48b   :  { %vm2528_vm1 = vcmp.gt.s32.totalorder %v2527_v51, 0  ;;  %v5332_v12 = vsel %vm5312_vm9, %v5096_v4, %v2186_v53  ;;  %v2289_v11 = vxor.u32 2147483648, %v5304_v7  ;;  %v5335_v39 = vsel %vm3331_vm14, 0, %v3330_v27 }
 0x48c   :  { %v2529_v32 = vsel %vm2528_vm1, %v2527_v51, 0  ;;  %v5327_v15 = vshrl.u32 %v2474_v55, 30  ;;  %v2525_v10 = vor.u32 8388608, %v2524_v50  ;;  %v2631_v17 = vadd.s32 1, %v3340_v9 }
 0x48d   :  { %v2531_v28 = vand.u32 31, %v2529_v32  ;;  %v2530_v34 = vshrl.u32 %v2529_v32, 5  ;;  %v5879_v14 = vand.u32 2147483647, %v5268_v41  ;;  %vm2207_vm6 = vcmp.lt.s32.totalorder %v5098_v22, 0 }
 0x48e   :  { %v2476_v26 = vshll.u32 %v5327_v15, 30  ;;  %v2385_v52 = vsub.s32 4294967266, %v5335_v39  ;;  %v2565_v50 = vshll.u32 %v2525_v10, 8  ;;  %vm2632_vm13 = vcmp.gt.s32.totalorder %v2631_v17, 0 }
 0x48f   :  { %v2532_v2 = vsub.s32 32, %v2531_v28  ;;  %v2534_v59 = vshll.u32 %v5928_v35, %v2531_v28  ;;  %v2537_v63 = vshll.u32 %v5920_v48, %v2531_v28  ;;  %v2540_v30 = vshll.u32 %v5912_v44, %v2531_v28 }
 0x490   :  { %v5342_v37 = vsub.s32 %v2473_v13, %v2476_v26  ;;  %v2543_v24 = vshll.u32 %v5886_v23, %v2531_v28  ;;  %v2546_v3 = vshll.u32 %v5887_v36, %v2531_v28  ;;  %vm2549_vm5 = vcmp.lt.s32.totalorder %v2530_v34, 1 }
 0x491   :  { %v2535_v45 = vshrl.u32 %v5920_v48, %v2532_v2  ;;  %v2538_v29 = vshrl.u32 %v5912_v44, %v2532_v2  ;;  %v2541_v54 = vshrl.u32 %v5886_v23, %v2532_v2  ;;  %v2544_v1 = vshrl.u32 %v5887_v36, %v2532_v2 }
 0x492   :  { %v2547_v18 = vshrl.u32 %v5945_v49, %v2532_v2  ;;  %v2479_v27 = vsub.s32 0, %v5342_v37  ;;  %v2533_v55 = vshrl.u32 %v5928_v35, %v2532_v2  ;;  %vm2550_vm4 = vcmp.lt.s32.totalorder %v2530_v34, 2 }
 0x493   :  { %v2536_v31 = vor.u32 %v2535_v45, %v2534_v59  ;;  %v2539_v5 = vor.u32 %v2538_v29, %v2537_v63  ;;  %v2542_v38 = vor.u32 %v2541_v54, %v2540_v30  ;;  %v2545_v13 = vor.u32 %v2544_v1, %v2543_v24 }
 0x494   :  { %v2548_v51 = vor.u32 %v2547_v18, %v2546_v3  ;;  %v3333_v53 = vmin.u32 %v2479_v27, %v5342_v37  ;;  %vm2552_vm3 = vcmp.lt.s32.totalorder %v2530_v34, 4  ;;  %vm2551_vm7 = vcmp.lt.s32.totalorder %v2530_v34, 3 }
 0x495   :  { %v2557_v9 = vsel %vm2549_vm5, %v2536_v31, %v2539_v5  ;;  %v2554_v28 = vsel %vm2552_vm3, %v2542_v38, 2102212464  ;;  %v2558_v26 = vsel %vm2552_vm3, %v2545_v13, 920167782  ;;  %v2553_v59 = vsel %vm2549_vm5, %v2533_v55, %v2536_v31 }
 0x496   :  { %v2481_v32 = vclz %v3333_v53  ;;  %v2559_v63 = vsel %vm2551_vm7, %v2542_v38, %v2558_v26  ;;  %v2561_v45 = vsel %vm2549_vm5, %v2539_v5, %v2542_v38  ;;  %v2562_v30 = vsel %vm2552_vm3, %v2548_v51, 1326507024 }
 0x497   :  { %v2555_v24 = vsel %vm2551_vm7, %v2539_v5, %v2554_v28  ;;  %v2560_v54 = vsel %vm2550_vm4, %v2557_v9, %v2559_v63  ;;  %v2563_v1 = vsel %vm2551_vm7, %v2545_v13, %v2562_v30  ;;  %v2386_v10 = vadd.s32 127, %v2385_v52 }
 0x498   :  { %v3334_v29 = vadd.s32 4294967294, %v2481_v32  ;;  %v2564_v3 = vsel %vm2550_vm4, %v2561_v45, %v2563_v1  ;;  %v5359_v2 = vmul.u32.u64.low %v2565_v50, %v2560_v54  ;;  %v5360_v18 = vmul.u32.u64.high %v2565_v50, %v2560_v54, %v5359_v2 }
 0x499   :  { %v5363_v27 = vmul.u32.u64.low %v2565_v50, %v2564_v3  ;;  %v5364_v53 = vmul.u32.u64.high %v2565_v50, %v2564_v3, %v5363_v27  ;;  %v2633_v31 = vsel %vm2632_vm13, %v2631_v17, 0  ;;  %v2556_v5 = vsel %vm2550_vm4, %v2553_v59, %v2555_v24 }
 0x49a   :  { %vm3335_vm8 = vcmp.lt.s32.totalorder %v3334_v29, 0  ;;  %v2628_v13 = vand.u32 8388607, %v5879_v14  ;;  %v2635_v52 = vand.u32 31, %v2633_v31  ;;  %v5375_v51 = vsel %vm2207_vm6, %v2289_v11, %v5304_v7 }
 0x49b   :  { %v5367_v38 = vsel %vm3335_vm8, 0, %v3334_v29  ;;  %v2381_v55 = vsub.s32 32, %v5335_v39  ;;  %v2728_v32 = vand.u32 2139095040, %v5318_v56  ;;  %v2575_v28 = vadd.s32 1, %v5360_v18 }
 0x49c   :  { %v2489_v34 = vsub.s32 4294967266, %v5367_v38  ;;  %v2636_v26 = vsub.s32 32, %v2635_v52  ;;  %v2387_v59 = vshll.u32 %v2386_v10, 23  ;;  %v2469_v63 = vadd.s32 %v5284_v43, %v5289_v47 }
 0x49d   :  { %v2572_v7 = vmul.u32 %v2565_v50, %v2556_v5  ;;  %vm2574_vm10 = vc.u32 %v5364_v53, %v5359_v2  ;;  %v2629_v45 = vor.u32 8388608, %v2628_v13  ;;  %v2485_v24 = vsub.s32 32, %v5367_v38 }
 0x49e   :  { %v2576_v11 = vsel %vm2574_vm10, %v2575_v28, %v5360_v18  ;;  %v2639_v30 = vshrl.u32 %v5920_v48, %v2636_v26  ;;  %v2642_v29 = vshrl.u32 %v5912_v44, %v2636_v26  ;;  %v2634_v1 = vshrl.u32 %v2633_v31, 5 }
 0x49f   :  { %v2577_v54 = vadd.s32 %v2576_v11, %v2572_v7  ;;  %v2729_v3 = vshrl.u32 %v2728_v32, 23  ;;  %v2490_v10 = vadd.s32 127, %v2489_v34  ;;  %v2638_v27 = vshll.u32 %v5928_v35, %v2635_v52 }
 0x4a0   :  { %v2641_v43 = vshll.u32 %v5920_v48, %v2635_v52  ;;  %v2645_v47 = vshrl.u32 %v5886_v23, %v2636_v26  ;;  %v2644_v18 = vshll.u32 %v5912_v44, %v2635_v52  ;;  %v2647_v5 = vshll.u32 %v5886_v23, %v2635_v52 }
 0x4a1   :  { %v2578_v50 = vadd.s32 536870912, %v2577_v54  ;;  %v2648_v13 = vshrl.u32 %v5887_v36, %v2636_v26  ;;  %vm5400_vm11 = vcmp.le.f32.partialorder %v2205_v57, 0.7853982  ;;  %v2640_v31 = vor.u32 %v2639_v30, %v2638_v27 }
 0x4a2   :  { %v2643_v32 = vor.u32 %v2642_v29, %v2641_v43  ;;  %v2650_v34 = vshll.u32 %v5887_v36, %v2635_v52  ;;  %v2651_v7 = vshrl.u32 %v5945_v49, %v2636_v26  ;;  %v2383_v11 = vshrl.u32 %v5325_v58, %v2381_v55 }
 0x4a3   :  { %v5407_v14 = vshrl.u32 %v2578_v50, 30  ;;  %v2646_v60 = vor.u32 %v2645_v47, %v2644_v18  ;;  %v2649_v40 = vor.u32 %v2648_v13, %v2647_v5  ;;  %v2388_v20 = vor.u32 4788187, %v2387_v59 }
 0x4a4   :  { %v2652_v25 = vor.u32 %v2651_v7, %v2650_v34  ;;  %v2669_v61 = vshll.u32 %v2629_v45, 8  ;;  %v3344_v9 = vadd.s32 4294967169, %v2729_v3  ;;  %v2491_v57 = vshll.u32 %v2490_v10, 23 }
 0x4a5   :  { %v2580_v17 = vshll.u32 %v5407_v14, 30  ;;  %vm2653_vm15 = vcmp.lt.s32.totalorder %v2634_v1, 1  ;;  %vm2656_vm2 = vcmp.lt.s32.totalorder %v2634_v1, 4  ;;  %vm2311_vm12 = vcmp.lt.s32.totalorder %v5104_v16, 0 }
 0x4a6   :  { %v2486_v52 = vshll.u32 %v5342_v37, %v5367_v38  ;;  %v2487_v30 = vshrl.u32 %v2469_v63, %v2485_v24  ;;  %v2661_v58 = vsel %vm2653_vm15, %v2640_v31, %v2643_v32  ;;  %v2662_v55 = vsel %vm2656_vm2, %v2649_v40, 920167782 }
 0x4a7   :  { %v5414_v29 = vsub.s32 %v2577_v54, %v2580_v17  ;;  %v2637_v59 = vshrl.u32 %v5928_v35, %v2636_v26  ;;  %vm2655_vm14 = vcmp.lt.s32.totalorder %v2634_v1, 3  ;;  %v2658_v45 = vsel %vm2656_vm2, %v2646_v60, 2102212464 }
 0x4a8   :  { %vm2654_vm1 = vcmp.lt.s32.totalorder %v2634_v1, 2  ;;  %v2663_v3 = vsel %vm2655_vm14, %v2646_v60, %v2662_v55  ;;  %v2665_v10 = vsel %vm2653_vm15, %v2643_v32, %v2646_v60  ;;  %v2666_v27 = vsel %vm2656_vm2, %v2652_v25, 1326507024 }
 0x4a9   :  { %v2492_v43 = vor.u32 4788187, %v2491_v57  ;;  %v2583_v47 = vsub.s32 0, %v5414_v29  ;;  %v2657_v37 = vsel %vm2653_vm15, %v2637_v59, %v2640_v31  ;;  %v2664_v38 = vsel %vm2654_vm1, %v2661_v58, %v2663_v3 }
 0x4aa   :  { %v2659_v63 = vsel %vm2655_vm14, %v2643_v32, %v2658_v45  ;;  %v2667_v24 = vsel %vm2655_vm14, %v2649_v40, %v2666_v27  ;;  %v5421_v17 = vmul.u32.u64.low %v2669_v61, %v2664_v38  ;;  %v5422_v54 = vmul.u32.u64.high %v2669_v61, %v2664_v38, %v5421_v17 }
 0x4ab   :  { %v2293_v26 = vsel %vm5400_vm11, %v5098_v22, %v5375_v51  ;;  %v3337_v25 = vmin.u32 %v2583_v47, %v5414_v29  ;;  %v2668_v60 = vsel %vm2654_vm1, %v2665_v10, %v2667_v24  ;;  %v2735_v50 = vadd.s32 1, %v3344_v9 }
 0x4ac   :  { %v5950_v18 = vshll.u32 %v5273_v0, %v5335_v39  ;;  %v2488_v13 = vor.u32 %v2487_v30, %v2486_v52  ;;  %v5434_v40 = vmul.u32.u64.low %v2669_v61, %v2668_v60  ;;  %v5435_v31 = vmul.u32.u64.high %v2669_v61, %v2668_v60, %v5434_v40 }
 0x4ad   :  { %v2389_v32 = vand.u32 2147483647, %v2388_v20  ;;  %v2585_v34 = vclz %v3337_v25  ;;  %v2660_v7 = vsel %vm2654_vm1, %v2657_v37, %v2659_v63  ;;  %vm2736_vm5 = vcmp.gt.s32.totalorder %v2735_v50, 0 }
 0x4ae   :  { %v2384_v5 = vor.u32 %v2383_v11, %v5950_v18  ;;  %v2493_v57 = vand.u32 2147483647, %v2492_v43  ;;  %v2679_v51 = vadd.s32 1, %v5422_v54  ;;  %v5951_v58 = vand.u32 2147483647, %v5318_v56 }
 0x4af   :  { %v2737_v9 = vsel %vm2736_vm5, %v2735_v50, 0  ;;  %3566 = vcosq.f32 %v2293_v26  ;;  %v5952_v0 = vsub.s32 4, %v5257_v62  ;;  %v3338_v20 = vadd.s32 4294967294, %v2585_v34 }
 0x4b0   :  { %v2732_v55 = vand.u32 8388607, %v5951_v58  ;;  %v2739_v11 = vand.u32 31, %v2737_v9  ;;  %v2391_v1 = vcvt.s32.f32 %v2384_v5  ;;  %v2495_v52 = vcvt.s32.f32 %v2488_v13 }
 0x4b1   :  { %v5446_v39 = vsel %vm2311_vm12, %v5952_v0, %v5257_v62  ;;  %v2676_v30 = vmul.u32 %v2669_v61, %v2660_v7  ;;  %vm2678_vm13 = vc.u32 %v5435_v31, %v5421_v17  ;;  %3568 = vsinq.f32 %v2293_v26 }
 0x4b2   :  { %vm3339_vm4 = vcmp.lt.s32.totalorder %v3338_v20, 0  ;;  %v2680_v59 = vsel %vm2678_vm13, %v2679_v51, %v5422_v54  ;;  %v2740_v45 = vsub.s32 32, %v2739_v11  ;;  %v2392_v3 = vmul.f32 %v2391_v1, %v2389_v32 }
 0x4b3   :  { %v5451_v10 = vmul.f32 %v2495_v52, %v2493_v57  ;;  %v2681_v27 = vadd.s32 %v2680_v59, %v2676_v30  ;;  %v2733_v43 = vor.u32 8388608, %v2732_v55  ;;  %v5453_v62 = vsel %vm3339_vm4, 0, %v3338_v20 }
 0x4b4   :  { %v5455_v47 = vshrl.u32 %v2737_v9, 5  ;;  %v2748_v37 = vshll.u32 %v5912_v44, %v2739_v11  ;;  %v5460_v61 = vadd.f32 %v5119_v19, %v5308_v21  ;;  %v2743_v63 = vshrl.u32 %v5920_v48, %v2740_v45 }
 0x4b5   :  { %v2682_v38 = vadd.s32 536870912, %v2681_v27  ;;  %v2746_v24 = vshrl.u32 %v5912_v44, %v2740_v45  ;;  %v2749_v54 = vshrl.u32 %v5886_v23, %v2740_v45  ;;  %v2742_v26 = vshll.u32 %v5928_v35, %v2739_v11 }
 0x4b6   :  { %v2745_v25 = vshll.u32 %v5920_v48, %v2739_v11  ;;  %v2751_v60 = vshll.u32 %v5886_v23, %v2739_v11  ;;  %v2752_v50 = vshrl.u32 %v5887_v36, %v2740_v45  ;;  %v2393_v18 = vxor.u32 2147483648, %v2392_v3 }
 0x4b7   :  { %v2497_v5 = vxor.u32 2147483648, %v5451_v10  ;;  %v5470_v19 = vshrl.u32 %v2682_v38, 30  ;;  %v2750_v21 = vor.u32 %v2749_v54, %v2748_v37  ;;  %v2593_v13 = vsub.s32 4294967266, %v5453_v62 }
 0x4b8   :  { %v2744_v40 = vor.u32 %v2743_v63, %v2742_v26  ;;  %v2747_v32 = vor.u32 %v2746_v24, %v2745_v25  ;;  %v2753_v34 = vor.u32 %v2752_v50, %v2751_v60  ;;  %v5953_v7 = vand.u32 2147483647, %v5104_v16 }
 0x4b9   :  { %v2684_v51 = vshll.u32 %v5470_v19, 30  ;;  %v2754_v58 = vshll.u32 %v5887_v36, %v2739_v11  ;;  %v2755_v55 = vshrl.u32 %v5945_v49, %v2740_v45  ;;  %v2773_v9 = vshll.u32 %v2733_v43, 8  ;;  %v5482_v0 = vpop.eup %3566 }
 0x4ba   :  { %vm5475_vm3 = vcmp.le.f32.partialorder %v5953_v7, 0.7853982  ;;  %vm2415_vm7 = vcmp.lt.s32.totalorder %v5117_v46, 0  ;;  %v2589_v20 = vsub.s32 32, %v5453_v62  ;;  %v2741_v1 = vshrl.u32 %v5928_v35, %v2740_v45 }
 0x4bb   :  { %vm2760_vm8 = vcmp.lt.s32.totalorder %v5455_v47, 4  ;;  %v2832_v52 = vand.u32 2139095040, %v5460_v61  ;;  %v5489_v30 = vsub.s32 %v2681_v27, %v2684_v51  ;;  %v2756_v59 = vor.u32 %v2755_v55, %v2754_v58  ;;  %v5494_v43 = vpop.eup %3568 }
 0x4bc   :  { %vm2757_vm10 = vcmp.lt.s32.totalorder %v5455_v47, 1  ;;  %v2762_v11 = vsel %vm2760_vm8, %v2750_v21, 2102212464  ;;  %v2594_v37 = vadd.s32 127, %v2593_v13  ;;  %vm2759_vm15 = vcmp.lt.s32.totalorder %v5455_v47, 3 }
 0x4bd   :  { %v2765_v38 = vsel %vm2757_vm10, %v2744_v40, %v2747_v32  ;;  %v2766_v45 = vsel %vm2760_vm8, %v2753_v34, 920167782  ;;  %v5956_v63 = vand.u32 2147483647, %v5117_v46  ;;  %v2687_v24 = vsub.s32 0, %v5489_v30 }
 0x4be   :  { %vm2758_vm14 = vcmp.lt.s32.totalorder %v5455_v47, 2  ;;  %v2767_v54 = vsel %vm2759_vm15, %v2750_v21, %v2766_v45  ;;  %v2769_v26 = vsel %vm2757_vm10, %v2747_v32, %v2750_v21  ;;  %v2761_v25 = vsel %vm2757_vm10, %v2741_v1, %v2744_v40 }
 0x4bf   :  { %vm5501_vm2 = vcmp.le.f32.partialorder %v5956_v63, 0.7853982  ;;  %v2763_v60 = vsel %vm2759_vm15, %v2747_v32, %v2762_v11  ;;  %v2768_v50 = vsel %vm2758_vm14, %v2765_v38, %v2767_v54  ;;  %v2770_v13 = vsel %vm2760_vm8, %v2756_v59, 1326507024 }
 0x4c0   :  { %v3341_v7 = vmin.u32 %v2687_v24, %v5489_v30  ;;  %v2771_v51 = vsel %vm2759_vm15, %v2753_v34, %v2770_v13  ;;  %v5512_v58 = vmul.u32.u64.low %v2773_v9, %v2768_v50  ;;  %v5513_v55 = vmul.u32.u64.high %v2773_v9, %v2768_v50, %v5512_v58 }
 0x4c1   :  { %v5959_v63 = vsel %vm5312_vm9, 0, %v5302_v33  ;;  %v2394_v21 = vsel %vm2311_vm12, %v2393_v18, %v2392_v3  ;;  %v2772_v40 = vsel %vm2758_vm14, %v2769_v26, %v2771_v51  ;;  %v2833_v32 = vshrl.u32 %v2832_v52, 23 }
 0x4c2   :  { %v5519_v45 = vadd.s32 3, %v5959_v63  ;;  %v2573_v1 = vadd.s32 %v5359_v2, %v5364_v53  ;;  %v2689_v34 = vclz %v3341_v7  ;;  %3570 = vcosq.f32 %v5332_v12 }
 0x4c3   :  { %v5527_v59 = vmul.u32.u64.low %v2773_v9, %v2772_v40  ;;  %v5528_v11 = vmul.u32.u64.high %v2773_v9, %v2772_v40, %v5527_v59  ;;  %v2398_v33 = vsel %vm5475_vm3, 0, %v5446_v39  ;;  %v2764_v6 = vsel %vm2758_vm14, %v2761_v25, %v2763_v60 }
 0x4c4   :  { %v3348_v3 = vadd.s32 4294967169, %v2833_v32  ;;  %v2498_v18 = vsel %vm2415_vm7, %v2497_v5, %v5451_v10  ;;  %v2591_v52 = vshrl.u32 %v2573_v1, %v2589_v20  ;;  %v2595_v2 = vshll.u32 %v2594_v37, 23 }
 0x4c5   :  { %v2783_v53 = vadd.s32 1, %v5513_v55  ;;  %v2397_v38 = vsel %vm5475_vm3, %v5104_v16, %v2394_v21  ;;  %v5883_v24 = vand.u32 2147483647, %v5460_v61  ;;  %v2291_v39 = vsub.s32 4, %v5216_v8 }
 0x4c6   :  { %v2839_v54 = vadd.s32 1, %v3348_v3  ;;  %v2590_v47 = vshll.u32 %v5414_v29, %v5453_v62  ;;  %v3342_v26 = vadd.s32 4294967294, %v2689_v34  ;;  %v2780_v25 = vmul.u32 %v2773_v9, %v2764_v6 }
 0x4c7   :  { %vm2782_vm9 = vc.u32 %v5528_v11, %v5512_v58  ;;  %3572 = vsinq.f32 %v5332_v12  ;;  %v2501_v10 = vsel %vm5501_vm2, %v5117_v46, %v2498_v18  ;;  %v5555_v20 = vor.u32 4788187, %v2595_v2 }
 0x4c8   :  { %v2784_v5 = vsel %vm2782_vm9, %v2783_v53, %v5513_v55  ;;  %vm2840_vm12 = vcmp.gt.s32.totalorder %v2839_v54, 0  ;;  %3574 = vcosq.f32 %v2397_v38  ;;  %v5553_v57 = vor.u32 %v2591_v52, %v2590_v47 }
 0x4c9   :  { %v2785_v37 = vadd.s32 %v2784_v5, %v2780_v25  ;;  %3576 = vsinq.f32 %v2397_v38  ;;  %v5557_v29 = vadd.s32 3, %v2398_v33  ;;  %v2836_v62 = vand.u32 8388607, %v5883_v24 }
 0x4ca   :  { %v2841_v12 = vsel %vm2840_vm12, %v2839_v54, 0  ;;  %3578 = vcosq.f32 %v2501_v10  ;;  %vm3343_vm1 = vcmp.lt.s32.totalorder %v3342_v26, 0  ;;  %v2292_v60 = vsel %vm2207_vm6, %v2291_v39, %v5216_v8 }
 0x4cb   :  { %v2786_v9 = vadd.s32 536870912, %v2785_v37  ;;  %3580 = vsinq.f32 %v2501_v10  ;;  %v5566_v50 = vadd.s32 %v5421_v17, %v5435_v31  ;;  %v2843_v13 = vand.u32 31, %v2841_v12 }
 0x4cc   :  { %v5574_v40 = vpop.eup %3570  ;;  %v5576_v32 = vsel %vm3343_vm1, 0, %v3342_v26  ;;  %v2837_v8 = vor.u32 8388608, %v2836_v62  ;;  %v2294_v17 = vsel %vm5400_vm11, 0, %v2292_v60  ;;  %v5581_v31 = vadd.s32 %v5512_v58, %v5528_v11 }
 0x4cd   :  { %v5571_v63 = vshrl.u32 %v2786_v9, 30  ;;  %v2844_v1 = vsub.s32 32, %v2843_v13  ;;  %v2846_v59 = vshll.u32 %v5928_v35, %v2843_v13  ;;  %v2499_v33 = vsub.s32 4, %v5327_v15 }
 0x4ce   :  { %v2849_v3 = vshll.u32 %v5920_v48, %v2843_v13  ;;  %v2697_v28 = vsub.s32 4294967266, %v5576_v32  ;;  %v2842_v58 = vshrl.u32 %v2841_v12, 5  ;;  %v2852_v11 = vshll.u32 %v5912_v44, %v2843_v13 }
 0x4cf   :  { %v2788_v34 = vshll.u32 %v5571_v63, 30  ;;  %v2847_v6 = vshrl.u32 %v5920_v48, %v2844_v1  ;;  %v2850_v18 = vshrl.u32 %v5912_v44, %v2844_v1  ;;  %v2853_v52 = vshrl.u32 %v5886_v23, %v2844_v1 }
 0x4d0   :  { %v2693_v38 = vsub.s32 32, %v5576_v32  ;;  %v5597_v47 = vshll.u32 %v2837_v8, 8  ;;  %v2855_v5 = vshll.u32 %v5886_v23, %v2843_v13  ;;  %v2858_v12 = vshll.u32 %v5887_v36, %v2843_v13 }
 0x4d1   :  { %v5591_v2 = vsub.s32 %v2785_v37, %v2788_v34  ;;  %v5594_v53 = vpop.eup %3572  ;;  %v2848_v54 = vor.u32 %v2847_v6, %v2846_v59  ;;  %v2851_v39 = vor.u32 %v2850_v18, %v2849_v3  ;;  %v2854_v10 = vor.u32 %v2853_v52, %v2852_v11 }
 0x4d2   :  { %v5599_v26 = vpop.eup %3574  ;;  %v2856_v37 = vshrl.u32 %v5887_v36, %v2844_v1  ;;  %v2859_v9 = vshrl.u32 %v5945_v49, %v2844_v1  ;;  %v2298_v60 = vadd.s32 3, %v2294_v17  ;;  %v2500_v8 = vsel %vm2415_vm7, %v2499_v33, %v5327_v15 }
 0x4d3   :  { %v2791_v25 = vsub.s32 0, %v5591_v2  ;;  %v5604_v62 = vpop.eup %3576  ;;  %v2698_v59 = vadd.s32 127, %v2697_v28  ;;  %vm2861_vm6 = vcmp.lt.s32.totalorder %v2842_v58, 1  ;;  %v2845_v52 = vshrl.u32 %v5928_v35, %v2844_v1 }
 0x4d4   :  { %v5611_v34 = vpop.eup %3578  ;;  %v2857_v3 = vor.u32 %v2856_v37, %v2855_v5  ;;  %v2860_v11 = vor.u32 %v2859_v9, %v2858_v12  ;;  %vm2864_vm11 = vcmp.lt.s32.totalorder %v2842_v58, 4  ;;  %v2869_v13 = vsel %vm2861_vm6, %v2848_v54, %v2851_v39 }
 0x4d5   :  { %v3345_v6 = vmin.u32 %v2791_v25, %v5591_v2  ;;  %v3581_v18 = vpop.eup %3580  ;;  %vm2863_vm5 = vcmp.lt.s32.totalorder %v2842_v58, 3  ;;  %v2866_v17 = vsel %vm2864_vm11, %v2854_v10, 2102212464  ;;  %vm2862_vm13 = vcmp.lt.s32.totalorder %v2842_v58, 2 }
 0x4d6   :  { %v2870_v55 = vsel %vm2864_vm11, %v2857_v3, 920167782  ;;  %v2873_v15 = vsel %vm2861_vm6, %v2851_v39, %v2854_v10  ;;  %v2299_v33 = vand.u32 3, %v2298_v60  ;;  %v2865_v28 = vsel %vm2861_vm6, %v2845_v52, %v2848_v54 }
 0x4d7   :  { %v2793_v24 = vclz %v3345_v6  ;;  %v2871_v51 = vsel %vm2863_vm5, %v2854_v10, %v2870_v55  ;;  %v2874_v5 = vsel %vm2864_vm11, %v2860_v11, 1326507024  ;;  %v2867_v37 = vsel %vm2863_vm5, %v2851_v39, %v2866_v17 }
 0x4d8   :  { %v2872_v25 = vsel %vm2862_vm13, %v2869_v13, %v2871_v51  ;;  %v2875_v7 = vsel %vm2863_vm5, %v2857_v3, %v2874_v5  ;;  %v2694_v9 = vshll.u32 %v5489_v30, %v5576_v32  ;;  %v2695_v54 = vshrl.u32 %v5566_v50, %v2693_v38 }
 0x4d9   :  { %v3346_v21 = vadd.s32 4294967294, %v2793_v24  ;;  %v5617_v1 = vmul.u32.u64.low %v5597_v47, %v2872_v25  ;;  %v5618_v12 = vmul.u32.u64.high %v5597_v47, %v2872_v25, %v5617_v1  ;;  %v2876_v55 = vsel %vm2862_vm13, %v2873_v15, %v2875_v7 }
 0x4da   :  { %v2502_v24 = vsel %vm5501_vm2, 0, %v2500_v8  ;;  %v5628_v39 = vmul.u32.u64.low %v5597_v47, %v2876_v55  ;;  %v5629_v10 = vmul.u32.u64.high %v5597_v47, %v2876_v55, %v5628_v39  ;;  %vm2297_vm3 = vweird.f32 %v5098_v22 }
 0x4db   :  { %vm3347_vm4 = vcmp.lt.s32.totalorder %v3346_v21, 0  ;;  %vm2505_vm7 = vweird.f32 %v5117_v46  ;;  %v2699_v60 = vshll.u32 %v2698_v59, 23  ;;  %v2868_v30 = vsel %vm2862_vm13, %v2865_v28, %v2867_v37 }
 0x4dc   :  { %v2796_v51 = vsel %vm3347_vm4, 0, %v3346_v21  ;;  %v2510_v32 = vxor.u32 2147483648, %v3581_v18  ;;  %v2887_v7 = vadd.s32 1, %v5618_v12  ;;  %vm2301_vm8 = vcmp.eq.s32.totalorder %v2299_v33, 0 }
 0x4dd   :  { %v2801_v6 = vsub.s32 4294967266, %v2796_v51  ;;  %vm2304_vm10 = vcmp.eq.s32.totalorder %v2299_v33, 2  ;;  %v2506_v27 = vadd.s32 3, %v2502_v24  ;;  %v5960_v21 = vxor.u32 2147483648, %v5494_v43 }
 0x4de   :  { %v5961_v8 = vxor.u32 2147483648, %v5482_v0  ;;  %v2513_v59 = vxor.u32 2147483648, %v5611_v34  ;;  %v2696_v52 = vor.u32 %v2695_v54, %v2694_v9  ;;  %v2884_v58 = vmul.u32 %v5597_v47, %v2868_v30 }
 0x4df   :  { %v2802_v50 = vadd.s32 127, %v2801_v6  ;;  %v2303_v38 = vsel %vm2301_vm8, %v5482_v0, %v5960_v21  ;;  %vm2886_vm15 = vc.u32 %v5629_v10, %v5617_v1  ;;  %v2507_v11 = vand.u32 3, %v2506_v27 }
 0x4e0   :  { %v2306_v3 = vsel %vm2304_vm10, %v5961_v8, %v5494_v43  ;;  %v2700_v13 = vor.u32 4788187, %v2699_v60  ;;  %v2797_v17 = vsub.s32 32, %v2796_v51  ;;  %v2888_v15 = vsel %vm2886_vm15, %v2887_v7, %v5618_v12 }
 0x4e1   :  { %vm2300_vm2 = vcmp.lt.s32.totalorder %v2299_v33, 2  ;;  %v2889_v28 = vadd.s32 %v2888_v15, %v2884_v58  ;;  %vm2509_vm14 = vcmp.eq.s32.totalorder %v2507_v11, 0  ;;  %vm2512_vm9 = vcmp.eq.s32.totalorder %v2507_v11, 2 }
 0x4e2   :  { %v2307_v25 = vsel %vm2300_vm2, %v2303_v38, %v2306_v3  ;;  %v2803_v0 = vshll.u32 %v2802_v50, 23  ;;  %vm2508_vm12 = vcmp.lt.s32.totalorder %v2507_v11, 2  ;;  %v2511_v43 = vsel %vm2509_vm14, %v5611_v34, %v2510_v32 }
 0x4e3   :  { %v2514_v5 = vsel %vm2512_vm9, %v2513_v59, %v3581_v18  ;;  %v2890_v37 = vadd.s32 536870912, %v2889_v28  ;;  %v2195_v9 = vand.u32 3, %v5519_v45  ;;  %v2198_v55 = vxor.u32 2147483648, %v5594_v53 }
 0x4e4   :  { %v2515_v47 = vsel %vm2508_vm12, %v2511_v43, %v2514_v5  ;;  %v2799_v24 = vshrl.u32 %v5581_v31, %v2797_v17  ;;  %v2308_v33 = vsel %vm2297_vm3, nan, %v2307_v25  ;;  %v2201_v54 = vxor.u32 2147483648, %v5574_v40 }
 0x4e5   :  { %v2516_v12 = vsel %vm2505_vm7, nan, %v2515_v47  ;;  %v2798_v39 = vshll.u32 %v5591_v2, %v2796_v51  ;;  %v5656_v34 = vshrl.u32 %v2890_v37, 30  ;;  %vm2197_vm1 = vcmp.eq.s32.totalorder %v2195_v9, 0 }
 0x4e6   :  { %v3377_v18 = vpack.c.bf16 %v2516_v12, %v2308_v33  ;;  %v2804_v60 = vor.u32 4788187, %v2803_v0  ;;  %v2199_v45 = vsel %vm2197_vm1, %v5574_v40, %v2198_v55  ;;  %vm2200_vm6 = vcmp.eq.s32.totalorder %v2195_v9, 2 }
 0x4e7   :  { %v2403_v31 = vand.u32 3, %v5557_v29  ;;  %v2892_v22 = vshll.u32 %v5656_v34, 30  ;;  %v2202_v46 = vsel %vm2200_vm6, %v2201_v54, %v5594_v53  ;;  %v2406_v6 = vxor.u32 2147483648, %v5604_v62 }
 0x4e8   :  { %3378 = vmatprep.subr.bf16.mxu1 %v3377_v18  ;;  %v2409_v30 = vxor.u32 2147483648, %v5599_v26  ;;  %v2701_v2 = vand.u32 2147483647, %v2700_v13  ;;  %v2800_v51 = vor.u32 %v2799_v24, %v2798_v39  ;;  %vm2196_vm11 = vcmp.lt.s32.totalorder %v2195_v9, 2 }
 0x4e9   :  { %vm2405_vm5 = vcmp.eq.s32.totalorder %v2403_v31, 0  ;;  %v2893_v32 = vsub.s32 %v2889_v28, %v2892_v22  ;;  %v2203_v7 = vsel %vm2196_vm11, %v2199_v45, %v2202_v46  ;;  %vm2408_vm13 = vcmp.eq.s32.totalorder %v2403_v31, 2 }
 0x4ea   :  { %v2407_v40 = vsel %vm2405_vm5, %v5599_v26, %v2406_v6  ;;  %v2703_v27 = vcvt.s32.f32 %v2696_v52  ;;  %v2805_v29 = vand.u32 2147483647, %v2804_v60  ;;  %vm2404_vm4 = vcmp.lt.s32.totalorder %v2403_v31, 2 }
 0x4eb   :  { %v2410_v50 = vsel %vm2408_vm13, %v2409_v30, %v5604_v62  ;;  %v2895_v21 = vsub.s32 0, %v2893_v32  ;;  %vm2193_vm3 = vweird.f32 %v5096_v4  ;;  %vm2401_vm7 = vweird.f32 %v5104_v16 }
 0x4ec   :  { %v2411_v53 = vsel %vm2404_vm4, %v2407_v40, %v2410_v50  ;;  %v5962_v38 = vand.u32 2147483647, %v5555_v20  ;;  %v5963_v8 = vcvt.s32.f32 %v5553_v57  ;;  %v2807_v59 = vcvt.s32.f32 %v2800_v51 }
 0x4ed   :  { %v2204_v58 = vsel %vm2193_vm3, nan, %v2203_v7  ;;  %v2412_v26 = vsel %vm2401_vm7, nan, %v2411_v53  ;;  %v2704_v11 = vmul.f32 %v2703_v27, %v2701_v2  ;;  %v3349_v52 = vmin.u32 %v2895_v21, %v2893_v32 }
 0x4ee   :  { %v2600_v3 = vmul.f32 %v5963_v8, %v5962_v38  ;;  %v3379_v13 = vpack.c.bf16 %v2412_v26, %v2204_v58  ;;  %v2808_v17 = vmul.f32 %v2807_v59, %v2805_v29  ;;  %vm2519_vm8 = vcmp.lt.s32.totalorder %v5253_v42, 0 }
 0x4ef   :  { %v2897_v15 = vclz %v3349_v52  ;;  %v2705_v28 = vxor.u32 2147483648, %v2704_v11  ;;  %vm2623_vm15 = vcmp.lt.s32.totalorder %v5268_v41, 0  ;;  %vm2727_vm2 = vcmp.lt.s32.totalorder %v5318_v56, 0 }
 0x4f0   :  { %3380 = vmatpush1.bf16.msra.mxu1 %v3379_v13  ;;  %v2601_v62 = vxor.u32 2147483648, %v2600_v3  ;;  %v2809_v25 = vxor.u32 2147483648, %v2808_v17  ;;  %v2885_v0 = vadd.s32 %v5617_v1, %v5629_v10  ;;  %v5964_v37 = vand.u32 2147483647, %v5253_v42 }
 0x4f1   :  { %v3350_v4 = vadd.s32 4294967294, %v2897_v15  ;;  %v2706_v20 = vsel %vm2623_vm15, %v2705_v28, %v2704_v11  ;;  %v5967_v9 = vand.u32 2147483647, %v5268_v41  ;;  %v5970_v39 = vand.u32 2147483647, %v5318_v56 }
 0x4f2   :  { %v2602_v16 = vsel %vm2519_vm8, %v2601_v62, %v2600_v3  ;;  %vm5683_vm14 = vcmp.le.f32.partialorder %v5964_v37, 0.7853982  ;;  %v2810_v24 = vsel %vm2727_vm2, %v2809_v25, %v2808_v17  ;;  %v2811_v22 = vsub.s32 4, %v5571_v63 }
 0x4f3   :  { %vm3351_vm10 = vcmp.lt.s32.totalorder %v3350_v4, 0  ;;  %vm5689_vm9 = vcmp.le.f32.partialorder %v5967_v9, 0.7853982  ;;  %v2605_v1 = vsel %vm5683_vm14, %v5253_v42, %v2602_v16  ;;  %vm5703_vm12 = vcmp.le.f32.partialorder %v5970_v39, 0.7853982 }
 0x4f4   :  { %v2900_v57 = vsel %vm3351_vm10, 0, %v3350_v4  ;;  %v2709_v54 = vsel %vm5689_vm9, %v5268_v41, %v2706_v20  ;;  %v2813_v60 = vsel %vm5703_vm12, %v5318_v56, %v2810_v24  ;;  %3582 = vcosq.f32 %v2605_v1 }
 0x4f5   :  { %v2901_v43 = vsub.s32 32, %v2900_v57  ;;  %v2905_v5 = vsub.s32 4294967266, %v2900_v57  ;;  %v2902_v10 = vshll.u32 %v2893_v32, %v2900_v57  ;;  %3584 = vcosq.f32 %v2709_v54 }
 0x4f6   :  { %3586 = vcosq.f32 %v2813_v60  ;;  %v2707_v6 = vsub.s32 4, %v5470_v19  ;;  %v2603_v30 = vsub.s32 4, %v5407_v14  ;;  %v2812_v32 = vsel %vm2727_vm2, %v2811_v22, %v5571_v63 }
 0x4f7   :  { %v2903_v33 = vshrl.u32 %v2885_v0, %v2901_v43  ;;  %v2906_v12 = vadd.s32 127, %v2905_v5  ;;  %3588 = vsinq.f32 %v2813_v60  ;;  %v2915_v40 = vsub.s32 4, %v5656_v34 }
 0x4f8   :  { %3590 = vsinq.f32 %v2709_v54  ;;  %v2708_v27 = vsel %vm2623_vm15, %v2707_v6, %v5470_v19  ;;  %v2604_v29 = vsel %vm2519_vm8, %v2603_v30, %v5407_v14  ;;  %v2814_v21 = vsel %vm5703_vm12, 0, %v2812_v32 }
 0x4f9   :  { %v2904_v45 = vor.u32 %v2903_v33, %v2902_v10  ;;  %v2907_v31 = vshll.u32 %v2906_v12, 23  ;;  %3592 = vsinq.f32 %v2605_v1  ;;  %vm2831_vm1 = vcmp.lt.s32.totalorder %v5460_v61, 0 }
 0x4fa   :  { %v5973_v53 = vand.u32 2147483647, %v5460_v61  ;;  %v2710_v19 = vsel %vm5689_vm9, 0, %v2708_v27  ;;  %v2916_v8 = vsel %vm2831_vm1, %v2915_v40, %v5656_v34  ;;  %v2606_v14 = vsel %vm5683_vm14, 0, %v2604_v29  ;;  %v2933_v27 = vld [vmem:[%s5850_s7] sm:$0x7] }
 0x4fb   :  { %v2908_v46 = vor.u32 4788187, %v2907_v31  ;;  %v2911_v51 = vcvt.s32.f32 %v2904_v45  ;;  %v2818_v26 = vadd.s32 3, %v2814_v21  ;;  %v2714_v52 = vadd.s32 3, %v2710_v19  ;;  %s3638_s7 = smov [#allocation2]  }
 0x4fc   :  { %vm5728_vm6 = vcmp.le.f32.partialorder %v5973_v53, 0.7853982  ;;  %v2610_v15 = vadd.s32 3, %v2606_v14  ;;  %vm2817_vm12 = vweird.f32 %v5318_v56  ;;  %s3233_s10 = sshll.u32 %s3638_s7, 4  ;;  %s3234_s10 = int_to_ptr.vmem [resolvable:$true] %s3233_s10 }
 0x4fd   :  { %v2909_v2 = vand.u32 2147483647, %v2908_v46  ;;  %v2918_v13 = vsel %vm5728_vm6, 0, %v2916_v8  ;;  %v2819_v4 = vand.u32 3, %v2818_v26  ;;  %v2715_v25 = vand.u32 3, %v2714_v52  ;;  %s3606_s11 = scalar_lea.vmem %s3234_s10, 128  ;;  %p3611_p1 = scmp.lt.s32.totalorder %s3234_s10, %s3234_s10 }
 0x4fe   :  { %v3583_v3 = vpop.eup %3582  ;;  %v2922_v28 = vadd.s32 3, %v2918_v13  ;;  %v2611_v43 = vand.u32 3, %v2610_v15  ;;  %p3607_p0 = scmp.ne.s32.totalorder %s3234_s10, %s3606_s11  ;;  %p3612_p2 = scmp.lt.s32.totalorder %s3606_s11, %s3606_s11 }
 0x4ff   :  { %v2912_v7 = vmul.f32 %v2911_v51, %v2909_v2  ;;  %v3585_v58 = vpop.eup %3584  ;;  %v2617_v37 = vxor.u32 2147483648, %v3583_v3  ;;  %vm2821_vm11 = vcmp.eq.s32.totalorder %v2819_v4, 0  ;;  %vm2824_vm5 = vcmp.eq.s32.totalorder %v2819_v4, 2 }
 0x500   :  { %v3587_v11 = vpop.eup %3586  ;;  %v2721_v0 = vxor.u32 2147483648, %v3585_v58  ;;  %v2923_v47 = vand.u32 3, %v2922_v28  ;;  %vm2717_vm13 = vcmp.eq.s32.totalorder %v2715_v25, 0  ;;  %vm2720_vm4 = vcmp.eq.s32.totalorder %v2715_v25, 2  ;;  %p3613_p3 = por %p3612_p2, %p3611_p1 }
 0x501   :  { %v2913_v50 = vxor.u32 2147483648, %v2912_v7  ;;  %v3589_v17 = vpop.eup %3588  ;;  %v2825_v57 = vxor.u32 2147483648, %v3587_v11  ;;  %vm2613_vm3 = vcmp.eq.s32.totalorder %v2611_v43, 0  ;;  %vm2616_vm7 = vcmp.eq.s32.totalorder %v2611_v43, 2 }
 0x502   :  { %v3591_v34 = vpop.eup %3590  ;;  %v2822_v16 = vxor.u32 2147483648, %v3589_v17  ;;  %vm2820_vm8 = vcmp.lt.s32.totalorder %v2819_v4, 2  ;;  %vm2716_vm10 = vcmp.lt.s32.totalorder %v2715_v25, 2  ;;  %vm2928_vm15 = vcmp.eq.s32.totalorder %v2923_v47, 2  ;;  %p3614_p4 = pnand %p3613_p3, %p3607_p0 }
 0x503   :  { %v2914_v38 = vsel %vm2831_vm1, %v2913_v50, %v2912_v7  ;;  %v3593_v62 = vpop.eup %3592  ;;  %v2718_v20 = vxor.u32 2147483648, %v3591_v34  ;;  %v2826_v55 = vsel %vm2824_vm5, %v2825_v57, %v3589_v17  ;;  %v2722_v10 = vsel %vm2720_vm4, %v2721_v0, %v3591_v34 }
 0x504   :  { %v2917_v59 = vsel %vm5728_vm6, %v5460_v61, %v2914_v38  ;;  %v2614_v5 = vxor.u32 2147483648, %v3593_v62  ;;  %v2823_v9 = vsel %vm2821_vm11, %v3587_v11, %v2822_v16  ;;  %v2618_v39 = vsel %vm2616_vm7, %v2617_v37, %v3593_v62 }
 0x505   :  { %3594 = vcosq.f32 %v2917_v59  ;;  %v2719_v1 = vsel %vm2717_vm13, %v3585_v58, %v2718_v20  ;;  %v2827_v60 = vsel %vm2820_vm8, %v2823_v9, %v2826_v55  ;;  %vm2925_vm2 = vcmp.eq.s32.totalorder %v2923_v47, 0 }
 0x506   :  { %3596 = vsinq.f32 %v2917_v59  ;;  %v2615_v54 = vsel %vm2613_vm3, %v3583_v3, %v2614_v5  ;;  %v2723_v45 = vsel %vm2716_vm10, %v2719_v1, %v2722_v10  ;;  %vm2612_vm14 = vcmp.lt.s32.totalorder %v2611_v43, 2 }
 0x507   :  { %vm2924_vm9 = vcmp.lt.s32.totalorder %v2923_v47, 2  ;;  %v2619_v46 = vsel %vm2612_vm14, %v2615_v54, %v2618_v39  ;;  %vm2713_vm1 = vweird.f32 %v5268_v41  ;;  %vm2921_vm6 = vweird.f32 %v5460_v61  ;;  %v2938_v41 = vpop.permute.xlu0 %2937 }
 0x508   :  { %v2828_v30 = vsel %vm2817_vm12, nan, %v2827_v60  ;;  %v2724_v2 = vsel %vm2713_vm1, nan, %v2723_v45  ;;  %vm2609_vm11 = vweird.f32 %v5253_v42 }
 0x509   :  { %v2620_v7 = vsel %vm2609_vm11, nan, %v2619_v46 }
 0x50a   :  { %v3383_v40 = vpack.c.bf16 %v2828_v30, %v2620_v7 }
 0x50f   :  { %v3595_v24 = vpop.eup %3594 }
 0x510   :  { %v3597_v33 = vpop.eup %3596  ;;  %v2929_v12 = vxor.u32 2147483648, %v3595_v24 }
 0x511   :  { %v2926_v18 = vxor.u32 2147483648, %v3597_v33 }
 0x512   :  { %v2930_v31 = vsel %vm2928_vm15, %v2929_v12, %v3597_v33 }
 0x513   :  { %v2927_v22 = vsel %vm2925_vm2, %v3595_v24, %v2926_v18 }
 0x514   :  { %v2931_v6 = vsel %vm2924_vm9, %v2927_v22, %v2930_v31 }
 0x515   :  { %v2932_v51 = vsel %vm2921_vm6, nan, %v2931_v6 }
 0x516   :  { %v3381_v32 = vpack.c.bf16 %v2932_v51, %v2724_v2 }
 0x518   :  { %3382 = vmatprep.subr.bf16.mxu1 %v3381_v32 }
 0x519   :  { %3384 = vmatpush1.bf16.msra.mxu1 %v3383_v40 }
 0x51c   :  { %3352 = vmatmul.mubr.msk.f32.vlgmr.msra.gmra.mrb[12].mxu1 %vm1038_vm0, %v2933_v27 }
 0x5ef   :  { %v3009_v56 = vpop.f32.mrb[12].mxu1 }
 0x5f0   :  { %v5750_v61 = vadd.f32 %v3009_v56, %v2938_v41  ;;  %v3011_v29 = vpop.f32.mrb[13].mxu1 }
 0x5f1   :  { %v5752_v50 = vadd.f32 %v3011_v29, %v2938_v41 }
 0x5f2   :  { %v3014_v42 = vand.u32 2147483647, %v5750_v61  ;;  %v3017_v21 = vand.u32 2139095040, %v5750_v61  ;;  %vm3016_vm6 = vcmp.lt.s32.totalorder %v5750_v61, 0 }
 0x5f3   :  { %v3121_v53 = vand.u32 2139095040, %v5752_v50  ;;  %v3118_v19 = vand.u32 2147483647, %v5752_v50 }
 0x5f4   :  { %v3018_v63 = vshrl.u32 %v3017_v21, 23  ;;  %v3021_v38 = vand.u32 8388607, %v3014_v42  ;;  %vm3015_vm11 = vcmp.le.f32.partialorder %v3014_v42, 0.7853982 }
 0x5f5   :  { %v3122_v8 = vshrl.u32 %v3121_v53, 23  ;;  %v3125_v26 = vand.u32 8388607, %v3118_v19 }
 0x5f6   :  { %v3353_v3 = vadd.s32 4294967169, %v3018_v63  ;;  %v3022_v58 = vor.u32 8388608, %v3021_v38 }
 0x5f7   :  { %v3357_v14 = vadd.s32 4294967169, %v3122_v8  ;;  %v3126_v62 = vor.u32 8388608, %v3125_v26 }
 0x5f8   :  { %v3024_v59 = vadd.s32 1, %v3353_v3  ;;  %v5762_v34 = vshll.u32 %v3022_v58, 8 }
 0x5f9   :  { %v3128_v11 = vadd.s32 1, %v3357_v14  ;;  %v3166_v26 = vshll.u32 %v3126_v62, 8 }
 0x5fa   :  { %vm3025_vm0 = vcmp.gt.s32.totalorder %v3024_v59, 0 }
 0x5fb   :  { %v3026_v52 = vsel %vm3025_vm0, %v3024_v59, 0  ;;  %vm3129_vm5 = vcmp.gt.s32.totalorder %v3128_v11, 0  ;;  %vm3120_vm0 = vcmp.lt.s32.totalorder %v5752_v50, 0 }
 0x5fc   :  { %v3027_v13 = vshrl.u32 %v3026_v52, 5  ;;  %v3028_v17 = vand.u32 31, %v3026_v52  ;;  %v3130_v15 = vsel %vm3129_vm5, %v3128_v11, 0  ;;  %vm3119_vm5 = vcmp.le.f32.partialorder %v3118_v19, 0.7853982 }
 0x5fd   :  { %v5765_v25 = vshrl.u32 %v3130_v15, 5  ;;  %v3132_v16 = vand.u32 31, %v3130_v15 }
 0x5fe   :  { %v3029_v28 = vsub.s32 32, %v3028_v17  ;;  %v3031_v4 = vshll.u32 %v5928_v35, %v3028_v17  ;;  %v3034_v57 = vshll.u32 %v5920_v48, %v3028_v17  ;;  %v3037_v20 = vshll.u32 %v5912_v44, %v3028_v17 }
 0x5ff   :  { %v3040_v0 = vshll.u32 %v5886_v23, %v3028_v17  ;;  %v3043_v43 = vshll.u32 %v5887_v36, %v3028_v17  ;;  %vm3046_vm13 = vcmp.lt.s32.totalorder %v3027_v13, 1  ;;  %vm3047_vm4 = vcmp.lt.s32.totalorder %v3027_v13, 2 }
 0x600   :  { %v3032_v5 = vshrl.u32 %v5920_v48, %v3029_v28  ;;  %v3035_v37 = vshrl.u32 %v5912_v44, %v3029_v28  ;;  %v3038_v47 = vshrl.u32 %v5886_v23, %v3029_v28  ;;  %v3030_v9 = vshrl.u32 %v5928_v35, %v3029_v28 }
 0x601   :  { %v3041_v55 = vshrl.u32 %v5887_v36, %v3029_v28  ;;  %v3044_v24 = vshrl.u32 %v5945_v49, %v3029_v28  ;;  %v3133_v12 = vsub.s32 32, %v3132_v16  ;;  %vm3048_vm3 = vcmp.lt.s32.totalorder %v3027_v13, 3 }
 0x602   :  { %v3033_v1 = vor.u32 %v3032_v5, %v3031_v4  ;;  %v3036_v10 = vor.u32 %v3035_v37, %v3034_v57  ;;  %v3039_v33 = vor.u32 %v3038_v47, %v3037_v20  ;;  %vm3049_vm7 = vcmp.lt.s32.totalorder %v3027_v13, 4 }
 0x603   :  { %v3042_v54 = vor.u32 %v3041_v55, %v3040_v0  ;;  %v3045_v39 = vor.u32 %v3044_v24, %v3043_v43  ;;  %v3135_v30 = vshll.u32 %v5928_v35, %v3132_v16  ;;  %v3136_v32 = vshrl.u32 %v5920_v48, %v3133_v12 }
 0x604   :  { %v3050_v18 = vsel %vm3046_vm13, %v3030_v9, %v3033_v1  ;;  %v3051_v60 = vsel %vm3049_vm7, %v3039_v33, 2102212464  ;;  %v3054_v45 = vsel %vm3046_vm13, %v3033_v1, %v3036_v10  ;;  %v3058_v31 = vsel %vm3046_vm13, %v3036_v10, %v3039_v33 }
 0x605   :  { %v3052_v22 = vsel %vm3048_vm3, %v3036_v10, %v3051_v60  ;;  %v3055_v46 = vsel %vm3049_vm7, %v3042_v54, 920167782  ;;  %v3059_v6 = vsel %vm3049_vm7, %v3045_v39, 1326507024  ;;  %v3138_v7 = vshll.u32 %v5920_v48, %v3132_v16 }
 0x606   :  { %v3056_v2 = vsel %vm3048_vm3, %v3039_v33, %v3055_v46  ;;  %v3060_v51 = vsel %vm3048_vm3, %v3042_v54, %v3059_v6  ;;  %v3053_v40 = vsel %vm3047_vm4, %v3050_v18, %v3052_v22  ;;  %v3139_v56 = vshrl.u32 %v5912_v44, %v3133_v12 }
 0x607   :  { %v3057_v27 = vsel %vm3047_vm4, %v3054_v45, %v3056_v2  ;;  %v3061_v41 = vsel %vm3047_vm4, %v3058_v31, %v3060_v51  ;;  %v3137_v38 = vor.u32 %v3136_v32, %v3135_v30  ;;  %v3141_v48 = vshll.u32 %v5912_v44, %v3132_v16 }
 0x608   :  { %v5788_v29 = vmul.u32.u64.low %v5762_v34, %v3061_v41  ;;  %v5789_v21 = vmul.u32.u64.high %v5762_v34, %v3061_v41, %v5788_v29  ;;  %v5792_v53 = vmul.u32.u64.low %v5762_v34, %v3057_v27  ;;  %v5793_v63 = vmul.u32.u64.high %v5762_v34, %v3057_v27, %v5792_v53 }
 0x609   :  { %v3140_v8 = vor.u32 %v3139_v56, %v3138_v7  ;;  %v3142_v3 = vshrl.u32 %v5886_v23, %v3133_v12  ;;  %v3144_v14 = vshll.u32 %v5886_v23, %v3132_v16  ;;  %v3145_v59 = vshrl.u32 %v5887_v36, %v3133_v12 }
 0x60a   :  { %v3148_v58 = vshrl.u32 %v5945_v49, %v3133_v12  ;;  %v3069_v11 = vmul.u32 %v5762_v34, %v3053_v40  ;;  %v3134_v52 = vshrl.u32 %v5928_v35, %v3133_v12  ;;  %v3147_v17 = vshll.u32 %v5887_v36, %v3132_v16 }
 0x60b   :  { %v3143_v13 = vor.u32 %v3142_v3, %v3141_v48  ;;  %vm3071_vm8 = vc.u32 %v5789_v21, %v5792_v53  ;;  %v3072_v44 = vadd.s32 1, %v5793_v63  ;;  %v3146_v15 = vor.u32 %v3145_v59, %v3144_v14 }
 0x60c   :  { %vm3150_vm10 = vcmp.lt.s32.totalorder %v5765_v25, 1  ;;  %v3149_v23 = vor.u32 %v3148_v58, %v3147_v17  ;;  %vm3152_vm15 = vcmp.lt.s32.totalorder %v5765_v25, 3  ;;  %vm3153_vm2 = vcmp.lt.s32.totalorder %v5765_v25, 4 }
 0x60d   :  { %v3158_v49 = vsel %vm3150_vm10, %v3137_v38, %v3140_v8  ;;  %v3073_v34 = vsel %vm3071_vm8, %v3072_v44, %v5793_v63  ;;  %v3155_v62 = vsel %vm3153_vm2, %v3143_v13, 2102212464  ;;  %v3159_v35 = vsel %vm3153_vm2, %v3146_v15, 920167782 }
 0x60e   :  { %v3162_v28 = vsel %vm3150_vm10, %v3140_v8, %v3143_v13  ;;  %v3074_v4 = vadd.s32 %v3073_v34, %v3069_v11  ;;  %vm3151_vm14 = vcmp.lt.s32.totalorder %v5765_v25, 2  ;;  %v3160_v36 = vsel %vm3152_vm15, %v3143_v13, %v3159_v35 }
 0x60f   :  { %v3163_v16 = vsel %vm3153_vm2, %v3149_v23, 1326507024  ;;  %v3154_v57 = vsel %vm3150_vm10, %v3134_v52, %v3137_v38  ;;  %v3156_v20 = vsel %vm3152_vm15, %v3140_v8, %v3155_v62  ;;  %v3161_v0 = vsel %vm3151_vm14, %v3158_v49, %v3160_v36 }
 0x610   :  { %v3164_v43 = vsel %vm3152_vm15, %v3146_v15, %v3163_v16  ;;  %v3075_v5 = vadd.s32 536870912, %v3074_v4  ;;  %v5810_v47 = vmul.u32.u64.low %v3166_v26, %v3161_v0  ;;  %v5811_v9 = vmul.u32.u64.high %v3166_v26, %v3161_v0, %v5810_v47 }
 0x611   :  { %v3165_v37 = vsel %vm3151_vm14, %v3162_v28, %v3164_v43  ;;  %v3157_v10 = vsel %vm3151_vm14, %v3154_v57, %v3156_v20  ;;  %v3070_v7 = vadd.s32 %v5792_v53, %v5789_v21  ;;  %vm3106_vm7 = vweird.f32 %v5750_v61 }
 0x612   :  { %v5813_v55 = vmul.u32.u64.low %v3166_v26, %v3165_v37  ;;  %v5814_v24 = vmul.u32.u64.high %v3166_v26, %v3165_v37, %v5813_v55  ;;  %v3076_v1 = vshrl.u32 %v3075_v5, 30  ;;  %v3176_v12 = vadd.s32 1, %v5811_v9 }
 0x613   :  { %v3173_v25 = vmul.u32 %v3166_v26, %v3157_v10  ;;  %vm3210_vm2 = vweird.f32 %v5752_v50 }
 0x614   :  { %v3077_v33 = vshll.u32 %v3076_v1, 30  ;;  %vm3175_vm9 = vc.u32 %v5814_v24, %v5810_v47  ;;  %v3174_v11 = vadd.s32 %v5810_v47, %v5814_v24  ;;  %v3100_v53 = vsub.s32 4, %v3076_v1 }
 0x615   :  { %v3177_v39 = vsel %vm3175_vm9, %v3176_v12, %v5811_v9 }
 0x616   :  { %v3078_v54 = vsub.s32 %v3074_v4, %v3077_v33  ;;  %v3178_v18 = vadd.s32 %v3177_v39, %v3173_v25  ;;  %v3101_v35 = vsel %vm3016_vm6, %v3100_v53, %v3076_v1 }
 0x617   :  { %v3103_v57 = vsel %vm3015_vm11, 0, %v3101_v35 }
 0x618   :  { %v3080_v60 = vsub.s32 0, %v3078_v54  ;;  %v3179_v45 = vadd.s32 536870912, %v3178_v18  ;;  %v3107_v43 = vadd.s32 3, %v3103_v57 }
 0x61a   :  { %v3354_v31 = vmin.u32 %v3080_v60, %v3078_v54  ;;  %v3180_v22 = vshrl.u32 %v3179_v45, 30  ;;  %v3108_v47 = vand.u32 3, %v3107_v43 }
 0x61c   :  { %v3082_v46 = vclz %v3354_v31  ;;  %v3181_v6 = vshll.u32 %v3180_v22, 30  ;;  %v3204_v0 = vsub.s32 4, %v3180_v22  ;;  %vm3113_vm13 = vcmp.eq.s32.totalorder %v3108_v47, 2 }
 0x61d   :  { %vm3110_vm4 = vcmp.eq.s32.totalorder %v3108_v47, 0  ;;  %vm3109_vm3 = vcmp.lt.s32.totalorder %v3108_v47, 2 }
 0x61e   :  { %v3355_v30 = vadd.s32 4294967294, %v3082_v46  ;;  %v3182_v2 = vsub.s32 %v3178_v18, %v3181_v6  ;;  %v3205_v42 = vsel %vm3120_vm0, %v3204_v0, %v3180_v22 }
 0x61f   :  { %v3207_v24 = vsel %vm3119_vm5, 0, %v3205_v42 }
 0x620   :  { %vm3356_vm12 = vcmp.lt.s32.totalorder %v3355_v30, 0  ;;  %v3184_v32 = vsub.s32 0, %v3182_v2  ;;  %v3211_v25 = vadd.s32 3, %v3207_v24 }
 0x621   :  { %v3085_v51 = vsel %vm3356_vm12, 0, %v3355_v30 }
 0x622   :  { %v3086_v40 = vsub.s32 32, %v3085_v51  ;;  %v3090_v27 = vsub.s32 4294967266, %v3085_v51  ;;  %v3358_v41 = vmin.u32 %v3184_v32, %v3182_v2  ;;  %v3087_v56 = vshll.u32 %v3078_v54, %v3085_v51 }
 0x623   :  { %v3212_v18 = vand.u32 3, %v3211_v25 }
 0x624   :  { %v3088_v29 = vshrl.u32 %v3070_v7, %v3086_v40  ;;  %v3091_v63 = vadd.s32 127, %v3090_v27  ;;  %v3186_v38 = vclz %v3358_v41 }
 0x625   :  { %vm3217_vm8 = vcmp.eq.s32.totalorder %v3212_v18, 2  ;;  %vm3214_vm10 = vcmp.eq.s32.totalorder %v3212_v18, 0  ;;  %vm3213_vm15 = vcmp.lt.s32.totalorder %v3212_v18, 2 }
 0x626   :  { %v3089_v8 = vor.u32 %v3088_v29, %v3087_v56  ;;  %v3092_v48 = vshll.u32 %v3091_v63, 23  ;;  %v3359_v3 = vadd.s32 4294967294, %v3186_v38 }
 0x628   :  { %v3093_v14 = vor.u32 4788187, %v3092_v48  ;;  %vm3360_vm1 = vcmp.lt.s32.totalorder %v3359_v3, 0  ;;  %v3096_v58 = vcvt.s32.f32 %v3089_v8 }
 0x629   :  { %v3189_v26 = vsel %vm3360_vm1, 0, %v3359_v3 }
 0x62a   :  { %v3094_v59 = vand.u32 2147483647, %v3093_v14  ;;  %v3190_v52 = vsub.s32 32, %v3189_v26  ;;  %v3194_v13 = vsub.s32 4294967266, %v3189_v26  ;;  %v3191_v17 = vshll.u32 %v3182_v2, %v3189_v26 }
 0x62c   :  { %v3097_v21 = vmul.f32 %v3096_v58, %v3094_v59  ;;  %v3192_v44 = vshrl.u32 %v3174_v11, %v3190_v52  ;;  %v3195_v15 = vadd.s32 127, %v3194_v13 }
 0x62e   :  { %v3098_v23 = vxor.u32 2147483648, %v3097_v21  ;;  %v3193_v49 = vor.u32 %v3192_v44, %v3191_v17  ;;  %v3196_v34 = vshll.u32 %v3195_v15, 23 }
 0x630   :  { %v3099_v62 = vsel %vm3016_vm6, %v3098_v23, %v3097_v21  ;;  %v3197_v28 = vor.u32 4788187, %v3196_v34  ;;  %v3200_v16 = vcvt.s32.f32 %v3193_v49 }
 0x631   :  { %v3102_v4 = vsel %vm3015_vm11, %v5750_v61, %v3099_v62 }
 0x632   :  { %3598 = vcosq.f32 %v3102_v4  ;;  %v3198_v36 = vand.u32 2147483647, %v3197_v28 }
 0x633   :  { %3600 = vsinq.f32 %v3102_v4 }
 0x634   :  { %v3201_v20 = vmul.f32 %v3200_v16, %v3198_v36 }
 0x636   :  { %v3202_v5 = vxor.u32 2147483648, %v3201_v20 }
 0x638   :  { %v3203_v37 = vsel %vm3120_vm0, %v3202_v5, %v3201_v20 }
 0x639   :  { %v3206_v9 = vsel %vm3119_vm5, %v5752_v50, %v3203_v37 }
 0x63a   :  { %3602 = vcosq.f32 %v3206_v9 }
 0x63b   :  { %3604 = vsinq.f32 %v3206_v9 }
 0x63c   :  { %v3599_v55 = vpop.eup %3598 }
 0x63d   :  { %v3601_v1 = vpop.eup %3600  ;;  %v3114_v10 = vxor.u32 2147483648, %v3599_v55 }
 0x63e   :  { %v3111_v33 = vxor.u32 2147483648, %v3601_v1 }
 0x63f   :  { %v3115_v12 = vsel %vm3113_vm13, %v3114_v10, %v3601_v1 }
 0x640   :  { %v3112_v54 = vsel %vm3110_vm4, %v3599_v55, %v3111_v33 }
 0x641   :  { %v3116_v19 = vsel %vm3109_vm3, %v3112_v54, %v3115_v12 }
 0x642   :  { %v3117_v39 = vsel %vm3106_vm7, nan, %v3116_v19 }
 0x644   :  { %v3603_v60 = vpop.eup %3602 }
 0x645   :  { %v3605_v45 = vpop.eup %3604  ;;  %v3218_v31 = vxor.u32 2147483648, %v3603_v60 }
 0x646   :  { %v3215_v22 = vxor.u32 2147483648, %v3605_v45 }
 0x647   :  { %v3219_v46 = vsel %vm3217_vm8, %v3218_v31, %v3605_v45 }
 0x648   :  { %v3216_v6 = vsel %vm3214_vm10, %v3603_v60, %v3215_v22 }
 0x649   :  { %v3220_v30 = vsel %vm3213_vm15, %v3216_v6, %v3219_v46 }
 0x64a   :  { %v3221_v2 = vsel %vm3210_vm2, nan, %v3220_v30 }
 0x64b   :  { %v3224_v51 = vcombine.low %v3117_v39, %v3221_v2 }
 0x64d   :  { %3226 = vst [vmem:[#allocation2] sm:$0x77] %v3224_v51 }
 0x64e   :  { %3617 = shalt.err (!%p3614_p4)
}
 0x64f   :  { %s3618_s14 = scalar_lea.hbm %s5852_s9, 128 }
 0x650   :  { %p3619_p5 = scmp.ne.s32.totalorder %s5852_s9, %s3618_s14  ;;  %p3622_p6 = scmp.lt.u32.totalorder %s3618_s14, %s5852_s9 }
 0x652   :  { %p3624_p7 = pnand %p3622_p6, %p3619_p5 }
 0x654   :  { %3627 = shalt.err (!%p3624_p7)
}
 0x655   :  { %3236 = dma.vmem_to_hbm [thread:$0]  %s3234_s10, 128, %s5852_s9, [#allocation3]  }
 0x656   :  { %3628 = dma.done.wait [#allocation3], 128  }
 0x657   :  { %3629 = vsyncadd [#allocation3], 4294967168 }
 0x658   :  { %3240 = vsyncpa [#allocation3], 1 }

</bundles_post_ra>
